<compile_context>
chip_gen: v7x
topology: tpu7x:2x2x1
jax: 0.10.0
libtpu: 0.0.40
codegen_flags: <defaults>
</compile_context>

<pallas_src>
import functools

import jax
import jax.numpy as jnp
from jax import lax
from jax.experimental import pallas as pl
from jax.experimental.pallas import tpu as pltpu


def _hidistance_tile_kernel(xr_ref, xc_ref, rowp_ref, colp_ref, out_ref,
                            s_all, s_bin, s_mul, s_sb, *, margin):
    j = pl.program_id(1)
    tm = xr_ref.shape[0]
    tn = xc_ref.shape[0]
    cw = s_all.shape[1]          # accumulator lane width (128, or tn if tn < 128)
    nchunks = tn // cw

    # ---- init per-row accumulators at the first column block ----
    @pl.when(j == 0)
    def _():
        s_all[...] = jnp.zeros_like(s_all)
        s_bin[...] = jnp.zeros_like(s_bin)
        s_mul[...] = jnp.zeros_like(s_mul)
        s_sb[...] = jnp.zeros_like(s_sb)

    # ---- (TM, TN) gram tile on the MXU (contract feature dims, no transpose) --
    gram = lax.dot_general(xr_ref[...], xc_ref[...],
                           dimension_numbers=(((1,), (1,)), ((), ())),
                           preferred_element_type=jnp.float32)

    # Row-side per-sample scalars, broadcast ONCE per tile (hoisted out of the
    # chunk loop; JAX does not CSE broadcast_in_dim).
    b_row = rowp_ref[:, 0:1]            # [TM, 1] binary label
    lab_row = rowp_ref[:, 1:2]          # [TM, 1] multi-class label
    xn_row = rowp_ref[:, 3:4]           # [TM, 1] squared feature norm (f32)
    b_row_b = jnp.broadcast_to(b_row, (tm, cw))
    lab_row_b = jnp.broadcast_to(lab_row, (tm, cw))
    xn_row_b = jnp.broadcast_to(xn_row, (tm, cw))
    ben_row_b = b_row_b == 0.0

    # ---- per-128-lane-chunk accumulation (pure VPU adds; no lane reduce) ----
    # NOTE: the diagonal entry of dist (clamped, ~1e-10) is NOT zeroed here; it
    # cancels exactly in the derived other_mal / bin_neg sums and is negligible
    # (<= f32 matmul rounding of the self-distance) in same_mal_fam / same_ben.
    for c in range(nchunks):
        sl = slice(c * cw, (c + 1) * cw)
        b_c = colp_ref[0:1, sl]         # [1, cw]
        lab_c = colp_ref[1:2, sl]       # [1, cw]
        xn_c = colp_ref[2:3, sl]        # [1, cw]

        d = jnp.maximum(xn_row_b + xn_c - 2.0 * gram[:, sl], 1e-10)  # [TM, cw]

        bin_eq = b_row_b == b_c                      # same binary label
        mul_eq = lab_row_b == lab_c                  # same multi-class label
        sb = ben_row_b & (b_c == 0.0)                # both benign

        s_all[...] += d
        s_bin[...] += jnp.where(bin_eq, d, 0.0)
        s_mul[...] += jnp.where(mul_eq, d, 0.0)
        s_sb[...] += jnp.where(sb, d, 0.0)

    # ---- finalize this row block at the last column block ----
    @pl.when(j == pl.num_programs(1) - 1)
    def _():
        # One cross-lane reduce per accumulator, once per row block.
        sum_all = jnp.sum(s_all[...], axis=1, keepdims=True)
        sum_bin = jnp.sum(s_bin[...], axis=1, keepdims=True)
        sum_mul = jnp.sum(s_mul[...], axis=1, keepdims=True)
        sum_sb = jnp.sum(s_sb[...], axis=1, keepdims=True)

        # Exact, diagonal-excluded pair counts (label-only, wrapper-precomputed).
        cnt_sb = rowp_ref[:, 4:5]
        cnt_om = rowp_ref[:, 5:6]
        cnt_sm = rowp_ref[:, 6:7]
        cnt_bn = rowp_ref[:, 7:8]

        # Masked distance row-sums derived by linear mask algebra.
        sum_om = sum_bin - sum_mul
        sum_sm = sum_mul - sum_sb
        sum_bn = sum_all - sum_bin

        t_sb = jnp.maximum(sum_sb - cnt_sb * margin, 0.0)
        t_om = jnp.maximum(sum_om - cnt_om * margin, 0.0)
        t_bn = jnp.maximum(cnt_bn * (2.0 * margin) - sum_bn, 0.0)

        per = (t_sb * pl.reciprocal(jnp.maximum(cnt_sb, 1.0), approx=False)
               + t_om * pl.reciprocal(jnp.maximum(cnt_om, 1.0), approx=False)
               + sum_sm * pl.reciprocal(jnp.maximum(cnt_sm, 1.0), approx=False)
               + t_bn * pl.reciprocal(jnp.maximum(cnt_bn, 1.0), approx=False))

        # Binary cross-entropy for this row block (torch clamps log at -100).
        p = rowp_ref[:, 2:3]
        logp = jnp.maximum(jnp.log(p), -100.0)
        log1mp = jnp.maximum(jnp.log(1.0 - p), -100.0)
        bce = -(b_row * logp + (1.0 - b_row) * log1mp)

        # Single lane-dense output slab: supcon in lanes [0,64), bce in [64,128).
        lane = lax.broadcasted_iota(jnp.int32, out_ref.shape, 1)
        out_ref[...] = jnp.where(lane < 64, per, bce)


def _pick_tm(b):
    for t in (256, 128, 64, 32, 16, 8):
        if b % t == 0 and b // t >= 2:   # keep >=2 row blocks for megacore / v7x
            return t
    return b


def _pick_tn(b, d, feat_bytes):
    # Fetch ALL column features once per row block if the (B, D) slab is small
    # (kills the dominant column re-streaming HBM term); otherwise tile.
    if b * max(d, 128) * feat_bytes <= 8 * 1024 * 1024:
        return b
    for t in (512, 256, 128):
        if b % t == 0:
            return t
    return b


def hidistance_xent_loss(xent_lambda, y_bin_pred, y_bin_batch, features, labels,
                         margin=10.0, block_m=None, block_n=None,
                         compute_dtype=None):
    """HiDistanceXentLoss forward (reduce='mean', sample_reduce='mean',
    weight=None, split=None).  Returns (loss, supcon_loss, xent_bin_loss)."""
    b, d_feat = features.shape
    feat = features if compute_dtype is None else features.astype(compute_dtype)

    binlab = y_bin_batch[:, 1].astype(jnp.float32)                        # [B]
    pred = y_bin_pred[:, 1].astype(jnp.float32)                           # [B]
    lab = labels.reshape(-1).astype(jnp.float32)                          # [B]
    xnorm2 = jnp.sum(jnp.square(features.astype(jnp.float32)), axis=1)    # [B]

    # ---- label-only pair counts (diagonal excluded), computed in the wrapper --
    ben = binlab == 0.0
    n_ben = jnp.sum(ben.astype(jnp.float32))
    c_bin_incl = jnp.where(ben, n_ben, float(b) - n_ben)                  # incl. self
    # O(B^2) boolean compare in plain XLA (D-times cheaper than the kernel; fine).
    c_mul_incl = jnp.sum((lab[:, None] == lab[None, :]).astype(jnp.float32), axis=1)
    cnt_bin = c_bin_incl - 1.0
    cnt_mul = c_mul_incl - 1.0
    cnt_sb = jnp.where(ben, n_ben - 1.0, 0.0)        # same-benign pairs
    cnt_om = cnt_bin - cnt_mul                       # other-malware pairs
    cnt_sm = cnt_mul - cnt_sb                        # same malware family pairs
    cnt_bn = float(b) - c_bin_incl                   # different binary label

    # Lane-packed per-sample scalars: row form [B, 8] and lane-major [8, B].
    row_pack = jnp.stack([binlab, lab, pred, xnorm2,
                          cnt_sb, cnt_om, cnt_sm, cnt_bn], axis=1)        # [B, 8]
    zeros = jnp.zeros_like(binlab)
    col_pack = jnp.stack([binlab, lab, xnorm2,
                          zeros, zeros, zeros, zeros, zeros], axis=0)     # [8, B]

    feat_bytes = jnp.dtype(feat.dtype).itemsize
    tm = block_m if block_m is not None else _pick_tm(b)
    tn = block_n if block_n is not None else _pick_tn(b, d_feat, feat_bytes)
    assert b % tm == 0 and b % tn == 0, (b, tm, tn)
    cw = 128 if tn % 128 == 0 else tn                # accumulator lane width

    kernel = functools.partial(_hidistance_tile_kernel, margin=float(margin))

    # Right-sized VMEM budget (double-buffered feature tiles + output block +
    # accumulators + gram/dist/mask temporaries), clamped to [16, 64] MiB.
    est = (2 * (tm + tn) * max(d_feat, 128) * feat_bytes
           + 2 * tm * 128 * 4
           + 4 * tm * cw * 4
           + 8 * tm * tn * 4)
    vmem_limit = int(min(64 * 1024 * 1024, max(16 * 1024 * 1024, 2 * est)))

    grid_spec = pltpu.PrefetchScalarGridSpec(
        num_scalar_prefetch=0,
        grid=(b // tm, b // tn),
        in_specs=[
            pl.BlockSpec((tm, d_feat), lambda i, j: (i, 0)),   # row feature tile
            pl.BlockSpec((tn, d_feat), lambda i, j: (j, 0)),   # col feature tile
            pl.BlockSpec((tm, 8), lambda i, j: (i, 0)),        # row scalar pack
            pl.BlockSpec((8, tn), lambda i, j: (0, j)),        # col scalar pack
        ],
        out_specs=pl.BlockSpec((tm, 128), lambda i, j: (i, 0)),
        scratch_shapes=[pltpu.VMEM((tm, cw), jnp.float32) for _ in range(4)],
    )

    out = pl.pallas_call(
        kernel,
        grid_spec=grid_spec,
        out_shape=jax.ShapeDtypeStruct((b, 128), jnp.float32),
        compiler_params=pltpu.CompilerParams(
            dimension_semantics=("parallel", "arbitrary"),
            vmem_limit_bytes=vmem_limit),
    )(feat, feat, row_pack, col_pack)

    supcon = jnp.mean(out[:, 0])
    xent = jnp.mean(out[:, 64])
    loss = supcon + xent_lambda * xent
    return loss, supcon, xent


def _reference(xent_lambda, y_bin_pred, y_bin_batch, features, labels, margin=10.0):
    """Pure-JAX reference mirroring the PyTorch forward (weight=None, split=None)."""
    b = features.shape[0]
    x = features.astype(jnp.float32)
    bl = y_bin_batch[:, 1].reshape(b, 1).astype(jnp.float32)
    lab = labels.reshape(b, 1).astype(jnp.float32)
    p = y_bin_pred[:, 1].astype(jnp.float32)

    xnorm2 = jnp.sum(x * x, axis=1, keepdims=True)
    gram = jnp.dot(x, x.T, precision=lax.Precision.HIGHEST)
    dist = jnp.maximum(xnorm2 + xnorm2.T - 2.0 * gram, 1e-10)
    binary_mask = (bl == bl.T).astype(jnp.float32)
    multi_mask = (lab == lab.T).astype(jnp.float32)
    other_mal = binary_mask - multi_mask
    ben = (bl == 0.0).astype(jnp.float32)
    same_ben = ben @ ben.T
    same_mal_fam = multi_mask - same_ben
    bin_neg = 1.0 - binary_mask
    diag = 1.0 - jnp.eye(b, dtype=jnp.float32)
    other_mal, same_ben, same_mal_fam = other_mal * diag, same_ben * diag, same_mal_fam * diag

    rs = lambda m: jnp.sum(m, axis=1)
    s_sb = jnp.maximum(rs(same_ben * dist) - rs(same_ben) * margin, 0.0)
    s_om = jnp.maximum(rs(other_mal * dist) - rs(other_mal) * margin, 0.0)
    s_sm = rs(same_mal_fam * dist)
    s_bn = jnp.maximum(rs(bin_neg) * (2.0 * margin) - rs(bin_neg * dist), 0.0)
    per = (s_sb / jnp.maximum(rs(same_ben), 1.0)
           + s_om / jnp.maximum(rs(other_mal), 1.0)
           + s_sm / jnp.maximum(rs(same_mal_fam), 1.0)
           + s_bn / jnp.maximum(rs(bin_neg), 1.0))
    sup = jnp.mean(per)
    y = bl[:, 0]
    bce = jnp.mean(-(y * jnp.maximum(jnp.log(p), -100.0)
                     + (1.0 - y) * jnp.maximum(jnp.log(1.0 - p), -100.0)))
    return sup + xent_lambda * bce, sup, bce


if __name__ == "__main__":
    key = jax.random.PRNGKey(0)
    B, D = 256, 32
    k_feat, k_lab, k_logit = jax.random.split(key, 3)

    features = jax.random.normal(k_feat, (B, D), dtype=jnp.float32)
    # multi-class labels: 0 = benign, 1..3 = malware families
    labels = jax.random.randint(k_lab, (B,), 0, 4)
    binary = (labels > 0).astype(jnp.float32)                       # [B]
    y_bin_batch = jnp.stack([1.0 - binary, binary], axis=1)         # one-hot [B, 2]
    logits = jax.random.normal(k_logit, (B, 2), dtype=jnp.float32)
    y_bin_pred = jax.nn.softmax(logits, axis=1)                     # probabilities [B, 2]

    xent_lambda = 0.5
    margin = 10.0

    ref_loss, ref_sup, ref_xent = _reference(
        xent_lambda, y_bin_pred, y_bin_batch, features, labels, margin=margin)

    # f32 path, explicit 128x128 tiles: exercises multi-column accumulation,
    # the init/accumulate/finalize phasing, and diagonal & off-diagonal tiles.
    # (sup/loss tolerance 1e-3 absorbs MXU f32-matmul multi-pass rounding.)
    loss, sup, xent = hidistance_xent_loss(
        xent_lambda, y_bin_pred, y_bin_batch, features, labels,
        margin=margin, block_m=128, block_n=128)
    jax.block_until_ready((loss, sup, xent))
    assert jnp.allclose(xent, ref_xent, rtol=1e-5, atol=1e-5), (xent, ref_xent)
    assert jnp.allclose(sup, ref_sup, rtol=1e-3, atol=1e-3), (sup, ref_sup)
    assert jnp.allclose(loss, ref_loss, rtol=1e-3, atol=1e-3), (loss, ref_loss)

    # bf16-feature path with default tiling (TN = B: column features fetched
    # once; two 128-lane chunks per tile).  Loose tolerance for bf16 gram.
    loss2, sup2, xent2 = hidistance_xent_loss(
        xent_lambda, y_bin_pred, y_bin_batch, features, labels,
        margin=margin, compute_dtype=jnp.bfloat16)
    jax.block_until_ready((loss2, sup2, xent2))
    assert jnp.allclose(loss2, ref_loss, rtol=3e-2, atol=3e-2), (loss2, ref_loss)

    print("KERNEL_OK")
</pallas_src>

<mosaic_0001>
module attributes {stable_mosaic.version = 11 : i64} {
  func.func @_hidistance_tile_kernel(%arg0: i32, %arg1: i32, %arg2: memref<128x32xf32, #tpu.memory_space<vmem>>, %arg3: memref<128x32xf32, #tpu.memory_space<vmem>>, %arg4: memref<128x8xf32, #tpu.memory_space<vmem>>, %arg5: memref<8x128xf32, #tpu.memory_space<vmem>>, %arg6: memref<128x128xf32, #tpu.memory_space<vmem>>, %arg7: memref<128x128xf32, #tpu.memory_space<vmem>>, %arg8: memref<128x128xf32, #tpu.memory_space<vmem>>, %arg9: memref<128x128xf32, #tpu.memory_space<vmem>>, %arg10: memref<128x128xf32, #tpu.memory_space<vmem>>) attributes {dimension_semantics = [#tpu.dimension_semantics<parallel>, #tpu.dimension_semantics<arbitrary>], iteration_bounds = array<i64: 2, 2>, scalar_prefetch = 0 : i64, scratch_operands = 4 : i64, tpu.core_type = #tpu.core_type<tc>, window_params = [{transform_indices = @transform_0, window_bounds = array<i64: 128, 32>}, {transform_indices = @transform_1, window_bounds = array<i64: 128, 32>}, {transform_indices = @transform_2, window_bounds = array<i64: 128, 8>}, {transform_indices = @transform_3, window_bounds = array<i64: 8, 128>}, {transform_indices = @transform_4, window_bounds = array<i64: 128, 128>}]} {
    %c0_i32 = arith.constant 0 : i32
    %0 = arith.cmpi eq, %arg1, %c0_i32 : i32
    %1 = arith.extui %0 : i1 to i32
    %c0_i32_0 = arith.constant 0 : i32
    %2 = arith.cmpi ne, %1, %c0_i32_0 : i32
    scf.if %2 {
      %cst_37 = arith.constant 0.000000e+00 : f32
      %56 = vector.broadcast %cst_37 : f32 to vector<128x128xf32>
      %c0_38 = arith.constant 0 : index
      %c0_39 = arith.constant 0 : index
      %57 = vector.load %arg7[%c0_38, %c0_39] : memref<128x128xf32, #tpu.memory_space<vmem>>, vector<128x128xf32>
      tpu.vector_store %arg7[%c0_38, %c0_39], %56 {strides = array<i32>} : memref<128x128xf32, #tpu.memory_space<vmem>>, vector<128x128xf32>,
      %cst_40 = arith.constant 0.000000e+00 : f32
      %58 = vector.broadcast %cst_40 : f32 to vector<128x128xf32>
      %c0_41 = arith.constant 0 : index
      %c0_42 = arith.constant 0 : index
      %59 = vector.load %arg8[%c0_41, %c0_42] : memref<128x128xf32, #tpu.memory_space<vmem>>, vector<128x128xf32>
      tpu.vector_store %arg8[%c0_41, %c0_42], %58 {strides = array<i32>} : memref<128x128xf32, #tpu.memory_space<vmem>>, vector<128x128xf32>,
      %cst_43 = arith.constant 0.000000e+00 : f32
      %60 = vector.broadcast %cst_43 : f32 to vector<128x128xf32>
      %c0_44 = arith.constant 0 : index
      %c0_45 = arith.constant 0 : index
      %61 = vector.load %arg9[%c0_44, %c0_45] : memref<128x128xf32, #tpu.memory_space<vmem>>, vector<128x128xf32>
      tpu.vector_store %arg9[%c0_44, %c0_45], %60 {strides = array<i32>} : memref<128x128xf32, #tpu.memory_space<vmem>>, vector<128x128xf32>,
      %cst_46 = arith.constant 0.000000e+00 : f32
      %62 = vector.broadcast %cst_46 : f32 to vector<128x128xf32>
      %c0_47 = arith.constant 0 : index
      %c0_48 = arith.constant 0 : index
      %63 = vector.load %arg10[%c0_47, %c0_48] : memref<128x128xf32, #tpu.memory_space<vmem>>, vector<128x128xf32>
      tpu.vector_store %arg10[%c0_47, %c0_48], %62 {strides = array<i32>} : memref<128x128xf32, #tpu.memory_space<vmem>>, vector<128x128xf32>,
    } else {
    }
    %c0 = arith.constant 0 : index
    %c0_1 = arith.constant 0 : index
    %3 = vector.load %arg2[%c0, %c0_1] : memref<128x32xf32, #tpu.memory_space<vmem>>, vector<128x32xf32>
    %c0_2 = arith.constant 0 : index
    %c0_3 = arith.constant 0 : index
    %4 = vector.load %arg3[%c0_2, %c0_3] : memref<128x32xf32, #tpu.memory_space<vmem>>, vector<128x32xf32>
    %cst = arith.constant dense<0.000000e+00> : vector<128x128xf32>
    %5 = tpu.matmul %3, %4, %cst {dimension_numbers = #tpu.dot_dimension_numbers<[1], [1], [0], [0], [0, 0, 1, 0], [], []>} : vector<128x32xf32>, vector<128x32xf32>, vector<128x128xf32> -> vector<128x128xf32>
    %c0_4 = arith.constant 0 : index
    %c0_5 = arith.constant 0 : index
    %6 = vector.load %arg4[%c0_4, %c0_5] : memref<128x8xf32, #tpu.memory_space<vmem>>, vector<128x1xf32>
    %c0_6 = arith.constant 0 : index
    %c1 = arith.constant 1 : index
    %7 = vector.load %arg4[%c0_6, %c1] : memref<128x8xf32, #tpu.memory_space<vmem>>, vector<128x1xf32>
    %c0_7 = arith.constant 0 : index
    %c3 = arith.constant 3 : index
    %8 = vector.load %arg4[%c0_7, %c3] : memref<128x8xf32, #tpu.memory_space<vmem>>, vector<128x1xf32>
    %9 = vector.shape_cast %6 : vector<128x1xf32> to vector<128x1xf32>
    %10 = vector.broadcast %9 : vector<128x1xf32> to vector<128x128xf32>
    %11 = vector.shape_cast %7 : vector<128x1xf32> to vector<128x1xf32>
    %12 = vector.broadcast %11 : vector<128x1xf32> to vector<128x128xf32>
    %13 = vector.shape_cast %8 : vector<128x1xf32> to vector<128x1xf32>
    %14 = vector.broadcast %13 : vector<128x1xf32> to vector<128x128xf32>
    %cst_8 = arith.constant 0.000000e+00 : f32
    %15 = vector.broadcast %cst_8 : f32 to vector<128x128xf32>
    %16 = arith.cmpf oeq, %10, %15 : vector<128x128xf32>
    %c0_9 = arith.constant 0 : index
    %c0_10 = arith.constant 0 : index
    %17 = vector.load %arg5[%c0_9, %c0_10] : memref<8x128xf32, #tpu.memory_space<vmem>>, vector<1x128xf32>
    %c1_11 = arith.constant 1 : index
    %c0_12 = arith.constant 0 : index
    %18 = vector.load %arg5[%c1_11, %c0_12] : memref<8x128xf32, #tpu.memory_space<vmem>>, vector<1x128xf32>
    %c2 = arith.constant 2 : index
    %c0_13 = arith.constant 0 : index
    %19 = vector.load %arg5[%c2, %c0_13] : memref<8x128xf32, #tpu.memory_space<vmem>>, vector<1x128xf32>
    %20 = vector.broadcast %19 : vector<1x128xf32> to vector<128x128xf32>
    %21 = arith.addf %14, %20 : vector<128x128xf32>
    %cst_14 = arith.constant 2.000000e+00 : f32
    %22 = vector.broadcast %cst_14 : f32 to vector<128x128xf32>
    %23 = arith.mulf %22, %5 : vector<128x128xf32>
    %24 = arith.subf %21, %23 : vector<128x128xf32>
    %cst_15 = arith.constant 1.000000e-10 : f32
    %25 = vector.broadcast %cst_15 : f32 to vector<128x128xf32>
    %26 = arith.maximumf %24, %25 : vector<128x128xf32>
    %27 = vector.broadcast %17 : vector<1x128xf32> to vector<128x128xf32>
    %28 = arith.cmpf oeq, %10, %27 : vector<128x128xf32>
    %29 = vector.broadcast %18 : vector<1x128xf32> to vector<128x128xf32>
    %30 = arith.cmpf oeq, %12, %29 : vector<128x128xf32>
    %cst_16 = arith.constant 0.000000e+00 : f32
    %31 = vector.broadcast %cst_16 : f32 to vector<1x128xf32>
    %32 = arith.cmpf oeq, %17, %31 : vector<1x128xf32>
    %33 = vector.broadcast %32 : vector<1x128xi1> to vector<128x128xi1>
    %34 = arith.andi %16, %33 : vector<128x128xi1>
    %c0_17 = arith.constant 0 : index
    %c0_18 = arith.constant 0 : index
    %35 = vector.load %arg7[%c0_17, %c0_18] : memref<128x128xf32, #tpu.memory_space<vmem>>, vector<128x128xf32>
    %36 = arith.addf %35, %26 : vector<128x128xf32>
    %c0_19 = arith.constant 0 : index
    %c0_20 = arith.constant 0 : index
    %37 = vector.load %arg7[%c0_19, %c0_20] : memref<128x128xf32, #tpu.memory_space<vmem>>, vector<128x128xf32>
    tpu.vector_store %arg7[%c0_19, %c0_20], %36 {strides = array<i32>} : memref<128x128xf32, #tpu.memory_space<vmem>>, vector<128x128xf32>,
    %c0_21 = arith.constant 0 : index
    %c0_22 = arith.constant 0 : index
    %38 = vector.load %arg8[%c0_21, %c0_22] : memref<128x128xf32, #tpu.memory_space<vmem>>, vector<128x128xf32>
    %cst_23 = arith.constant 0.000000e+00 : f32
    %39 = vector.broadcast %cst_23 : f32 to vector<128x128xf32>
    %40 = arith.select %28, %26, %39 : vector<128x128xi1>, vector<128x128xf32>
    %41 = arith.addf %38, %40 : vector<128x128xf32>
    %c0_24 = arith.constant 0 : index
    %c0_25 = arith.constant 0 : index
    %42 = vector.load %arg8[%c0_24, %c0_25] : memref<128x128xf32, #tpu.memory_space<vmem>>, vector<128x128xf32>
    tpu.vector_store %arg8[%c0_24, %c0_25], %41 {strides = array<i32>} : memref<128x128xf32, #tpu.memory_space<vmem>>, vector<128x128xf32>,
    %c0_26 = arith.constant 0 : index
    %c0_27 = arith.constant 0 : index
    %43 = vector.load %arg9[%c0_26, %c0_27] : memref<128x128xf32, #tpu.memory_space<vmem>>, vector<128x128xf32>
    %cst_28 = arith.constant 0.000000e+00 : f32
    %44 = vector.broadcast %cst_28 : f32 to vector<128x128xf32>
    %45 = arith.select %30, %26, %44 : vector<128x128xi1>, vector<128x128xf32>
    %46 = arith.addf %43, %45 : vector<128x128xf32>
    %c0_29 = arith.constant 0 : index
    %c0_30 = arith.constant 0 : index
    %47 = vector.load %arg9[%c0_29, %c0_30] : memref<128x128xf32, #tpu.memory_space<vmem>>, vector<128x128xf32>
    tpu.vector_store %arg9[%c0_29, %c0_30], %46 {strides = array<i32>} : memref<128x128xf32, #tpu.memory_space<vmem>>, vector<128x128xf32>,
    %c0_31 = arith.constant 0 : index
    %c0_32 = arith.constant 0 : index
    %48 = vector.load %arg10[%c0_31, %c0_32] : memref<128x128xf32, #tpu.memory_space<vmem>>, vector<128x128xf32>
    %cst_33 = arith.constant 0.000000e+00 : f32
    %49 = vector.broadcast %cst_33 : f32 to vector<128x128xf32>
    %50 = arith.select %34, %26, %49 : vector<128x128xi1>, vector<128x128xf32>
    %51 = arith.addf %48, %50 : vector<128x128xf32>
    %c0_34 = arith.constant 0 : index
    %c0_35 = arith.constant 0 : index
    %52 = vector.load %arg10[%c0_34, %c0_35] : memref<128x128xf32, #tpu.memory_space<vmem>>, vector<128x128xf32>
    tpu.vector_store %arg10[%c0_34, %c0_35], %51 {strides = array<i32>} : memref<128x128xf32, #tpu.memory_space<vmem>>, vector<128x128xf32>,
    %c1_i32 = arith.constant 1 : i32
    %53 = arith.cmpi eq, %arg1, %c1_i32 : i32
    %54 = arith.extui %53 : i1 to i32
    %c0_i32_36 = arith.constant 0 : i32
    %55 = arith.cmpi ne, %54, %c0_i32_36 : i32
    scf.if %55 {
      %c0_37 = arith.constant 0 : index
      %c0_38 = arith.constant 0 : index
      %56 = vector.load %arg7[%c0_37, %c0_38] : memref<128x128xf32, #tpu.memory_space<vmem>>, vector<128x128xf32>
      %cst_39 = arith.constant dense<0.000000e+00> : vector<128xf32>
      %57 = vector.multi_reduction <add>, %56, %cst_39 [1] : vector<128x128xf32> to vector<128xf32>
      %58 = vector.shape_cast %57 : vector<128xf32> to vector<128x1xf32>
      %c0_40 = arith.constant 0 : index
      %c0_41 = arith.constant 0 : index
      %59 = vector.load %arg8[%c0_40, %c0_41] : memref<128x128xf32, #tpu.memory_space<vmem>>, vector<128x128xf32>
      %cst_42 = arith.constant dense<0.000000e+00> : vector<128xf32>
      %60 = vector.multi_reduction <add>, %59, %cst_42 [1] : vector<128x128xf32> to vector<128xf32>
      %61 = vector.shape_cast %60 : vector<128xf32> to vector<128x1xf32>
      %c0_43 = arith.constant 0 : index
      %c0_44 = arith.constant 0 : index
      %62 = vector.load %arg9[%c0_43, %c0_44] : memref<128x128xf32, #tpu.memory_space<vmem>>, vector<128x128xf32>
      %cst_45 = arith.constant dense<0.000000e+00> : vector<128xf32>
      %63 = vector.multi_reduction <add>, %62, %cst_45 [1] : vector<128x128xf32> to vector<128xf32>
      %64 = vector.shape_cast %63 : vector<128xf32> to vector<128x1xf32>
      %c0_46 = arith.constant 0 : index
      %c0_47 = arith.constant 0 : index
      %65 = vector.load %arg10[%c0_46, %c0_47] : memref<128x128xf32, #tpu.memory_space<vmem>>, vector<128x128xf32>
      %cst_48 = arith.constant dense<0.000000e+00> : vector<128xf32>
      %66 = vector.multi_reduction <add>, %65, %cst_48 [1] : vector<128x128xf32> to vector<128xf32>
      %67 = vector.shape_cast %66 : vector<128xf32> to vector<128x1xf32>
      %c0_49 = arith.constant 0 : index
      %c4 = arith.constant 4 : index
      %68 = vector.load %arg4[%c0_49, %c4] : memref<128x8xf32, #tpu.memory_space<vmem>>, vector<128x1xf32>
      %c0_50 = arith.constant 0 : index
      %c5 = arith.constant 5 : index
      %69 = vector.load %arg4[%c0_50, %c5] : memref<128x8xf32, #tpu.memory_space<vmem>>, vector<128x1xf32>
      %c0_51 = arith.constant 0 : index
      %c6 = arith.constant 6 : index
      %70 = vector.load %arg4[%c0_51, %c6] : memref<128x8xf32, #tpu.memory_space<vmem>>, vector<128x1xf32>
      %c0_52 = arith.constant 0 : index
      %c7 = arith.constant 7 : index
      %71 = vector.load %arg4[%c0_52, %c7] : memref<128x8xf32, #tpu.memory_space<vmem>>, vector<128x1xf32>
      %72 = arith.subf %61, %64 : vector<128x1xf32>
      %73 = arith.subf %64, %67 : vector<128x1xf32>
      %74 = arith.subf %58, %61 : vector<128x1xf32>
      %cst_53 = arith.constant 1.000000e+01 : f32
      %75 = vector.broadcast %cst_53 : f32 to vector<128x1xf32>
      %76 = arith.mulf %68, %75 : vector<128x1xf32>
      %77 = arith.subf %67, %76 : vector<128x1xf32>
      %cst_54 = arith.constant 0.000000e+00 : f32
      %78 = vector.broadcast %cst_54 : f32 to vector<128x1xf32>
      %79 = arith.maximumf %77, %78 : vector<128x1xf32>
      %cst_55 = arith.constant 1.000000e+01 : f32
      %80 = vector.broadcast %cst_55 : f32 to vector<128x1xf32>
      %81 = arith.mulf %69, %80 : vector<128x1xf32>
      %82 = arith.subf %72, %81 : vector<128x1xf32>
      %cst_56 = arith.constant 0.000000e+00 : f32
      %83 = vector.broadcast %cst_56 : f32 to vector<128x1xf32>
      %84 = arith.maximumf %82, %83 : vector<128x1xf32>
      %cst_57 = arith.constant 2.000000e+01 : f32
      %85 = vector.broadcast %cst_57 : f32 to vector<128x1xf32>
      %86 = arith.mulf %71, %85 : vector<128x1xf32>
      %87 = arith.subf %86, %74 : vector<128x1xf32>
      %cst_58 = arith.constant 0.000000e+00 : f32
      %88 = vector.broadcast %cst_58 : f32 to vector<128x1xf32>
      %89 = arith.maximumf %87, %88 : vector<128x1xf32>
      %cst_59 = arith.constant 1.000000e+00 : f32
      %90 = vector.broadcast %cst_59 : f32 to vector<128x1xf32>
      %91 = arith.maximumf %68, %90 : vector<128x1xf32>
      %92 = tpu.reciprocal %91 : vector<128x1xf32> -> vector<128x1xf32>
      %93 = arith.mulf %79, %92 : vector<128x1xf32>
      %cst_60 = arith.constant 1.000000e+00 : f32
      %94 = vector.broadcast %cst_60 : f32 to vector<128x1xf32>
      %95 = arith.maximumf %69, %94 : vector<128x1xf32>
      %96 = tpu.reciprocal %95 : vector<128x1xf32> -> vector<128x1xf32>
      %97 = arith.mulf %84, %96 : vector<128x1xf32>
      %98 = arith.addf %93, %97 : vector<128x1xf32>
      %cst_61 = arith.constant 1.000000e+00 : f32
      %99 = vector.broadcast %cst_61 : f32 to vector<128x1xf32>
      %100 = arith.maximumf %70, %99 : vector<128x1xf32>
      %101 = tpu.reciprocal %100 : vector<128x1xf32> -> vector<128x1xf32>
      %102 = arith.mulf %73, %101 : vector<128x1xf32>
      %103 = arith.addf %98, %102 : vector<128x1xf32>
      %cst_62 = arith.constant 1.000000e+00 : f32
      %104 = vector.broadcast %cst_62 : f32 to vector<128x1xf32>
      %105 = arith.maximumf %71, %104 : vector<128x1xf32>
      %106 = tpu.reciprocal %105 : vector<128x1xf32> -> vector<128x1xf32>
      %107 = arith.mulf %89, %106 : vector<128x1xf32>
      %108 = arith.addf %103, %107 : vector<128x1xf32>
      %c0_63 = arith.constant 0 : index
      %c2_64 = arith.constant 2 : index
      %109 = vector.load %arg4[%c0_63, %c2_64] : memref<128x8xf32, #tpu.memory_space<vmem>>, vector<128x1xf32>
      %110 = math.log %109 : vector<128x1xf32>
      %cst_65 = arith.constant -1.000000e+02 : f32
      %111 = vector.broadcast %cst_65 : f32 to vector<128x1xf32>
      %112 = arith.maximumf %110, %111 : vector<128x1xf32>
      %cst_66 = arith.constant 1.000000e+00 : f32
      %113 = vector.broadcast %cst_66 : f32 to vector<128x1xf32>
      %114 = arith.subf %113, %109 : vector<128x1xf32>
      %115 = math.log %114 : vector<128x1xf32>
      %cst_67 = arith.constant -1.000000e+02 : f32
      %116 = vector.broadcast %cst_67 : f32 to vector<128x1xf32>
      %117 = arith.maximumf %115, %116 : vector<128x1xf32>
      %118 = arith.mulf %6, %112 : vector<128x1xf32>
      %cst_68 = arith.constant 1.000000e+00 : f32
      %119 = vector.broadcast %cst_68 : f32 to vector<128x1xf32>
      %120 = arith.subf %119, %6 : vector<128x1xf32>
      %121 = arith.mulf %120, %117 : vector<128x1xf32>
      %122 = arith.addf %118, %121 : vector<128x1xf32>
      %cst_69 = arith.constant 0.000000e+00 : f32
      %123 = vector.broadcast %cst_69 : f32 to vector<128x1xf32>
      %124 = arith.subf %123, %122 : vector<128x1xf32>
      %125 = tpu.iota {dimensions = array<i32: 1>} : vector<128x128xi32>
      %c64_i32 = arith.constant 64 : i32
      %126 = vector.broadcast %c64_i32 : i32 to vector<128x128xi32>
      %127 = arith.cmpi slt, %125, %126 : vector<128x128xi32>
      %128 = vector.shape_cast %108 : vector<128x1xf32> to vector<128x1xf32>
      %129 = vector.broadcast %128 : vector<128x1xf32> to vector<128x128xf32>
      %130 = vector.shape_cast %124 : vector<128x1xf32> to vector<128x1xf32>
      %131 = vector.broadcast %130 : vector<128x1xf32> to vector<128x128xf32>
      %132 = arith.select %127, %129, %131 : vector<128x128xi1>, vector<128x128xf32>
      %c0_70 = arith.constant 0 : index
      %c0_71 = arith.constant 0 : index
      %133 = vector.load %arg6[%c0_70, %c0_71] : memref<128x128xf32, #tpu.memory_space<vmem>>, vector<128x128xf32>
      tpu.vector_store %arg6[%c0_70, %c0_71], %132 {strides = array<i32>} : memref<128x128xf32, #tpu.memory_space<vmem>>, vector<128x128xf32>,
    } else {
    }
    return
  }
  func.func @transform_0(%arg0: i32, %arg1: i32) -> (i32, i32) {
    %c0_i32 = arith.constant 0 : i32
    %c0_i32_0 = arith.constant 0 : i32
    return %arg0, %c0_i32 : i32, i32
  }
  func.func @transform_1(%arg0: i32, %arg1: i32) -> (i32, i32) {
    %c0_i32 = arith.constant 0 : i32
    %c0_i32_0 = arith.constant 0 : i32
    return %arg1, %c0_i32 : i32, i32
  }
  func.func @transform_2(%arg0: i32, %arg1: i32) -> (i32, i32) {
    %c0_i32 = arith.constant 0 : i32
    %c0_i32_0 = arith.constant 0 : i32
    return %arg0, %c0_i32 : i32, i32
  }
  func.func @transform_3(%arg0: i32, %arg1: i32) -> (i32, i32) {
    %c0_i32 = arith.constant 0 : i32
    %c0_i32_0 = arith.constant 0 : i32
    return %c0_i32, %arg1 : i32, i32
  }
  func.func @transform_4(%arg0: i32, %arg1: i32) -> (i32, i32) {
    %c0_i32 = arith.constant 0 : i32
    %c0_i32_0 = arith.constant 0 : i32
    return %arg0, %c0_i32 : i32, i32
  }
}

</mosaic_0001>

<bundles_post_ra>
// kernel: tpu_custom_call.1
= control target key start
LH: loop header
LB: loop body
LE: loop exit
PB: predicated region body
PF: predicated region fallthrough
CT: control target
= control target key end

     0   :  { %9 = vsyncpa [#allocation7], 0  ;;  %s4788_s0 = inlined_call_operand.vmem [shape: f32[256,32], index: 0, kind: input, shape index: {}]   ;;  %s4789_s1 = inlined_call_operand.vmem [shape: f32[256,32], index: 1, kind: input, shape index: {}]   ;;  %s4790_s2 = inlined_call_operand.vmem [shape: f32[256,8], index: 2, kind: input, shape index: {}]   ;;  %s4791_s3 = inlined_call_operand.vmem [shape: f32[8,256], index: 3, kind: input, shape index: {}]   ;;  %s4792_s4 = inlined_call_operand.hbm [shape: f32[256,128], index: 4, kind: output, shape index: {}]  }
   0x1   :  { %11 = vsyncpa [#allocation7 + $0x1], 0  ;;  %s3120_s15 = smov 0   ;;  %s3122_s16 = smov 0  }
   0x2   :  { %s3124_s17 = smov 0   ;;  %s3126_s18 = smov 0  }
   0x3   :  { %s3128_s19 = smov 0   ;;  %s3130_s20 = smov 0  }
   0x4   :  { %s3132_s21 = smov 0   ;;  %s3134_s22 = smov 0  }
   0x5 LB: > { %4897 = sst [smem:[#allocation9_spill]] %s3073_s20  ;;  %s2590_s23 = sadd.s32 4294967295, %s3081_s22   ;;  %s3081_s22 = sphi %s3134_s22, %s17_s22   ;;  %s3077_s21 = sphi %s3132_s21, %s5137_s21   ;;  %s3073_s20 = sphi %s3130_s20, %s5136_s20   ;;  %s3069_s19 = sphi %s3128_s19, %s5135_s19   ;;  %s3065_s18 = sphi %s3126_s18, %s5134_s18   ;;  %s3061_s17 = sphi %s3124_s17, %s5140_s17   ;;  %s3057_s16 = sphi %s3122_s16, %s5139_s16   ;;  %s3053_s15 = sphi %s3120_s15, %s5138_s15  }
   0x6   : > { %4898 = sst [smem:[#allocation10_spill]] %s3077_s21  ;;  %s2591_s24 = sadd.s32 4294967294, %s3081_s22  }
   0x7   : > { %s26_s25 = sadd.s32 1, %s3073_s20  ;;  %s29_s26 = sadd.s32 1, %s3077_s21 }
   0x8   : > { %p27_p0 = scmp.ge.s32.totalorder %s26_s25, 2  ;;  %p150_p1 = scmp.ne.s32.totalorder %s3061_s17, %s3057_s16 }
   0x9   : > { %p151_p2 = scmp.eq.s32.totalorder %s2590_s23, 3  ;;  %p156_p4 = scmp.ne.s32.totalorder %s3057_s16, %s3053_s15 }
   0xa   : > { %s5142_s25 = smov (%p27_p0, %s26_s25), 0  ;;  %s5144_s26 = smov (!%p27_p0, %s29_s26), %s3077_s21 }
   0xb   : > { %4899 = sst [smem:[#allocation11_spill]] %s5142_s25  ;;  %p3169_p3 = por %p151_p2, %p150_p1 }
   0xc   : > { %p31_p5 = scmp.ge.s32.totalorder %s5144_s26, 2  ;;  %p157_p6 = scmp.eq.s32.totalorder %s2591_s24, 3 }
   0xd   : > { %p2594_p7 = scmp.ge.s32.totalorder %s3081_s22, 1  ;;  %p209_p8 = scmp.lt.s32.totalorder %s3081_s22, 5 }
   0xe   : > { %s5146_s26 = smov (%p31_p5, %s5144_s26), 0  ;;  %p3179_p9 = por %p157_p6, %p156_p4 }
   0xf   : > { %4901 = sst [smem:[#allocation12_spill]] %s5146_s26  ;;  %p210_p10 = pnand %p2594_p7, %p209_p8 }
  0x10   : > { %s137_s29 = ssub.s32 %s3077_s21, %s5146_s26  ;;  %s140_s30 = sadd.s32 1, %s3061_s17 }
  0x11   : > { %p138_p11 = scmp.eq.s32.totalorder %s137_s29, 0  ;;  %213 = sbr.rel (%p210_p10) target bundleno = 1051 (0x41b), region = 36 }
  0x13   : > { %s3187_s5 = scalar_select %p138_p11, %s3061_s17, %s140_s30  }
  0x18   : > { %s4793_s6 = sand.u32 1, %s3057_s16   ;;  %s2596_s7 = sshll.u32 %s3069_s19, 4 }
  0x19   : > { %s2595_s8 = sshll.u32 %s4793_s6, 7  ;;  %p250_p12 = scmp.lt.s32.totalorder %s2596_s7, 31 }
  0x1a   : > { %s2598_s9 = sshll.u32 %s3065_s18, 4  ;;  %p267_p0 = scmp.lt.s32.totalorder %s3065_s18, 1 }
  0x1b   : > { %s5148_s7 = smov (!%p250_p12, %s2596_s7), 31  ;;  %p256_p13 = scmp.lt.s32.totalorder %s2598_s9, 31 }
  0x1c   : > { %s2597_s10 = sshll.u32 %s5148_s7, 3  ;;  %s3216_s12 = scalar_lea.vmem [#allocation6], %s2595_s8 }
  0x1d   : > { %s3198_s13 = scalar_lea.vmem %s4788_s0, %s2597_s10  ;;  %s3203_s24 = scalar_lea.vmem %s4790_s2, %s2597_s10 }
  0x1e   : > { %s5150_s9 = smov (!%p256_p13, %s2598_s9), 31  ;;  %p2603_p1 = scmp.ne.s32.totalorder %s3065_s18, 0 }
  0x1f   : > { %s268_s29 = scalar_select %p267_p0, %s3065_s18, 1 }
  0x20   : > { %s2599_s30 = sshll.u32 %s5150_s9, 3  ;;  %275 = sbr.rel (%p2603_p1) target bundleno = 65 (0x41), region = 40  ;;  %v3083_v0 = vmov (!%p2603_p1), 0.0  }
  0x21   : > { %s3209_s25 = scalar_lea.vmem %s4789_s1, %s2599_s30  ;;  %s2602_s21 = sshll.u32 %s268_s29, 3  ;;  %276 = vst [vmem:[#allocation2] sm:$0xff] (!%p2603_p1), %v3083_v0  ;;  %277 = vst [vmem:[#allocation2 + $0x8] sm:$0xff] (!%p2603_p1), %v3083_v0 }
  0x22   : > { %s3214_s11 = scalar_lea.vmem %s4791_s3, %s2602_s21  ;;  %278 = vst [vmem:[#allocation2 + $0x10] sm:$0xff] (!%p2603_p1), %v3083_v0  ;;  %279 = vst [vmem:[#allocation2 + $0x18] sm:$0xff] (!%p2603_p1), %v3083_v0 }
  0x23   : > { %280 = vst [vmem:[#allocation2 + $0x20] sm:$0xff] (!%p2603_p1), %v3083_v0  ;;  %281 = vst [vmem:[#allocation2 + $0x28] sm:$0xff] (!%p2603_p1), %v3083_v0 }
  0x24   : > { %282 = vst [vmem:[#allocation2 + $0x30] sm:$0xff] (!%p2603_p1), %v3083_v0  ;;  %283 = vst [vmem:[#allocation2 + $0x38] sm:$0xff] (!%p2603_p1), %v3083_v0 }
  0x25   : > { %284 = vst [vmem:[#allocation2 + $0x40] sm:$0xff] (!%p2603_p1), %v3083_v0  ;;  %285 = vst [vmem:[#allocation2 + $0x48] sm:$0xff] (!%p2603_p1), %v3083_v0 }
  0x26   : > { %286 = vst [vmem:[#allocation2 + $0x50] sm:$0xff] (!%p2603_p1), %v3083_v0  ;;  %287 = vst [vmem:[#allocation2 + $0x58] sm:$0xff] (!%p2603_p1), %v3083_v0 }
  0x27   : > { %288 = vst [vmem:[#allocation2 + $0x60] sm:$0xff] %v3083_v0  ;;  %289 = vst [vmem:[#allocation2 + $0x68] sm:$0xff] %v3083_v0 }
  0x28   : > { %290 = vst [vmem:[#allocation2 + $0x70] sm:$0xff] %v3083_v0  ;;  %291 = vst [vmem:[#allocation2 + $0x78] sm:$0xff] %v3083_v0 }
  0x29   : > { %292 = vst [vmem:[#allocation3] sm:$0xff] %v3083_v0  ;;  %293 = vst [vmem:[#allocation3 + $0x8] sm:$0xff] %v3083_v0 }
  0x2a   : > { %294 = vst [vmem:[#allocation3 + $0x10] sm:$0xff] %v3083_v0  ;;  %295 = vst [vmem:[#allocation3 + $0x18] sm:$0xff] %v3083_v0 }
  0x2b   : > { %296 = vst [vmem:[#allocation3 + $0x20] sm:$0xff] %v3083_v0  ;;  %297 = vst [vmem:[#allocation3 + $0x28] sm:$0xff] %v3083_v0 }
  0x2c   : > { %298 = vst [vmem:[#allocation3 + $0x30] sm:$0xff] %v3083_v0  ;;  %299 = vst [vmem:[#allocation3 + $0x38] sm:$0xff] %v3083_v0 }
  0x2d   : > { %300 = vst [vmem:[#allocation3 + $0x40] sm:$0xff] %v3083_v0  ;;  %301 = vst [vmem:[#allocation3 + $0x48] sm:$0xff] %v3083_v0 }
  0x2e   : > { %302 = vst [vmem:[#allocation3 + $0x50] sm:$0xff] %v3083_v0  ;;  %303 = vst [vmem:[#allocation3 + $0x58] sm:$0xff] %v3083_v0 }
  0x2f   : > { %304 = vst [vmem:[#allocation3 + $0x60] sm:$0xff] %v3083_v0  ;;  %305 = vst [vmem:[#allocation3 + $0x68] sm:$0xff] %v3083_v0 }
  0x30   : > { %306 = vst [vmem:[#allocation3 + $0x70] sm:$0xff] %v3083_v0  ;;  %307 = vst [vmem:[#allocation3 + $0x78] sm:$0xff] %v3083_v0 }
  0x31   : > { %308 = vst [vmem:[#allocation4] sm:$0xff] %v3083_v0  ;;  %309 = vst [vmem:[#allocation4 + $0x8] sm:$0xff] %v3083_v0 }
  0x32   : > { %310 = vst [vmem:[#allocation4 + $0x10] sm:$0xff] %v3083_v0  ;;  %311 = vst [vmem:[#allocation4 + $0x18] sm:$0xff] %v3083_v0 }
  0x33   : > { %312 = vst [vmem:[#allocation4 + $0x20] sm:$0xff] %v3083_v0  ;;  %313 = vst [vmem:[#allocation4 + $0x28] sm:$0xff] %v3083_v0 }
  0x34   : > { %314 = vst [vmem:[#allocation4 + $0x30] sm:$0xff] %v3083_v0  ;;  %315 = vst [vmem:[#allocation4 + $0x38] sm:$0xff] %v3083_v0 }
  0x35   : > { %316 = vst [vmem:[#allocation4 + $0x40] sm:$0xff] %v3083_v0  ;;  %317 = vst [vmem:[#allocation4 + $0x48] sm:$0xff] %v3083_v0 }
  0x36   : > { %318 = vst [vmem:[#allocation4 + $0x50] sm:$0xff] %v3083_v0  ;;  %319 = vst [vmem:[#allocation4 + $0x58] sm:$0xff] %v3083_v0 }
  0x37   : > { %320 = vst [vmem:[#allocation4 + $0x60] sm:$0xff] %v3083_v0  ;;  %321 = vst [vmem:[#allocation4 + $0x68] sm:$0xff] %v3083_v0 }
  0x38   : > { %322 = vst [vmem:[#allocation4 + $0x70] sm:$0xff] %v3083_v0  ;;  %323 = vst [vmem:[#allocation4 + $0x78] sm:$0xff] %v3083_v0 }
  0x39   : > { %324 = vst [vmem:[#allocation5] sm:$0xff] %v3083_v0  ;;  %325 = vst [vmem:[#allocation5 + $0x8] sm:$0xff] %v3083_v0 }
  0x3a   : > { %326 = vst [vmem:[#allocation5 + $0x10] sm:$0xff] %v3083_v0  ;;  %327 = vst [vmem:[#allocation5 + $0x18] sm:$0xff] %v3083_v0 }
  0x3b   : > { %328 = vst [vmem:[#allocation5 + $0x20] sm:$0xff] %v3083_v0  ;;  %329 = vst [vmem:[#allocation5 + $0x28] sm:$0xff] %v3083_v0 }
  0x3c   : > { %330 = vst [vmem:[#allocation5 + $0x30] sm:$0xff] %v3083_v0  ;;  %331 = vst [vmem:[#allocation5 + $0x38] sm:$0xff] %v3083_v0 }
  0x3d   : > { %332 = vst [vmem:[#allocation5 + $0x40] sm:$0xff] %v3083_v0  ;;  %333 = vst [vmem:[#allocation5 + $0x48] sm:$0xff] %v3083_v0 }
  0x3e   : > { %334 = vst [vmem:[#allocation5 + $0x50] sm:$0xff] %v3083_v0  ;;  %335 = vst [vmem:[#allocation5 + $0x58] sm:$0xff] %v3083_v0 }
  0x3f   : > { %336 = vst [vmem:[#allocation5 + $0x60] sm:$0xff] %v3083_v0  ;;  %337 = vst [vmem:[#allocation5 + $0x68] sm:$0xff] %v3083_v0 }
  0x40   : > { %338 = vst [vmem:[#allocation5 + $0x70] sm:$0xff] %v3083_v0  ;;  %339 = vst [vmem:[#allocation5 + $0x78] sm:$0xff] %v3083_v0 }
  0x41 PF: > { %v356_v1 = vld [vmem:[%s3209_s25] sm:$0xff]  ;;  %v357_v2 = vld [vmem:[%s3209_s25 + $0x8] sm:$0xff]  ;;  %vm372_vm0 = vcmask 261120   ;;  %v358_v3 = vld [vmem:[%s3209_s25 + $0x10] sm:$0xff]  ;;  %v3084_v7 = vmov 0   ;;  %v3085_v41 = vmov 1   ;;  %v4797_v61 = vlaneseq }
  0x42   : > { %v2733_v4 = vpack.c.bf16 %v357_v2, %v356_v1  ;;  %vm3288_vm1 = vmpackc.low %vm372_vm0, %vm372_vm0  ;;  %v359_v6 = vld [vmem:[%s3209_s25 + $0x18] sm:$0xff]  ;;  %2880 = vset.pattern.permute.xlu1 %v3084_v7  ;;  %2879 = vset.pattern.permute.xlu0 %v3084_v7  ;;  %v3304_v9 = vld [vmem:[%s3203_s24 + $0x10] sm:$0xff]  ;;  %v3086_v42 = vmov 3   ;;  %p2638_p2 = scmp.ne.s32.totalorder %s3065_s18, 1 }
  0x43   : > { %v2739_v8 = vpack.c.bf16 %v359_v6, %v358_v3  ;;  %4905 = vst [vmem:[#allocation13_spill] sm:$0xff] %v3304_v9  ;;  %v360_v10 = vld [vmem:[%s3209_s25 + $0x20] sm:$0xff]  ;;  %v361_v11 = vld [vmem:[%s3209_s25 + $0x28] sm:$0xff]  ;;  %642 = vperm.xlu1 %2880, %v3304_v9   ;;  %v3317_v13 = vld [vmem:[%s3203_s24 + $0x18] sm:$0xff]  ;;  %v3509_v63 = vshrl.u32 %v4797_v61, 7 }
  0x44   : > { %2735 = vmatprep.subr.msk.bf16.mxu0 %vm3288_vm1, %v2733_v4  ;;  %2781 = vmatprep.subr.msk.bf16.mxu1 %vm3288_vm1, %v2733_v4  ;;  %v3314_v12 = vld [vmem:[%s3203_s24] sm:$0xff]  ;;  %4907 = vst [vmem:[#allocation15_spill] sm:$0xff] %v3317_v13  ;;  %v3321_v14 = vld [vmem:[%s3203_s24 + $0x8] sm:$0xff]  ;;  %v2745_v15 = vpack.c.bf16 %v361_v11, %v360_v10  ;;  %v362_v20 = vld [vmem:[%s3209_s25 + $0x30] sm:$0xff] }
  0x45   : > { %2738 = vmatpush3.bf16.xpose.msk.msra.mxu0 %vm3288_vm1, %v2733_v4  ;;  %2789 = vmatpush3.bf16.xpose.msk.msra.mxu1 %vm3288_vm1, %v2733_v4  ;;  %4906 = vst [vmem:[#allocation14_spill] sm:$0xff] %v3314_v12  ;;  %4908 = vst [vmem:[#allocation16_spill] sm:$0xff] %v3321_v14  ;;  %v340_v16 = vld [vmem:[%s3198_s13] sm:$0xff]  ;;  %v3326_v17 = vld [vmem:[%s3203_s24 + $0x28] sm:$0xff]  ;;  %v4798_v0 = vsub.s32 0, %v3509_v63 }
  0x46   : > { %2741 = vmatprep.subr.msk.bf16.mxu0 %vm3288_vm1, %v2739_v8  ;;  %2782 = vmatprep.subr.msk.bf16.mxu1 %vm3288_vm1, %v2739_v8  ;;  %4909 = vst [vmem:[#allocation17_spill] sm:$0xff] %v3326_v17  ;;  %v348_v18 = vld [vmem:[%s3198_s13 + $0x40] sm:$0xff]  ;;  %v363_v21 = vld [vmem:[%s3209_s25 + $0x38] sm:$0xff]  ;;  %v3351_v23 = vld [vmem:[%s3203_s24 + $0x30] sm:$0xff] }
  0x47   : > { %632 = vperm.xlu0 %2879, %v3314_v12   ;;  %647 = vperm.xlu1 %2880, %v3317_v13   ;;  %v3336_v19 = vld [vmem:[%s3203_s24 + $0x20] sm:$0xff]  ;;  %v3347_v22 = vld [vmem:[%s3203_s24 + $0x38] sm:$0xff]  ;;  %4912 = vst [vmem:[#allocation20_spill] sm:$0xff] %v3351_v23  ;;  %v2751_v24 = vpack.c.bf16 %v363_v21, %v362_v20  ;;  %v3355_v25 = vld [vmem:[%s3203_s24 + $0x48] sm:$0xff]  ;;  %v4932_v20 = vmov 0 }
  0x48   : > { %2709 = vmatprep.mubr.msk.f32.mxu0 %vm372_vm0, %v340_v16  ;;  %4910 = vst [vmem:[#allocation18_spill] sm:$0xff] %v3336_v19  ;;  %2721 = vmatprep.mubr.msk.f32.mxu1 %vm372_vm0, %v348_v18  ;;  %4911 = vst [vmem:[#allocation19_spill] sm:$0xff] %v3347_v22  ;;  %v3363_v26 = vld [vmem:[%s3203_s24 + $0x40] sm:$0xff]  ;;  %v365_v28 = vld [vmem:[%s3209_s25 + $0x48] sm:$0xff]  ;;  %v4929_v18 = vmov 0 }
  0x49   : > { %4913 = vst [vmem:[#allocation21_spill] sm:$0xff] %v3355_v25  ;;  %4914 = vst [vmem:[#allocation22_spill] sm:$0xff] %v3363_v26  ;;  %v364_v27 = vld [vmem:[%s3209_s25 + $0x40] sm:$0xff]  ;;  %v3373_v29 = vld [vmem:[%s3203_s24 + $0x58] sm:$0xff] }
  0x4a   : > { %4915 = vst [vmem:[#allocation23_spill] sm:$0xff] %v3373_v29  ;;  %v3377_v30 = vld [vmem:[%s3203_s24 + $0x50] sm:$0xff]  ;;  %v2757_v31 = vpack.c.bf16 %v365_v28, %v364_v27  ;;  %v3381_v32 = vld [vmem:[%s3203_s24 + $0x68] sm:$0xff]  ;;  %v3389_v33 = vld [vmem:[%s3203_s24 + $0x60] sm:$0xff]  ;;  %v4937_v27 = vmov 0  ;;  %v4940_v28 = vmov 0 }
  0x4b   : > { %637 = vperm.xlu0 %2879, %v3321_v14   ;;  %657 = vperm.xlu1 %2880, %v3326_v17   ;;  %4916 = vst [vmem:[#allocation24_spill] sm:$0xff] %v3377_v30  ;;  %4917 = vst [vmem:[#allocation25_spill] sm:$0xff] %v3381_v32  ;;  %v366_v34 = vld [vmem:[%s3209_s25 + $0x50] sm:$0xff]  ;;  %v367_v35 = vld [vmem:[%s3209_s25 + $0x58] sm:$0xff] }
  0x4c   : > { %4918 = vst [vmem:[#allocation26_spill] sm:$0xff] %v3389_v33  ;;  %v3399_v36 = vld [vmem:[%s3203_s24 + $0x78] sm:$0xff]  ;;  %v3403_v37 = vld [vmem:[%s3203_s24 + $0x70] sm:$0xff]  ;;  %v2763_v38 = vpack.c.bf16 %v367_v35, %v366_v34  ;;  %v368_v39 = vld [vmem:[%s3209_s25 + $0x60] sm:$0xff] }
  0x4d   : > { %2744 = vmatpush3.bf16.xpose.msk.msra.mxu0 %vm3288_vm1, %v2739_v8  ;;  %2790 = vmatpush3.bf16.xpose.msk.msra.mxu1 %vm3288_vm1, %v2739_v8  ;;  %4919 = vst [vmem:[#allocation27_spill] sm:$0xff] %v3399_v36  ;;  %4920 = vst [vmem:[#allocation28_spill] sm:$0xff] %v3403_v37  ;;  %v369_v40 = vld [vmem:[%s3209_s25 + $0x68] sm:$0xff]  ;;  %v370_v44 = vld [vmem:[%s3209_s25 + $0x70] sm:$0xff] }
  0x4e   : > { %2747 = vmatprep.subr.msk.bf16.mxu0 %vm3288_vm1, %v2745_v15  ;;  %2783 = vmatprep.subr.msk.bf16.mxu1 %vm3288_vm1, %v2745_v15  ;;  %v2769_v43 = vpack.c.bf16 %v369_v40, %v368_v39  ;;  %v371_v45 = vld [vmem:[%s3209_s25 + $0x78] sm:$0xff]  ;;  %v341_v47 = vld [vmem:[%s3198_s13 + $0x8] sm:$0xff]  ;;  %v342_v49 = vld [vmem:[%s3198_s13 + $0x10] sm:$0xff] }
  0x4f   : > { %652 = vperm.xlu0 %2879, %v3336_v19   ;;  %667 = vperm.xlu1 %2880, %v3347_v22   ;;  %v2775_v46 = vpack.c.bf16 %v371_v45, %v370_v44  ;;  %v349_v48 = vld [vmem:[%s3198_s13 + $0x48] sm:$0xff]  ;;  %v350_v50 = vld [vmem:[%s3198_s13 + $0x50] sm:$0xff]  ;;  %v343_v51 = vld [vmem:[%s3198_s13 + $0x18] sm:$0xff]  ;;  %v4949_v44 = vmov 0  ;;  %v4952_v45 = vmov 0 }
  0x50   : > { %v351_v52 = vld [vmem:[%s3198_s13 + $0x58] sm:$0xff]  ;;  %v344_v53 = vld [vmem:[%s3198_s13 + $0x20] sm:$0xff]  ;;  %v345_v55 = vld [vmem:[%s3198_s13 + $0x28] sm:$0xff] }
  0x51   : > { %v352_v54 = vld [vmem:[%s3198_s13 + $0x60] sm:$0xff]  ;;  %v353_v56 = vld [vmem:[%s3198_s13 + $0x68] sm:$0xff]  ;;  %v346_v57 = vld [vmem:[%s3198_s13 + $0x30] sm:$0xff] }
  0x52   : > { %v354_v58 = vld [vmem:[%s3198_s13 + $0x70] sm:$0xff]  ;;  %v347_v59 = vld [vmem:[%s3198_s13 + $0x38] sm:$0xff]  ;;  %v3506_v62 = vld [vmem:[%s3214_s11] sm:$0x1] }
  0x53   : > { %662 = vperm.xlu0 %2879, %v3351_v23   ;;  %677 = vperm.xlu1 %2880, %v3355_v25   ;;  %v355_v60 = vld [vmem:[%s3198_s13 + $0x78] sm:$0xff]  ;;  %vm965_vm2 = vcmp.eq.f32.partialorder %v3506_v62, 0.0  ;;  %v1044_v35 = vld [vmem:[#allocation3 + $0x40] sm:$0xff] }
  0x54   : > { %v966_v1 = vsel %vm965_vm2, 1, %v3084_v7 }
  0x55   : > { %2750 = vmatpush3.bf16.xpose.msk.msra.mxu0 %vm3288_vm1, %v2745_v15  ;;  %2791 = vmatpush3.bf16.xpose.msk.msra.mxu1 %vm3288_vm1, %v2745_v15  ;;  %v3516_v2 = vrot.slane %v966_v1, %v4798_v0 }
  0x56   : > { %2753 = vmatprep.subr.msk.bf16.mxu0 %vm3288_vm1, %v2751_v24  ;;  %2784 = vmatprep.subr.msk.bf16.mxu1 %vm3288_vm1, %v2751_v24 }
  0x57   : > { %672 = vperm.xlu0 %2879, %v3363_v26   ;;  %687 = vperm.xlu1 %2880, %v3373_v29   ;;  %vm4835_vm3 = vcmp.eq.s32.totalorder %v3516_v2, 1 }
  0x5b   : > { %682 = vperm.xlu0 %2879, %v3377_v30   ;;  %697 = vperm.xlu1 %2880, %v3381_v32  }
  0x5d   : > { %2756 = vmatpush3.bf16.xpose.msk.msra.mxu0 %vm3288_vm1, %v2751_v24  ;;  %2792 = vmatpush3.bf16.xpose.msk.msra.mxu1 %vm3288_vm1, %v2751_v24 }
  0x5e   : > { %2759 = vmatprep.subr.msk.bf16.mxu0 %vm3288_vm1, %v2757_v31  ;;  %2785 = vmatprep.subr.msk.bf16.mxu1 %vm3288_vm1, %v2757_v31 }
  0x5f   : > { %692 = vperm.xlu0 %2879, %v3389_v33   ;;  %707 = vperm.xlu1 %2880, %v3399_v36  }
  0x63   : > { %702 = vperm.xlu0 %2879, %v3403_v37   ;;  %2881 = vset.pattern.permute.xlu1 %v3085_v41 }
  0x64   : > { %715 = vperm.xlu1 %2881, %v3321_v14  }
  0x65   : > { %2762 = vmatpush3.bf16.xpose.msk.msra.mxu0 %vm3288_vm1, %v2757_v31  ;;  %2793 = vmatpush3.bf16.xpose.msk.msra.mxu1 %vm3288_vm1, %v2757_v31 }
  0x66   : > { %2765 = vmatprep.subr.msk.bf16.mxu0 %vm3288_vm1, %v2763_v38  ;;  %2786 = vmatprep.subr.msk.bf16.mxu1 %vm3288_vm1, %v2763_v38 }
  0x67   : > { %2883 = vset.pattern.permute.xlu0 %v3086_v42 }
  0x68   : > { %779 = vperm.xlu0 %2883, %v3321_v14   ;;  %719 = vperm.xlu1 %2881, %v3304_v9   ;;  %v2636_v14 = vld [vmem:[%s3214_s11 + $0x2] ss:$0 sm:$0xff] }
  0x6c   : > { %791 = vperm.xlu0 %2883, %v3336_v19   ;;  %727 = vperm.xlu1 %2881, %v3336_v19   ;;  %v4966_v19 = vsub.s32 0, %v3509_v63 }
  0x6d   : > { %2768 = vmatpush3.bf16.xpose.msk.msra.mxu0 %vm3288_vm1, %v2763_v38  ;;  %2794 = vmatpush3.bf16.xpose.msk.msra.mxu1 %vm3288_vm1, %v2763_v38 }
  0x6e   : > { %2771 = vmatprep.subr.msk.bf16.mxu0 %vm3288_vm1, %v2769_v43  ;;  %2787 = vmatprep.subr.msk.bf16.mxu1 %vm3288_vm1, %v2769_v43 }
  0x70   : > { %799 = vperm.xlu0 %2883, %v3351_v23   ;;  %735 = vperm.xlu1 %2881, %v3351_v23  }
  0x74   : > { %807 = vperm.xlu0 %2883, %v3363_v26   ;;  %743 = vperm.xlu1 %2881, %v3363_v26  }
  0x75   : > { %2774 = vmatpush3.bf16.xpose.msk.msra.mxu0 %vm3288_vm1, %v2769_v43  ;;  %2795 = vmatpush3.bf16.xpose.msk.msra.mxu1 %vm3288_vm1, %v2769_v43 }
  0x76   : > { %2777 = vmatprep.subr.msk.bf16.mxu0 %vm3288_vm1, %v2775_v46  ;;  %2788 = vmatprep.subr.msk.bf16.mxu1 %vm3288_vm1, %v2775_v46 }
  0x78   : > { %815 = vperm.xlu0 %2883, %v3377_v30   ;;  %751 = vperm.xlu1 %2881, %v3377_v30  }
  0x7c   : > { %823 = vperm.xlu0 %2883, %v3389_v33   ;;  %759 = vperm.xlu1 %2881, %v3389_v33  }
  0x7d   : > { %2780 = vmatpush3.bf16.xpose.msk.msra.mxu0 %vm3288_vm1, %v2775_v46  ;;  %2796 = vmatpush3.bf16.xpose.msk.msra.mxu1 %vm3288_vm1, %v2775_v46 }
  0x80   : > { %831 = vperm.xlu0 %2883, %v3403_v37   ;;  %2882 = vset.pattern.permute.xlu1 %v3086_v42 }
  0x81   : > { %775 = vperm.xlu1 %2882, %v3314_v12  }
  0x84   : > { %2710 = vmatmul.mubr.msk.f32.vlgmr.msra.gmra.mrb[0].mxu0 %vm372_vm0, %v341_v47  ;;  %2722 = vmatmul.mubr.msk.f32.vlgmr.msra.gmra.mrb[0].mxu1 %vm372_vm0, %v349_v48  ;;  %v4957_v48 = vmov 0 }
  0x85   : > { %2712 = vmatprep.mubr.msk.f32.mxu0 %vm372_vm0, %v342_v49  ;;  %2724 = vmatprep.mubr.msk.f32.mxu1 %vm372_vm0, %v350_v50  ;;  %v4960_v49 = vmov 0 }
  0x86   : > { %2884 = vset.pattern.permute.xlu0 %v3085_v41  ;;  %783 = vperm.xlu1 %2882, %v3304_v9   ;;  %v3684_v9 = vld [vmem:[%s3214_s11 + $0x1] ss:$0 sm:$0xff] }
  0x87   : > { %711 = vperm.xlu0 %2884, %v3314_v12  }
  0x88   : > { %2713 = vmatmul.mubr.msk.f32.gmra.mrb[2].mxu0 %vm372_vm0, %v343_v51  ;;  %2725 = vmatmul.mubr.msk.f32.gmra.mrb[2].mxu1 %vm372_vm0, %v351_v52 }
  0x89   : > { %2715 = vmatprep.mubr.msk.f32.mxu0 %vm372_vm0, %v344_v53  ;;  %2727 = vmatprep.mubr.msk.f32.mxu1 %vm372_vm0, %v352_v54 }
  0x8a   : > { %787 = vperm.xlu1 %2882, %v3317_v13  }
  0x8b   : > { %723 = vperm.xlu0 %2884, %v3317_v13   ;;  %v3681_v13 = vrot.slane %v3506_v62, %v4966_v19 }
  0x8c   : > { %2716 = vmatmul.mubr.msk.f32.gmra.mrb[4].mxu0 %vm372_vm0, %v345_v55  ;;  %2728 = vmatmul.mubr.msk.f32.gmra.mrb[4].mxu1 %vm372_vm0, %v353_v56 }
  0x8d   : > { %2718 = vmatprep.mubr.msk.f32.mxu0 %vm372_vm0, %v346_v57  ;;  %2730 = vmatprep.mubr.msk.f32.mxu1 %vm372_vm0, %v354_v58 }
  0x8e   : > { %795 = vperm.xlu1 %2882, %v3326_v17  }
  0x8f   : > { %731 = vperm.xlu0 %2884, %v3326_v17  }
  0x90   : > { %2719 = vmatmul.mubr.msk.f32.gmra.mrb[6].mxu0 %vm372_vm0, %v347_v59  ;;  %2731 = vmatmul.mubr.msk.f32.gmra.mrb[6].mxu1 %vm372_vm0, %v355_v60 }
  0x92   : > { %803 = vperm.xlu1 %2882, %v3347_v22  }
  0x93   : > { %739 = vperm.xlu0 %2884, %v3347_v22  }
  0x96   : > { %811 = vperm.xlu1 %2882, %v3355_v25  }
  0x97   : > { %747 = vperm.xlu0 %2884, %v3355_v25  }
  0x9a   : > { %819 = vperm.xlu1 %2882, %v3373_v29  }
  0x9b   : > { %755 = vperm.xlu0 %2884, %v3373_v29  }
  0x9e   : > { %827 = vperm.xlu1 %2882, %v3381_v32  }
  0x9f   : > { %763 = vperm.xlu0 %2884, %v3381_v32  }
  0xa2   : > { %835 = vperm.xlu1 %2882, %v3399_v36  }
  0xa3   : > { %767 = vperm.xlu0 %2884, %v3403_v37  }
  0xa6   : > { %2885 = vset.pattern.permute.xlu1 %v3085_v41 }
  0xa7   : > { %2886 = vset.pattern.permute.xlu0 %v3086_v42  ;;  %771 = vperm.xlu1 %2885, %v3399_v36  }
  0xc2   : > { %v3519_v3 = vpop.permute.xlu1 %642 }
  0xc3   : > { %vm840_vm4 = vcmp.eq.f32.partialorder %v3519_v3, 0.0 }
  0xc4   : > { %vm3526_vm5 = vmand %vm840_vm4, %vm4835_vm3 }
  0xc6   : > { %v3522_v4 = vpop.permute.xlu0 %632  ;;  %v3537_v7 = vpop.permute.xlu1 %647 }
  0xc7   : > { %vm838_vm6 = vcmp.eq.f32.partialorder %v3522_v4, 0.0  ;;  %vm841_vm8 = vcmp.eq.f32.partialorder %v3537_v7, 0.0 }
  0xc8   : > { %vm3533_vm7 = vmand %vm838_vm6, %vm4835_vm3 }
  0xc9   : > { %vm3544_vm9 = vmand %vm841_vm8, %vm4835_vm3 }
  0xca   : > { %v3540_v8 = vpop.permute.xlu0 %637  ;;  %v3555_v15 = vpop.permute.xlu1 %657 }
  0xcb   : > { %vm839_vm10 = vcmp.eq.f32.partialorder %v3540_v8, 0.0  ;;  %vm843_vm12 = vcmp.eq.f32.partialorder %v3555_v15, 0.0 }
  0xcc   : > { %vm3551_vm11 = vmand %vm839_vm10, %vm4835_vm3 }
  0xcd   : > { %vm3562_vm13 = vmand %vm843_vm12, %vm4835_vm3 }
  0xce   : > { %v3558_v16 = vpop.permute.xlu0 %652  ;;  %v4930_v18 = vsel %vm3562_vm13, 4294967295, %v4929_v18  ;;  %v3573_v21 = vpop.permute.xlu1 %667 }
  0xcf   : > { %4931 = vst [vmem:[#allocation29_spill] sm:$0xff] %v4930_v18  ;;  %vm842_vm14 = vcmp.eq.f32.partialorder %v3558_v16, 0.0  ;;  %4935 = vst [vmem:[#allocation31_spill] sm:$0xff] %v3573_v21  ;;  %vm845_vm0 = vcmp.eq.f32.partialorder %v3573_v21, 0.0  ;;  %v988_v21 = vld [vmem:[#allocation2] sm:$0xff] }
  0xd0   : > { %vm3569_vm15 = vmand %vm842_vm14, %vm4835_vm3 }
  0xd1   : > { %v4933_v20 = vsel %vm3569_vm15, 4294967295, %v4932_v20  ;;  %vm3580_vm1 = vmand %vm845_vm0, %vm4835_vm3 }
  0xd2   : > { %4934 = vst [vmem:[#allocation30_spill] sm:$0xff] %v4933_v20  ;;  %v3576_v24 = vpop.permute.xlu0 %662  ;;  %v4938_v27 = vsel %vm3580_vm1, 4294967295, %v4937_v27  ;;  %v3591_v31 = vpop.permute.xlu1 %677  ;;  %v997_v20 = vld [vmem:[#allocation2 + $0x48] sm:$0xff] }
  0xd3   : > { %4936 = vst [vmem:[#allocation32_spill] sm:$0xff] %v3576_v24  ;;  %4939 = vst [vmem:[#allocation33_spill] sm:$0xff] %v4938_v27  ;;  %vm844_vm2 = vcmp.eq.f32.partialorder %v3576_v24, 0.0  ;;  %vm847_vm6 = vcmp.eq.f32.partialorder %v3591_v31, 0.0 }
  0xd4   : > { %vm3587_vm4 = vmand %vm844_vm2, %vm4835_vm3 }
  0xd5   : > { %v4941_v28 = vsel %vm3587_vm4, 4294967295, %v4940_v28  ;;  %vm3598_vm8 = vmand %vm847_vm6, %vm4835_vm3 }
  0xd6   : > { %4942 = vst [vmem:[#allocation34_spill] sm:$0xff] %v4941_v28  ;;  %v3594_v34 = vpop.permute.xlu0 %672  ;;  %v3602_v38 = vpop.permute.xlu1 %687 }
  0xd7   : > { %vm849_vm10 = vcmp.eq.f32.partialorder %v3602_v38, 0.0 }
  0xd8   : > { %vm3609_vm12 = vmand %vm849_vm10, %vm4835_vm3 }
  0xda   : > { %v3605_v39 = vpop.permute.xlu0 %682  ;;  %v3620_v42 = vpop.permute.xlu1 %697 }
  0xdb   : > { %vm848_vm14 = vcmp.eq.f32.partialorder %v3605_v39, 0.0  ;;  %vm851_vm2 = vcmp.eq.f32.partialorder %v3620_v42, 0.0 }
  0xdc   : > { %vm3616_vm0 = vmand %vm848_vm14, %vm4835_vm3 }
  0xdd   : > { %vm3627_vm6 = vmand %vm851_vm2, %vm4835_vm3 }
  0xde   : > { %v3623_v43 = vpop.permute.xlu0 %692  ;;  %v4950_v44 = vsel %vm3627_vm6, 4294967295, %v4949_v44  ;;  %v3638_v46 = vpop.permute.xlu1 %707 }
  0xdf   : > { %4951 = vst [vmem:[#allocation35_spill] sm:$0xff] %v4950_v44  ;;  %vm850_vm10 = vcmp.eq.f32.partialorder %v3623_v43, 0.0  ;;  %4955 = vst [vmem:[#allocation37_spill] sm:$0xff] %v3638_v46  ;;  %vm853_vm4 = vcmp.eq.f32.partialorder %v3638_v46, 0.0 }
  0xe0   : > { %vm3634_vm14 = vmand %vm850_vm10, %vm4835_vm3 }
  0xe1   : > { %v4953_v45 = vsel %vm3634_vm14, 4294967295, %v4952_v45  ;;  %vm3645_vm2 = vmand %vm853_vm4, %vm4835_vm3 }
  0xe2   : > { %4954 = vst [vmem:[#allocation36_spill] sm:$0xff] %v4953_v45  ;;  %v3641_v47 = vpop.permute.xlu0 %702  ;;  %v4958_v48 = vsel %vm3645_vm2, 4294967295, %v4957_v48 }
  0xe3   : > { %4956 = vst [vmem:[#allocation38_spill] sm:$0xff] %v3641_v47  ;;  %4959 = vst [vmem:[#allocation39_spill] sm:$0xff] %v4958_v48  ;;  %vm852_vm1 = vcmp.eq.f32.partialorder %v3641_v47, 0.0  ;;  %v3656_v50 = vpop.permute.xlu1 %715 }
  0xe4   : > { %vm3652_vm10 = vmand %vm852_vm1, %vm4835_vm3  ;;  %vm4974_vm1 = vcmp.eq.f32.partialorder %v3540_v8, %v3681_v13  ;;  %vm4975_vm4 = vcmp.eq.f32.partialorder %v3656_v50, %v3684_v9  ;;  %vm932_vm3 = vcmp.eq.f32.partialorder %v3537_v7, %v3681_v13  ;;  %v996_v50 = vld [vmem:[#allocation2 + $0x40] sm:$0xff] }
  0xe5   : > { %v4961_v49 = vsel %vm3652_vm10, 4294967295, %v4960_v49  ;;  %vm4980_vm10 = vcmp.eq.s32.totalorder %v3516_v2, 1 }
  0xe6   : > { %4962 = vst [vmem:[#allocation40_spill] sm:$0xff] %v4961_v49 }
  0xe7   : > { %v3658_v51 = vpop.permute.xlu1 %719  ;;  %v780_v54 = vpop.permute.xlu0 %779 }
  0xe8   : > { %v862_v49 = vadd.f32 %v2636_v14, %v780_v54 }
  0xeb   : > { %v3660_v52 = vpop.permute.xlu1 %727  ;;  %v792_v56 = vpop.permute.xlu0 %791 }
  0xec   : > { %v3691_v28 = vadd.f32 %v2636_v14, %v792_v56 }
  0xee   : > { %4967 = vst [vmem:[#allocation44_spill] sm:$0xff] %v3691_v28 }
  0xef   : > { %v3662_v53 = vpop.permute.xlu1 %735  ;;  %v800_v58 = vpop.permute.xlu0 %799 }
  0xf0   : > { %4963 = vst [vmem:[#allocation41_spill] sm:$0xff] %v3662_v53  ;;  %v3693_v48 = vadd.f32 %v2636_v14, %v800_v58 }
  0xf2   : > { %4968 = vst [vmem:[#allocation45_spill] sm:$0xff] %v3693_v48 }
  0xf3   : > { %v3664_v55 = vpop.permute.xlu1 %743  ;;  %v808_v60 = vpop.permute.xlu0 %807 }
  0xf4   : > { %v869_v19 = vadd.f32 %v2636_v14, %v808_v60 }
  0xf7   : > { %v3666_v57 = vpop.permute.xlu1 %751  ;;  %v816_v61 = vpop.permute.xlu0 %815 }
  0xf8   : > { %v3699_v62 = vadd.f32 %v2636_v14, %v816_v61 }
  0xfb   : > { %v3668_v59 = vpop.permute.xlu1 %759  ;;  %v824_v36 = vpop.permute.xlu0 %823 }
  0xfc   : > { %4964 = vst [vmem:[#allocation42_spill] sm:$0xff] %v3668_v59  ;;  %v3701_v63 = vadd.f32 %v2636_v14, %v824_v36 }
  0xfe   : > { %4969 = vst [vmem:[#allocation46_spill] sm:$0xff] %v3701_v63 }
  0xff   : > { %v832_v32 = vpop.permute.xlu0 %831 }
 0x100   : > { %v776_v1 = vpop.permute.xlu1 %775 }
 0x101   : > { %v861_v54 = vadd.f32 %v2636_v14, %v776_v1  ;;  %v989_v1 = vld [vmem:[#allocation2 + $0x8] sm:$0xff] }
 0x105   : > { %v784_v0 = vpop.permute.xlu1 %783 }
 0x106   : > { %v3670_v29 = vpop.permute.xlu0 %711  ;;  %v3708_v60 = vadd.f32 %v2636_v14, %v784_v0 }
 0x109   : > { %v788_v37 = vpop.permute.xlu1 %787 }
 0x10a   : > { %v3672_v25 = vpop.permute.xlu0 %723  ;;  %v3710_v61 = vadd.f32 %v2636_v14, %v788_v37  ;;  %v1037_v37 = vld [vmem:[#allocation3 + $0x8] sm:$0xff] }
 0x10d   : > { %v796_v33 = vpop.permute.xlu1 %795 }
 0x10e   : > { %v3674_v22 = vpop.permute.xlu0 %731 }
 0x111   : > { %v804_v30 = vpop.permute.xlu1 %803 }
 0x112   : > { %v3676_v17 = vpop.permute.xlu0 %739 }
 0x113   : > { %4965 = vst [vmem:[#allocation43_spill] sm:$0xff] %v3676_v17  ;;  %v3703_v17 = vadd.f32 %v2636_v14, %v832_v32 }
 0x115   : > { %v812_v26 = vpop.permute.xlu1 %811  ;;  %4970 = vst [vmem:[#allocation47_spill] sm:$0xff] %v3703_v17 }
 0x116   : > { %v3695_v27 = vpop.permute.xlu0 %747  ;;  %v870_v56 = vadd.f32 %v2636_v14, %v812_v26  ;;  %v3718_v26 = vadd.f32 %v2636_v14, %v796_v33 }
 0x119   : > { %v820_v23 = vpop.permute.xlu1 %819 }
 0x11a   : > { %v3722_v46 = vadd.f32 %v2636_v14, %v820_v23 }
 0x11d   : > { %v828_v12 = vpop.permute.xlu1 %827 }
 0x157   : > { %v2711_v53 = vpop.f32.mrb[0].mxu0  ;;  %v2723_v47 = vpop.f32.mrb[0].mxu1 }
 0x158   : > { %v878_v58 = vmul.f32 2.0, %v2711_v53  ;;  %v886_v48 = vmul.f32 2.0, %v2723_v47  ;;  %v535_v45 = vpop.f32.mrb[1].mxu0  ;;  %v575_v24 = vpop.f32.mrb[1].mxu1  ;;  %v3720_v47 = vadd.f32 %v2636_v14, %v804_v30 }
 0x159   : > { %v877_v32 = vmul.f32 2.0, %v535_v45  ;;  %v885_v36 = vmul.f32 2.0, %v575_v24  ;;  %v836_v53 = vpop.permute.xlu1 %835  ;;  %v1101_v24 = vld [vmem:[#allocation4 + $0x8] sm:$0xff] }
 0x15a   : > { %4971 = vst [vmem:[#allocation48_spill] sm:$0xff] %v3720_v47  ;;  %v894_v0 = vsub.f32 %v862_v49, %v878_v58  ;;  %v902_v17 = vsub.f32 %v870_v56, %v886_v48  ;;  %v1165_v45 = vld [vmem:[#allocation5 + $0x8] sm:$0xff]  ;;  %v3730_v48 = vadd.f32 %v2636_v14, %v828_v12  ;;  %v3732_v23 = vadd.f32 %v2636_v14, %v836_v53 }
 0x15b   : > { %v893_v44 = vsub.f32 %v861_v54, %v877_v32  ;;  %v901_v18 = vsub.f32 %v869_v19, %v885_v36  ;;  %v2714_v33 = vpop.f32.mrb[2].mxu0  ;;  %v2726_v63 = vpop.f32.mrb[2].mxu1 }
 0x15c   : > { %v910_v30 = vmax.f32 %v894_v0, 1e-10  ;;  %v918_v47 = vmax.f32 %v902_v17, 1e-10  ;;  %v3726_v28 = vmul.f32 2.0, %v2714_v33  ;;  %v3728_v49 = vmul.f32 2.0, %v2726_v63  ;;  %v3740_v19 = vpop.permute.xlu0 %755 }
 0x15d   : > { %4972 = vst [vmem:[#allocation49_spill] sm:$0xff] %v3730_v48  ;;  %4973 = vst [vmem:[#allocation50_spill] sm:$0xff] %v3732_v23  ;;  %v909_v56 = vmax.f32 %v893_v44, 1e-10  ;;  %v3734_v58 = vmax.f32 %v901_v18, 1e-10 }
 0x15e   : > { %v3736_v59 = vpop.f32.mrb[3].mxu0  ;;  %v3738_v54 = vpop.f32.mrb[3].mxu1  ;;  %v1005_v32 = vadd.f32 %v989_v1, %v910_v30  ;;  %v1053_v17 = vsel %vm4974_vm1, %v910_v30, 0.0  ;;  %v1117_v12 = vsel %vm4975_vm4, %v910_v30, 0.0  ;;  %v1181_v14 = vsel %vm3551_vm11, %v910_v30, 0.0  ;;  %v1045_v18 = vld [vmem:[#allocation3 + $0x48] sm:$0xff] }
 0x15f   : > { %v1109_v44 = vld [vmem:[#allocation4 + $0x48] sm:$0xff]  ;;  %v1069_v36 = vadd.f32 %v1053_v17, %v1037_v37  ;;  %v1133_v53 = vadd.f32 %v1117_v12, %v1101_v24  ;;  %v1197_v8 = vadd.f32 %v1181_v14, %v1165_v45  ;;  %v1013_v0 = vadd.f32 %v997_v20, %v918_v47  ;;  %v1036_v1 = vld [vmem:[#allocation3] sm:$0xff]  ;;  %v3754_v23 = vpop.f32.mrb[4].mxu0  ;;  %v3756_v11 = vpop.f32.mrb[4].mxu1 }
 0x160   : > { %v1173_v63 = vld [vmem:[#allocation5 + $0x48] sm:$0xff]  ;;  %v1100_v33 = vld [vmem:[#allocation4] sm:$0xff]  ;;  %1021 = vst [vmem:[#allocation2 + $0x8] sm:$0xff] %v1005_v32  ;;  %vm4976_vm11 = vcmp.eq.f32.partialorder %v3591_v31, %v3681_v13  ;;  %vm4977_vm1 = vcmp.eq.f32.partialorder %v3695_v27, %v3684_v9  ;;  %v1189_v37 = vsel %vm3598_vm8, %v918_v47, 0.0  ;;  %v1004_v20 = vadd.f32 %v988_v21, %v909_v56  ;;  %v555_v45 = vpop.f32.mrb[5].mxu0  ;;  %v3766_v17 = vpop.f32.mrb[5].mxu1 }
 0x161   : > { %v1061_v30 = vsel %vm4976_vm11, %v918_v47, 0.0  ;;  %v1125_v48 = vsel %vm4977_vm1, %v918_v47, 0.0  ;;  %v1164_v24 = vld [vmem:[#allocation5] sm:$0xff]  ;;  %1085 = vst [vmem:[#allocation3 + $0x8] sm:$0xff] %v1069_v36  ;;  %1149 = vst [vmem:[#allocation4 + $0x8] sm:$0xff] %v1133_v53  ;;  %v1205_v32 = vadd.f32 %v1189_v37, %v1173_v63  ;;  %vm4978_vm8 = vcmp.eq.f32.partialorder %v3522_v4, %v3681_v13  ;;  %v1103_v37 = vld [vmem:[#allocation4 + $0x18] sm:$0xff]  ;;  %v3847_v4 = vpop.permute.xlu0 %763 }
 0x162   : > { %1213 = vst [vmem:[#allocation5 + $0x8] sm:$0xff] %v1197_v8  ;;  %1029 = vst [vmem:[#allocation2 + $0x48] sm:$0xff] %v1013_v0  ;;  %v1077_v27 = vadd.f32 %v1061_v30, %v1045_v18  ;;  %v1141_v31 = vadd.f32 %v1125_v48, %v1109_v44  ;;  %v1052_v21 = vsel %vm4978_vm8, %v909_v56, 0.0  ;;  %v1108_v47 = vld [vmem:[#allocation4 + $0x40] sm:$0xff]  ;;  %vm4979_vm11 = vcmp.eq.f32.partialorder %v3670_v29, %v3684_v9  ;;  %v1039_v30 = vld [vmem:[#allocation3 + $0x18] sm:$0xff] }
 0x163   : > { %1020 = vst [vmem:[#allocation2] sm:$0xff] %v1004_v20  ;;  %v1068_v12 = vadd.f32 %v1052_v21, %v1036_v1  ;;  %v1116_v14 = vsel %vm4979_vm11, %v909_v56, 0.0  ;;  %v1180_v36 = vsel %vm3533_vm7, %v909_v56, 0.0  ;;  %v1012_v53 = vadd.f32 %v996_v50, %v3734_v58  ;;  %v1172_v18 = vld [vmem:[#allocation5 + $0x40] sm:$0xff]  ;;  %1221 = vst [vmem:[#allocation5 + $0x48] sm:$0xff] %v1205_v32  ;;  %v3801_v56 = vpop.f32.mrb[6].mxu0 }
 0x164   : > { %vm931_vm1 = vcmp.eq.f32.partialorder %v3519_v3, %v3681_v13  ;;  %vm4981_vm8 = vcmp.eq.f32.partialorder %v3594_v34, 0.0  ;;  %vm951_vm11 = vcmp.eq.f32.partialorder %v3658_v51, %v3684_v9  ;;  %1093 = vst [vmem:[#allocation3 + $0x48] sm:$0xff] %v1077_v27  ;;  %1157 = vst [vmem:[#allocation4 + $0x48] sm:$0xff] %v1141_v31  ;;  %v1132_v29 = vadd.f32 %v1116_v14, %v1100_v33  ;;  %v3803_v44 = vpop.f32.mrb[6].mxu1  ;;  %v991_v1 = vld [vmem:[#allocation2 + $0x18] sm:$0xff]  ;;  %v3810_v33 = vpop.f32.mrb[7].mxu0 }
 0x165   : > { %vm3787_vm4 = vmand %vm4981_vm8, %vm4980_vm10  ;;  %v1196_v6 = vadd.f32 %v1180_v36, %v1164_v24  ;;  %vm4984_vm7 = vcmp.eq.f32.partialorder %v3594_v34, %v3681_v13  ;;  %vm4985_vm10 = vcmp.eq.f32.partialorder %v3664_v55, %v3684_v9  ;;  %1084 = vst [vmem:[#allocation3] sm:$0xff] %v1068_v12  ;;  %v896_v34 = vsub.f32 %v3710_v61, %v3726_v28  ;;  %v3812_v55 = vpop.f32.mrb[7].mxu1  ;;  %v999_v27 = vld [vmem:[#allocation2 + $0x58] sm:$0xff]  ;;  %v4991_v41 = vld [vmem:[#allocation49_spill] sm:$0xff] }
 0x166   : > { %v1060_v48 = vsel %vm4984_vm7, %v3734_v58, 0.0  ;;  %v1124_v2 = vsel %vm4985_vm10, %v3734_v58, 0.0  ;;  %1028 = vst [vmem:[#allocation2 + $0x40] sm:$0xff] %v1012_v53  ;;  %v1188_v0 = vsel %vm3787_vm4, %v3734_v58, 0.0  ;;  %vm939_vm8 = vcmp.eq.f32.partialorder %v3605_v39, %v3681_v13  ;;  %1148 = vst [vmem:[#allocation4] sm:$0xff] %v1132_v29  ;;  %v1167_v58 = vld [vmem:[#allocation5 + $0x18] sm:$0xff] }
 0x167   : > { %v1076_v63 = vadd.f32 %v1060_v48, %v1044_v35  ;;  %v1140_v8 = vadd.f32 %v1124_v2, %v1108_v47  ;;  %1212 = vst [vmem:[#allocation5] sm:$0xff] %v1196_v6  ;;  %v1204_v50 = vadd.f32 %v1188_v0, %v1172_v18  ;;  %v904_v28 = vsub.f32 %v3722_v46, %v3728_v49  ;;  %v1047_v47 = vld [vmem:[#allocation3 + $0x58] sm:$0xff]  ;;  %v1038_v53 = vld [vmem:[#allocation3 + $0x10] sm:$0xff] }
 0x168   : > { %v879_v61 = vmul.f32 2.0, %v3736_v59  ;;  %v887_v20 = vmul.f32 2.0, %v3738_v54  ;;  %v912_v24 = vmax.f32 %v896_v34, 1e-10  ;;  %v3823_v31 = vmul.f32 2.0, %v3754_v23  ;;  %v1111_v12 = vld [vmem:[#allocation4 + $0x58] sm:$0xff] }
 0x169   : > { %1092 = vst [vmem:[#allocation3 + $0x40] sm:$0xff] %v1076_v63  ;;  %1156 = vst [vmem:[#allocation4 + $0x40] sm:$0xff] %v1140_v8  ;;  %v3826_v32 = vmul.f32 2.0, %v3756_v11  ;;  %v3828_v21 = vmul.f32 2.0, %v555_v45  ;;  %v920_v35 = vmax.f32 %v904_v28, 1e-10  ;;  %vm4986_vm4 = vcmp.eq.f32.partialorder %v3672_v25, %v3684_v9 }
 0x16a   : > { %1220 = vst [vmem:[#allocation5 + $0x40] sm:$0xff] %v1204_v50  ;;  %v895_v46 = vsub.f32 %v3708_v60, %v879_v61  ;;  %v903_v59 = vsub.f32 %v3699_v62, %v887_v20  ;;  %v3833_v49 = vmul.f32 2.0, %v3766_v17  ;;  %v1007_v54 = vadd.f32 %v991_v1, %v912_v24  ;;  %v1175_v14 = vld [vmem:[#allocation5 + $0x58] sm:$0xff]  ;;  %v990_v60 = vld [vmem:[#allocation2 + $0x10] sm:$0xff] }
 0x16b   : > { %v1055_v23 = vsel %vm932_vm3, %v912_v24, 0.0  ;;  %v1119_v11 = vsel %vm4986_vm4, %v912_v24, 0.0  ;;  %v1183_v45 = vsel %vm3544_vm9, %v912_v24, 0.0  ;;  %vm934_vm10 = vcmp.eq.f32.partialorder %v3555_v15, %v3681_v13  ;;  %v1102_v18 = vld [vmem:[#allocation4 + $0x10] sm:$0xff]  ;;  %v1104_v15 = vld [vmem:[#allocation4 + $0x20] sm:$0xff] }
 0x16c   : > { %v1071_v62 = vadd.f32 %v1055_v23, %v1039_v30  ;;  %v1135_v17 = vadd.f32 %v1119_v11, %v1103_v37  ;;  %v1199_v7 = vadd.f32 %v1183_v45, %v1167_v58  ;;  %v1015_v36 = vadd.f32 %v999_v27, %v920_v35  ;;  %v1166_v25 = vld [vmem:[#allocation5 + $0x10] sm:$0xff]  ;;  %1023 = vst [vmem:[#allocation2 + $0x18] sm:$0xff] %v1007_v54  ;;  %v4990_v27 = vld [vmem:[#allocation42_spill] sm:$0xff]  ;;  %v4992_v11 = vld [vmem:[#allocation44_spill] sm:$0xff] }
 0x16d   : > { %vm4987_vm3 = vcmp.eq.f32.partialorder %v3602_v38, %v3681_v13  ;;  %vm4988_vm9 = vcmp.eq.f32.partialorder %v3740_v19, %v3684_v9  ;;  %v1191_v6 = vsel %vm3609_vm12, %v920_v35, 0.0  ;;  %v911_v48 = vmax.f32 %v895_v46, 1e-10  ;;  %v998_v2 = vld [vmem:[#allocation2 + $0x50] sm:$0xff]  ;;  %v1041_v46 = vld [vmem:[#allocation3 + $0x28] sm:$0xff] }
 0x16e   : > { %v1063_v10 = vsel %vm4987_vm3, %v920_v35, 0.0  ;;  %v1127_v29 = vsel %vm4988_vm9, %v920_v35, 0.0  ;;  %vm942_vm4 = vcmp.eq.f32.partialorder %v3620_v42, %v3681_v13  ;;  %vm962_vm7 = vcmp.eq.f32.partialorder %v3847_v4, %v3684_v9  ;;  %1087 = vst [vmem:[#allocation3 + $0x18] sm:$0xff] %v1071_v62  ;;  %1151 = vst [vmem:[#allocation4 + $0x18] sm:$0xff] %v1135_v17  ;;  %v1046_v50 = vld [vmem:[#allocation3 + $0x50] sm:$0xff]  ;;  %v1001_v23 = vld [vmem:[#allocation2 + $0x68] sm:$0xff] }
 0x16f   : > { %1215 = vst [vmem:[#allocation5 + $0x18] sm:$0xff] %v1199_v7  ;;  %1031 = vst [vmem:[#allocation2 + $0x58] sm:$0xff] %v1015_v36  ;;  %v1079_v38 = vadd.f32 %v1063_v10, %v1047_v47  ;;  %v1143_v63 = vadd.f32 %v1127_v29, %v1111_v12  ;;  %v1207_v8 = vadd.f32 %v1191_v6, %v1175_v14  ;;  %v919_v19 = vmax.f32 %v903_v59, 1e-10  ;;  %v1110_v30 = vld [vmem:[#allocation4 + $0x50] sm:$0xff]  ;;  %v993_v47 = vld [vmem:[#allocation2 + $0x28] sm:$0xff] }
 0x170   : > { %v1006_v0 = vadd.f32 %v990_v60, %v911_v48  ;;  %v1054_v40 = vsel %vm931_vm1, %v911_v48, 0.0  ;;  %v1118_v34 = vsel %vm951_vm11, %v911_v48, 0.0  ;;  %v1182_v1 = vsel %vm3526_vm5, %v911_v48, 0.0  ;;  %v1174_v37 = vld [vmem:[#allocation5 + $0x50] sm:$0xff]  ;;  %v4993_v12 = vld [vmem:[#allocation46_spill] sm:$0xff]  ;;  %v992_v10 = vld [vmem:[#allocation2 + $0x20] sm:$0xff] }
 0x171   : > { %vm933_vm12 = vcmp.eq.f32.partialorder %v3558_v16, %v3681_v13  ;;  %vm953_vm3 = vcmp.eq.f32.partialorder %v3660_v52, %v3684_v9  ;;  %1095 = vst [vmem:[#allocation3 + $0x58] sm:$0xff] %v1079_v38  ;;  %1159 = vst [vmem:[#allocation4 + $0x58] sm:$0xff] %v1143_v63  ;;  %v1070_v3 = vadd.f32 %v1054_v40, %v1038_v53  ;;  %v1062_v5 = vsel %vm939_vm8, %v919_v19, 0.0  ;;  %v1049_v17 = vld [vmem:[#allocation3 + $0x68] sm:$0xff]  ;;  %v1168_v38 = vld [vmem:[#allocation5 + $0x20] sm:$0xff] }
 0x172   : > { %1223 = vst [vmem:[#allocation5 + $0x58] sm:$0xff] %v1207_v8  ;;  %v1134_v58 = vadd.f32 %v1118_v34, %v1102_v18  ;;  %v1198_v28 = vadd.f32 %v1182_v1, %v1166_v25  ;;  %v1014_v51 = vadd.f32 %v998_v2, %v919_v19  ;;  %1022 = vst [vmem:[#allocation2 + $0x10] sm:$0xff] %v1006_v0  ;;  %v1190_v20 = vsel %vm3616_vm0, %v919_v19, 0.0  ;;  %v1177_v25 = vld [vmem:[#allocation5 + $0x68] sm:$0xff]  ;;  %v1040_v2 = vld [vmem:[#allocation3 + $0x20] sm:$0xff] }
 0x173   : > { %vm4989_vm5 = vcmp.eq.f32.partialorder %v3666_v57, %v3684_v9  ;;  %v898_v24 = vsub.f32 %v3718_v26, %v3823_v31  ;;  %vm941_vm1 = vcmp.eq.f32.partialorder %v3623_v43, %v3681_v13  ;;  %vm961_vm11 = vcmp.eq.f32.partialorder %v4990_v27, %v3684_v9  ;;  %1086 = vst [vmem:[#allocation3 + $0x10] sm:$0xff] %v1070_v3  ;;  %v1105_v26 = vld [vmem:[#allocation4 + $0x28] sm:$0xff]  ;;  %v1000_v40 = vld [vmem:[#allocation2 + $0x60] sm:$0xff]  ;;  %v995_v43 = vld [vmem:[#allocation2 + $0x38] sm:$0xff] }
 0x174   : > { %v1126_v61 = vsel %vm4989_vm5, %v919_v19, 0.0  ;;  %1150 = vst [vmem:[#allocation4 + $0x10] sm:$0xff] %v1134_v58  ;;  %1214 = vst [vmem:[#allocation5 + $0x10] sm:$0xff] %v1198_v28  ;;  %v1078_v39 = vadd.f32 %v1062_v5, %v1046_v50  ;;  %v1206_v57 = vadd.f32 %v1190_v20, %v1174_v37  ;;  %v906_v59 = vsub.f32 %v4991_v41, %v3826_v32  ;;  %v1169_v31 = vld [vmem:[#allocation5 + $0x28] sm:$0xff]  ;;  %v4998_v34 = vld [vmem:[#allocation37_spill] sm:$0xff] }
 0x175   : > { %1030 = vst [vmem:[#allocation2 + $0x50] sm:$0xff] %v1014_v51  ;;  %v1142_v35 = vadd.f32 %v1126_v61, %v1110_v30  ;;  %v914_v54 = vmax.f32 %v898_v24, 1e-10  ;;  %v897_v45 = vsub.f32 %v4992_v11, %v3828_v21  ;;  %v905_v14 = vsub.f32 %v4993_v12, %v3833_v49  ;;  %v1048_v51 = vld [vmem:[#allocation3 + $0x60] sm:$0xff]  ;;  %v5000_v20 = vld [vmem:[#allocation32_spill] sm:$0xff]  ;;  %v5004_v12 = vld [vmem:[#allocation38_spill] sm:$0xff] }
 0x176   : > { %v3894_v60 = vmul.f32 2.0, %v3801_v56  ;;  %1094 = vst [vmem:[#allocation3 + $0x50] sm:$0xff] %v1078_v39  ;;  %1222 = vst [vmem:[#allocation5 + $0x50] sm:$0xff] %v1206_v57  ;;  %v922_v62 = vmax.f32 %v906_v59, 1e-10  ;;  %v3897_v32 = vmul.f32 2.0, %v3803_v44  ;;  %vm4994_vm0 = vcmp.eq.f32.partialorder %v3674_v22, %v3684_v9 }
 0x177   : > { %1158 = vst [vmem:[#allocation4 + $0x50] sm:$0xff] %v1142_v35  ;;  %v3900_v7 = vmul.f32 2.0, %v3810_v33  ;;  %v3903_v36 = vmul.f32 2.0, %v3812_v55  ;;  %v1009_v21 = vadd.f32 %v993_v47, %v914_v54  ;;  %v1057_v56 = vsel %vm934_vm10, %v914_v54, 0.0  ;;  %v1113_v44 = vld [vmem:[#allocation4 + $0x68] sm:$0xff]  ;;  %v4996_v33 = vld [vmem:[#allocation31_spill] sm:$0xff] }
 0x178   : > { %v1121_v49 = vsel %vm4994_vm0, %v914_v54, 0.0  ;;  %v1185_v18 = vsel %vm3562_vm13, %v914_v54, 0.0  ;;  %vm936_vm8 = vcmp.eq.f32.partialorder %v4996_v33, %v3681_v13  ;;  %v1073_v55 = vadd.f32 %v1057_v56, %v1041_v46  ;;  %v1112_v5 = vld [vmem:[#allocation4 + $0x60] sm:$0xff]  ;;  %v5002_v41 = vld [vmem:[#allocation48_spill] sm:$0xff]  ;;  %v772_v54 = vpop.permute.xlu1 %771 }
 0x179   : > { %v1137_v29 = vadd.f32 %v1121_v49, %v1105_v26  ;;  %v1201_v6 = vadd.f32 %v1185_v18, %v1169_v31  ;;  %v1017_v48 = vadd.f32 %v1001_v23, %v922_v62  ;;  %1025 = vst [vmem:[#allocation2 + $0x28] sm:$0xff] %v1009_v21  ;;  %v1065_v22 = vsel %vm942_vm4, %v922_v62, 0.0  ;;  %v1176_v61 = vld [vmem:[#allocation5 + $0x60] sm:$0xff]  ;;  %v1043_v11 = vld [vmem:[#allocation3 + $0x38] sm:$0xff]  ;;  %v5006_v49 = vld [vmem:[#allocation47_spill] sm:$0xff] }
 0x17a   : > { %v1129_v63 = vsel %vm962_vm7, %v922_v62, 0.0  ;;  %v1193_v19 = vsel %vm3627_vm6, %v922_v62, 0.0  ;;  %v913_v0 = vmax.f32 %v897_v45, 1e-10  ;;  %vm944_vm13 = vcmp.eq.f32.partialorder %v4998_v34, %v3681_v13  ;;  %1089 = vst [vmem:[#allocation3 + $0x28] sm:$0xff] %v1073_v55  ;;  %v5003_v45 = vld [vmem:[#allocation50_spill] sm:$0xff] }
 0x17b   : > { %1153 = vst [vmem:[#allocation4 + $0x28] sm:$0xff] %v1137_v29  ;;  %1217 = vst [vmem:[#allocation5 + $0x28] sm:$0xff] %v1201_v6  ;;  %v1081_v1 = vadd.f32 %v1065_v22, %v1049_v17  ;;  %v1145_v50 = vadd.f32 %v1129_v63, %v1113_v44  ;;  %v1209_v42 = vadd.f32 %v1193_v19, %v1177_v25  ;;  %v921_v30 = vmax.f32 %v905_v14, 1e-10  ;;  %v1107_v62 = vld [vmem:[#allocation4 + $0x38] sm:$0xff]  ;;  %v5005_v21 = vld [vmem:[#allocation45_spill] sm:$0xff] }
 0x17c   : > { %1033 = vst [vmem:[#allocation2 + $0x68] sm:$0xff] %v1017_v48  ;;  %v1008_v37 = vadd.f32 %v992_v10, %v913_v0  ;;  %v1056_v4 = vsel %vm933_vm12, %v913_v0, 0.0  ;;  %v1120_v3 = vsel %vm953_vm3, %v913_v0, 0.0  ;;  %v1184_v28 = vsel %vm3569_vm15, %v913_v0, 0.0  ;;  %v1171_v17 = vld [vmem:[#allocation5 + $0x38] sm:$0xff]  ;;  %v5007_v18 = vld [vmem:[#allocation41_spill] sm:$0xff]  ;;  %v768_v10 = vpop.permute.xlu0 %767 }
 0x17d   : > { %vm935_vm6 = vcmp.eq.f32.partialorder %v5000_v20, %v3681_v13  ;;  %1097 = vst [vmem:[#allocation3 + $0x68] sm:$0xff] %v1081_v1  ;;  %1161 = vst [vmem:[#allocation4 + $0x68] sm:$0xff] %v1145_v50  ;;  %v1072_v24 = vadd.f32 %v1056_v4, %v1040_v2  ;;  %v1136_v39 = vadd.f32 %v1120_v3, %v1104_v15  ;;  %v1064_v52 = vsel %vm941_vm1, %v921_v30, 0.0  ;;  %v5008_v44 = vld [vmem:[#allocation43_spill] sm:$0xff]  ;;  %v1051_v25 = vld [vmem:[#allocation3 + $0x78] sm:$0xff] }
 0x17e   : > { %1225 = vst [vmem:[#allocation5 + $0x68] sm:$0xff] %v1209_v42  ;;  %v1200_v16 = vadd.f32 %v1184_v28, %v1168_v38  ;;  %v1016_v35 = vadd.f32 %v1000_v40, %v921_v30  ;;  %1024 = vst [vmem:[#allocation2 + $0x20] sm:$0xff] %v1008_v37  ;;  %v1128_v57 = vsel %vm961_vm11, %v921_v30, 0.0  ;;  %v1192_v46 = vsel %vm3634_vm14, %v921_v30, 0.0  ;;  %v5009_v29 = vld [vmem:[#allocation33_spill] sm:$0xff]  ;;  %v1179_v48 = vld [vmem:[#allocation5 + $0x78] sm:$0xff] }
 0x17f   : > { %v900_v59 = vsub.f32 %v5002_v41, %v3894_v60  ;;  %1088 = vst [vmem:[#allocation3 + $0x20] sm:$0xff] %v1072_v24  ;;  %1152 = vst [vmem:[#allocation4 + $0x20] sm:$0xff] %v1136_v39  ;;  %v1080_v26 = vadd.f32 %v1064_v52, %v1048_v51  ;;  %v1144_v31 = vadd.f32 %v1128_v57, %v1112_v5  ;;  %v1003_v60 = vld [vmem:[#allocation2 + $0x78] sm:$0xff]  ;;  %vm5010_vm9 = vnez %v5009_v29  ;;  %v994_v2 = vld [vmem:[#allocation2 + $0x30] sm:$0xff] }
 0x180   : > { %1216 = vst [vmem:[#allocation5 + $0x20] sm:$0xff] %v1200_v16  ;;  %1032 = vst [vmem:[#allocation2 + $0x60] sm:$0xff] %v1016_v35  ;;  %v1208_v23 = vadd.f32 %v1192_v46, %v1176_v61  ;;  %v908_v27 = vsub.f32 %v5003_v45, %v3897_v32  ;;  %vm943_vm15 = vcmp.eq.f32.partialorder %v5004_v12, %v3681_v13  ;;  %v1002_v15 = vld [vmem:[#allocation2 + $0x70] sm:$0xff]  ;;  %v1115_v3 = vld [vmem:[#allocation4 + $0x78] sm:$0xff] }
 0x181   : > { %v916_v14 = vmax.f32 %v900_v59, 1e-10  ;;  %v899_v56 = vsub.f32 %v5005_v21, %v3900_v7  ;;  %v907_v53 = vsub.f32 %v5006_v49, %v3903_v36  ;;  %vm955_vm14 = vcmp.eq.f32.partialorder %v5007_v18, %v3684_v9  ;;  %1096 = vst [vmem:[#allocation3 + $0x60] sm:$0xff] %v1080_v26  ;;  %1160 = vst [vmem:[#allocation4 + $0x60] sm:$0xff] %v1144_v31  ;;  %v1042_v19 = vld [vmem:[#allocation3 + $0x30] sm:$0xff]  ;;  %v5012_v5 = vld [vmem:[#allocation34_spill] sm:$0xff] }
 0x182   : > { %vm956_vm7 = vcmp.eq.f32.partialorder %v5008_v44, %v3684_v9  ;;  %1224 = vst [vmem:[#allocation5 + $0x60] sm:$0xff] %v1208_v23  ;;  %v924_v32 = vmax.f32 %v908_v27, 1e-10  ;;  %vm964_vm10 = vcmp.eq.f32.partialorder %v772_v54, %v3684_v9  ;;  %v1106_v0 = vld [vmem:[#allocation4 + $0x30] sm:$0xff]  ;;  %vm963_vm4 = vcmp.eq.f32.partialorder %v768_v10, %v3684_v9  ;;  %v5014_v41 = vld [vmem:[#allocation40_spill] sm:$0xff] }
 0x183   : > { %v1011_v55 = vadd.f32 %v995_v43, %v916_v14  ;;  %v1059_v7 = vsel %vm936_vm8, %v916_v14, 0.0  ;;  %v1123_v36 = vsel %vm956_vm7, %v916_v14, 0.0  ;;  %v1187_v6 = vsel %vm5010_vm9, %v916_v14, 0.0  ;;  %v1170_v40 = vld [vmem:[#allocation5 + $0x30] sm:$0xff] }
 0x184   : > { %v1075_v38 = vadd.f32 %v1059_v7, %v1043_v11  ;;  %v1139_v22 = vadd.f32 %v1123_v36, %v1107_v62  ;;  %v1203_v63 = vadd.f32 %v1187_v6, %v1171_v17  ;;  %v1019_v8 = vadd.f32 %v1003_v60, %v924_v32  ;;  %v1050_v24 = vld [vmem:[#allocation3 + $0x70] sm:$0xff] }
 0x185   : > { %1027 = vst [vmem:[#allocation2 + $0x38] sm:$0xff] %v1011_v55  ;;  %v1067_v33 = vsel %vm944_vm13, %v924_v32, 0.0  ;;  %v1195_v50 = vsel %vm3645_vm2, %v924_v32, 0.0  ;;  %v915_v42 = vmax.f32 %v899_v56, 1e-10  ;;  %v1131_v58 = vsel %vm964_vm10, %v924_v32, 0.0 }
 0x186   : > { %v923_v30 = vmax.f32 %v907_v53, 1e-10  ;;  %1091 = vst [vmem:[#allocation3 + $0x38] sm:$0xff] %v1075_v38  ;;  %1155 = vst [vmem:[#allocation4 + $0x38] sm:$0xff] %v1139_v22  ;;  %v1083_v37 = vadd.f32 %v1067_v33, %v1051_v25  ;;  %v1211_v4 = vadd.f32 %v1195_v50, %v1179_v48  ;;  %vm5013_vm2 = vnez %v5012_v5  ;;  %v1114_v39 = vld [vmem:[#allocation4 + $0x70] sm:$0xff] }
 0x187   : > { %1219 = vst [vmem:[#allocation5 + $0x38] sm:$0xff] %v1203_v63  ;;  %1035 = vst [vmem:[#allocation2 + $0x78] sm:$0xff] %v1019_v8  ;;  %v1010_v28 = vadd.f32 %v994_v2, %v915_v42  ;;  %v1058_v34 = vsel %vm935_vm6, %v915_v42, 0.0  ;;  %v1122_v51 = vsel %vm955_vm14, %v915_v42, 0.0  ;;  %v1186_v61 = vsel %vm5013_vm2, %v915_v42, 0.0  ;;  %v1178_v16 = vld [vmem:[#allocation5 + $0x70] sm:$0xff] }
 0x188   : > { %1099 = vst [vmem:[#allocation3 + $0x78] sm:$0xff] %v1083_v37  ;;  %1227 = vst [vmem:[#allocation5 + $0x78] sm:$0xff] %v1211_v4  ;;  %v1074_v35 = vadd.f32 %v1058_v34, %v1042_v19  ;;  %v1138_v52 = vadd.f32 %v1122_v51, %v1106_v0  ;;  %v1202_v57 = vadd.f32 %v1186_v61, %v1170_v40  ;;  %v1066_v20 = vsel %vm943_vm15, %v923_v30, 0.0  ;;  %1231 = sbr.rel (%p2638_p2) target bundleno = 1025 (0x401), region = 44 }
 0x189   : > { %v1018_v47 = vadd.f32 %v1002_v15, %v923_v30  ;;  %1026 = vst [vmem:[#allocation2 + $0x30] sm:$0xff] %v1010_v28  ;;  %v1130_v46 = vsel %vm963_vm4, %v923_v30, 0.0  ;;  %vm5015_vm12 = vnez %v5014_v41  ;;  %v1147_v54 = vadd.f32 %v1131_v58, %v1115_v3 }
 0x18a   : > { %v1194_v59 = vsel %vm5015_vm12, %v923_v30, 0.0  ;;  %1090 = vst [vmem:[#allocation3 + $0x30] sm:$0xff] %v1074_v35  ;;  %1154 = vst [vmem:[#allocation4 + $0x30] sm:$0xff] %v1138_v52  ;;  %v1082_v26 = vadd.f32 %v1066_v20, %v1050_v24  ;;  %v1146_v31 = vadd.f32 %v1130_v46, %v1114_v39 }
 0x18b   : > { %1218 = vst [vmem:[#allocation5 + $0x30] sm:$0xff] %v1202_v57  ;;  %1034 = vst [vmem:[#allocation2 + $0x70] sm:$0xff] %v1018_v47  ;;  %v1210_v23 = vadd.f32 %v1194_v59, %v1178_v16 }
 0x18c   : > { %1163 = vst [vmem:[#allocation4 + $0x78] sm:$0xff] %v1147_v54  ;;  %1098 = vst [vmem:[#allocation3 + $0x70] sm:$0xff] %v1082_v26 }
 0x18d   : > { %1162 = vst [vmem:[#allocation4 + $0x70] sm:$0xff] %v1146_v31  ;;  %1226 = vst [vmem:[#allocation5 + $0x70] sm:$0xff] %v1210_v23 }
 0x18f   : > { %v1234_v9 = vld [vmem:[#allocation2 + $0x10] sm:$0xff]  ;;  %v1232_v13 = vld [vmem:[#allocation2] sm:$0xff]  ;;  %v1235_v43 = vld [vmem:[#allocation2 + $0x18] sm:$0xff]  ;;  %s3087_s18 = smov 127   ;;  %s3088_s20 = smov 126  }
 0x190   : > { %1252 = vadd.xlane.f32.xlu1 %v1234_v9  ;;  %1248 = vadd.xlane.f32.xlu0 %v1232_v13  ;;  %v1233_v11 = vld [vmem:[#allocation2 + $0x8] sm:$0xff]  ;;  %v1236_v27 = vld [vmem:[#allocation2 + $0x20] sm:$0xff]  ;;  %v1239_v12 = vld [vmem:[#allocation2 + $0x38] sm:$0xff]  ;;  %s3090_s21 = smov 125  }
 0x191   : > { %v1237_v45 = vld [vmem:[#allocation2 + $0x28] sm:$0xff]  ;;  %v1238_v14 = vld [vmem:[#allocation2 + $0x30] sm:$0xff]  ;;  %v1240_v17 = vld [vmem:[#allocation2 + $0x40] sm:$0xff] }
 0x192   : > { %v1241_v62 = vld [vmem:[#allocation2 + $0x48] sm:$0xff]  ;;  %v1243_v60 = vld [vmem:[#allocation2 + $0x58] sm:$0xff]  ;;  %v1242_v21 = vld [vmem:[#allocation2 + $0x50] sm:$0xff] }
 0x193   : > { %v1245_v56 = vld [vmem:[#allocation2 + $0x68] sm:$0xff]  ;;  %v1244_v49 = vld [vmem:[#allocation2 + $0x60] sm:$0xff]  ;;  %v1247_v53 = vld [vmem:[#allocation2 + $0x78] sm:$0xff] }
 0x194   : > { %1254 = vadd.xlane.f32.xlu1 %v1235_v43  ;;  %1250 = vadd.xlane.f32.xlu0 %v1233_v11  ;;  %v1246_v18 = vld [vmem:[#allocation2 + $0x70] sm:$0xff]  ;;  %v1281_v44 = vld [vmem:[#allocation3 + $0x8] sm:$0xff]  ;;  %v1280_v32 = vld [vmem:[#allocation3] sm:$0xff] }
 0x195   : > { %v1283_v25 = vld [vmem:[#allocation3 + $0x18] sm:$0xff]  ;;  %v1282_v10 = vld [vmem:[#allocation3 + $0x10] sm:$0xff]  ;;  %v1285_v55 = vld [vmem:[#allocation3 + $0x28] sm:$0xff] }
 0x196   : > { %v1284_v7 = vld [vmem:[#allocation3 + $0x20] sm:$0xff]  ;;  %v1287_v36 = vld [vmem:[#allocation3 + $0x38] sm:$0xff]  ;;  %v1286_v29 = vld [vmem:[#allocation3 + $0x30] sm:$0xff] }
 0x197   : > { %v1289_v6 = vld [vmem:[#allocation3 + $0x48] sm:$0xff]  ;;  %v1288_v48 = vld [vmem:[#allocation3 + $0x40] sm:$0xff]  ;;  %v1291_v2 = vld [vmem:[#allocation3 + $0x58] sm:$0xff] }
 0x198   : > { %1258 = vadd.xlane.f32.xlu1 %v1237_v45  ;;  %1256 = vadd.xlane.f32.xlu0 %v1236_v27  ;;  %v1290_v15 = vld [vmem:[#allocation3 + $0x50] sm:$0xff]  ;;  %v1293_v38 = vld [vmem:[#allocation3 + $0x68] sm:$0xff]  ;;  %v1292_v22 = vld [vmem:[#allocation3 + $0x60] sm:$0xff] }
 0x199   : > { %v1295_v63 = vld [vmem:[#allocation3 + $0x78] sm:$0xff]  ;;  %v1294_v8 = vld [vmem:[#allocation3 + $0x70] sm:$0xff]  ;;  %v1329_v19 = vld [vmem:[#allocation4 + $0x8] sm:$0xff] }
 0x19a   : > { %v1328_v0 = vld [vmem:[#allocation4] sm:$0xff]  ;;  %v1331_v40 = vld [vmem:[#allocation4 + $0x18] sm:$0xff]  ;;  %v1330_v33 = vld [vmem:[#allocation4 + $0x10] sm:$0xff] }
 0x19b   : > { %v1333_v1 = vld [vmem:[#allocation4 + $0x28] sm:$0xff]  ;;  %v1332_v50 = vld [vmem:[#allocation4 + $0x20] sm:$0xff]  ;;  %v1335_v42 = vld [vmem:[#allocation4 + $0x38] sm:$0xff] }
 0x19c   : > { %1262 = vadd.xlane.f32.xlu1 %v1239_v12  ;;  %1260 = vadd.xlane.f32.xlu0 %v1238_v14  ;;  %v1334_v30 = vld [vmem:[#allocation4 + $0x30] sm:$0xff]  ;;  %v1337_v37 = vld [vmem:[#allocation4 + $0x48] sm:$0xff]  ;;  %v1336_v4 = vld [vmem:[#allocation4 + $0x40] sm:$0xff] }
 0x19d   : > { %v1339_v3 = vld [vmem:[#allocation4 + $0x58] sm:$0xff]  ;;  %v1338_v58 = vld [vmem:[#allocation4 + $0x50] sm:$0xff]  ;;  %v1341_v28 = vld [vmem:[#allocation4 + $0x68] sm:$0xff] }
 0x19e   : > { %v1340_v34 = vld [vmem:[#allocation4 + $0x60] sm:$0xff]  ;;  %v1343_v51 = vld [vmem:[#allocation4 + $0x78] sm:$0xff]  ;;  %v1342_v5 = vld [vmem:[#allocation4 + $0x70] sm:$0xff] }
 0x19f   : > { %v1377_v61 = vld [vmem:[#allocation5 + $0x8] sm:$0xff]  ;;  %v1376_v24 = vld [vmem:[#allocation5] sm:$0xff]  ;;  %v1379_v39 = vld [vmem:[#allocation5 + $0x18] sm:$0xff] }
 0x1a0   : > { %1266 = vadd.xlane.f32.xlu1 %v1241_v62  ;;  %1264 = vadd.xlane.f32.xlu0 %v1240_v17  ;;  %v1378_v16 = vld [vmem:[#allocation5 + $0x10] sm:$0xff]  ;;  %v1381_v35 = vld [vmem:[#allocation5 + $0x28] sm:$0xff]  ;;  %v1380_v52 = vld [vmem:[#allocation5 + $0x20] sm:$0xff] }
 0x1a1   : > { %v1383_v57 = vld [vmem:[#allocation5 + $0x38] sm:$0xff]  ;;  %v1382_v47 = vld [vmem:[#allocation5 + $0x30] sm:$0xff]  ;;  %v1385_v20 = vld [vmem:[#allocation5 + $0x48] sm:$0xff] }
 0x1a2   : > { %v1384_v46 = vld [vmem:[#allocation5 + $0x40] sm:$0xff]  ;;  %v1387_v41 = vld [vmem:[#allocation5 + $0x58] sm:$0xff]  ;;  %v1386_v59 = vld [vmem:[#allocation5 + $0x50] sm:$0xff] }
 0x1a3   : > { %v1389_v54 = vld [vmem:[#allocation5 + $0x68] sm:$0xff]  ;;  %v1388_v26 = vld [vmem:[#allocation5 + $0x60] sm:$0xff]  ;;  %v1391_v31 = vld [vmem:[#allocation5 + $0x78] sm:$0xff] }
 0x1a4   : > { %1270 = vadd.xlane.f32.xlu1 %v1243_v60  ;;  %1268 = vadd.xlane.f32.xlu0 %v1242_v21  ;;  %v1390_v23 = vld [vmem:[#allocation5 + $0x70] sm:$0xff] }
 0x1a8   : > { %1274 = vadd.xlane.f32.xlu1 %v1245_v56  ;;  %1272 = vadd.xlane.f32.xlu0 %v1244_v49 }
 0x1ac   : > { %1278 = vadd.xlane.f32.xlu1 %v1247_v53  ;;  %1276 = vadd.xlane.f32.xlu0 %v1246_v18 }
 0x1b0   : > { %1298 = vadd.xlane.f32.xlu1 %v1281_v44  ;;  %1296 = vadd.xlane.f32.xlu0 %v1280_v32 }
 0x1b4   : > { %1302 = vadd.xlane.f32.xlu1 %v1283_v25  ;;  %1300 = vadd.xlane.f32.xlu0 %v1282_v10 }
 0x1b8   : > { %1306 = vadd.xlane.f32.xlu1 %v1285_v55  ;;  %1304 = vadd.xlane.f32.xlu0 %v1284_v7 }
 0x1bc   : > { %1310 = vadd.xlane.f32.xlu1 %v1287_v36  ;;  %1308 = vadd.xlane.f32.xlu0 %v1286_v29 }
 0x1c0   : > { %1314 = vadd.xlane.f32.xlu1 %v1289_v6  ;;  %1312 = vadd.xlane.f32.xlu0 %v1288_v48 }
 0x1c4   : > { %1318 = vadd.xlane.f32.xlu1 %v1291_v2  ;;  %1316 = vadd.xlane.f32.xlu0 %v1290_v15  ;;  %v4040_v2 = vld [vmem:[%s3203_s24 + $0x8] sm:$0xff] }
 0x1c8   : > { %1322 = vadd.xlane.f32.xlu1 %v1293_v38  ;;  %1320 = vadd.xlane.f32.xlu0 %v1292_v22  ;;  %v4047_v22 = vld [vmem:[%s3203_s24] sm:$0xff] }
 0x1cc   : > { %1326 = vadd.xlane.f32.xlu1 %v1295_v63  ;;  %1324 = vadd.xlane.f32.xlu0 %v1294_v8  ;;  %v1617_v63 = vmax.f32 %v4040_v2, 1.0  ;;  %v1616_v8 = vmax.f32 %v4047_v22, 1.0 }
 0x1ce   : > { %2891 = vrcp.f32 %v1617_v63 }
 0x1cf   : > { %2893 = vrcp.f32 %v1616_v8 }
 0x1d0   : > { %1346 = vadd.xlane.f32.xlu1 %v1329_v19  ;;  %1344 = vadd.xlane.f32.xlu0 %v1328_v0 }
 0x1d4   : > { %1350 = vadd.xlane.f32.xlu1 %v1331_v40  ;;  %1348 = vadd.xlane.f32.xlu0 %v1330_v33  ;;  %v4056_v40 = vld [vmem:[%s3203_s24 + $0x10] sm:$0xff]  ;;  %v4059_v33 = vld [vmem:[%s3203_s24 + $0x18] sm:$0xff] }
 0x1d5   : > { %5044 = vst [vmem:[#allocation79_spill] sm:$0xff] %v4059_v33 }
 0x1d8   : > { %1354 = vadd.xlane.f32.xlu1 %v1333_v1  ;;  %1352 = vadd.xlane.f32.xlu0 %v1332_v50  ;;  %v1618_v1 = vmax.f32 %v4056_v40, 1.0 }
 0x1da   : > { %2895 = vrcp.f32 %v1618_v1 }
 0x1dc   : > { %1358 = vadd.xlane.f32.xlu1 %v1335_v42  ;;  %1356 = vadd.xlane.f32.xlu0 %v1334_v30  ;;  %v4067_v30 = vld [vmem:[%s3203_s24 + $0x20] sm:$0xff] }
 0x1dd   : > { %5047 = vst [vmem:[#allocation82_spill] sm:$0xff] %v4067_v30 }
 0x1e0   : > { %1362 = vadd.xlane.f32.xlu1 %v1337_v37  ;;  %1360 = vadd.xlane.f32.xlu0 %v1336_v4  ;;  %v1619_v37 = vmax.f32 %v4059_v33, 1.0  ;;  %v4071_v4 = vld [vmem:[%s3203_s24 + $0x28] sm:$0xff] }
 0x1e1   : > { %5048 = vst [vmem:[#allocation83_spill] sm:$0xff] %v4071_v4 }
 0x1e2   : > { %2897 = vrcp.f32 %v1619_v37  ;;  %v4121_v37 = vld [vmem:[%s3203_s24 + $0x48] sm:$0xff] }
 0x1e3   : > { %5052 = vst [vmem:[#allocation87_spill] sm:$0xff] %v4121_v37 }
 0x1e4   : > { %1366 = vadd.xlane.f32.xlu1 %v1339_v3  ;;  %1364 = vadd.xlane.f32.xlu0 %v1338_v58  ;;  %v4074_v3 = vmul.f32 10.0, %v4040_v2  ;;  %v4077_v58 = vmul.f32 10.0, %v4047_v22 }
 0x1e8   : > { %1370 = vadd.xlane.f32.xlu1 %v1341_v28  ;;  %1368 = vadd.xlane.f32.xlu0 %v1340_v34  ;;  %v1620_v28 = vmax.f32 %v4067_v30, 1.0 }
 0x1ea   : > { %2899 = vrcp.f32 %v1620_v28  ;;  %v4124_v28 = vmul.f32 10.0, %v4071_v4 }
 0x1ec   : > { %1374 = vadd.xlane.f32.xlu1 %v1343_v51  ;;  %1372 = vadd.xlane.f32.xlu0 %v1342_v5  ;;  %v4085_v5 = vld [vmem:[%s3203_s24 + $0x30] sm:$0xff] }
 0x1ed   : > { %5049 = vst [vmem:[#allocation84_spill] sm:$0xff] %v4085_v5 }
 0x1f0   : > { %1394 = vadd.xlane.f32.xlu1 %v1377_v61  ;;  %1392 = vadd.xlane.f32.xlu0 %v1376_v24 }
 0x1f4   : > { %1398 = vadd.xlane.f32.xlu1 %v1379_v39  ;;  %1396 = vadd.xlane.f32.xlu0 %v1378_v16  ;;  %v1621_v39 = vmax.f32 %v4071_v4, 1.0  ;;  %v4093_v16 = vld [vmem:[%s3203_s24 + $0x38] sm:$0xff] }
 0x1f5   : > { %5050 = vst [vmem:[#allocation85_spill] sm:$0xff] %v4093_v16  ;;  %v1623_v1 = vmax.f32 %v4093_v16, 1.0 }
 0x1f6   : > { %2901 = vrcp.f32 %v1621_v39 }
 0x1f8   : > { %1402 = vadd.xlane.f32.xlu1 %v1381_v35  ;;  %1400 = vadd.xlane.f32.xlu0 %v1380_v52 }
 0x1fc   : > { %1406 = vadd.xlane.f32.xlu1 %v1383_v57  ;;  %1404 = vadd.xlane.f32.xlu0 %v1382_v47  ;;  %v4098_v57 = vmul.f32 10.0, %v4059_v33  ;;  %v4101_v47 = vmul.f32 10.0, %v4056_v40 }
 0x200   : > { %1410 = vadd.xlane.f32.xlu1 %v1385_v20  ;;  %1408 = vadd.xlane.f32.xlu0 %v1384_v46  ;;  %v1622_v20 = vmax.f32 %v4085_v5, 1.0 }
 0x202   : > { %2903 = vrcp.f32 %v1622_v20 }
 0x203   : > { %2905 = vrcp.f32 %v1623_v1 }
 0x204   : > { %1414 = vadd.xlane.f32.xlu1 %v1387_v41  ;;  %1412 = vadd.xlane.f32.xlu0 %v1386_v59  ;;  %v4108_v59 = vpop.eup %2891 }
 0x205   : > { %v4117_v8 = vpop.eup %2893 }
 0x208   : > { %1418 = vadd.xlane.f32.xlu1 %v1389_v54  ;;  %1416 = vadd.xlane.f32.xlu0 %v1388_v26  ;;  %v4111_v54 = vld [vmem:[%s3203_s24 + $0x40] sm:$0xff] }
 0x209   : > { %5051 = vst [vmem:[#allocation86_spill] sm:$0xff] %v4111_v54  ;;  %v1624_v39 = vmax.f32 %v4111_v54, 1.0 }
 0x20b   : > { %2907 = vrcp.f32 %v1624_v39 }
 0x20c   : > { %1422 = vadd.xlane.f32.xlu1 %v1391_v31  ;;  %1420 = vadd.xlane.f32.xlu0 %v1390_v23 }
 0x21d   : > { %v3987_v9 = vpop.xlane.xlu1 %1252  ;;  %v3989_v13 = vpop.xlane.xlu0 %1248 }
 0x21e   : > { %5016 = vst [vmem:[#allocation51_spill] sm:$0xff] %v3987_v9 }
 0x221   : > { %v3991_v43 = vpop.xlane.xlu1 %1254  ;;  %v3993_v11 = vpop.xlane.xlu0 %1250 }
 0x222   : > { %5017 = vst [vmem:[#allocation52_spill] sm:$0xff] %v3991_v43  ;;  %5018 = vst [vmem:[#allocation53_spill] sm:$0xff] %v3993_v11 }
 0x225   : > { %v3995_v45 = vpop.xlane.xlu1 %1258  ;;  %v3997_v27 = vpop.xlane.xlu0 %1256 }
 0x226   : > { %5019 = vst [vmem:[#allocation54_spill] sm:$0xff] %v3995_v45  ;;  %5020 = vst [vmem:[#allocation55_spill] sm:$0xff] %v3997_v27 }
 0x229   : > { %v3999_v12 = vpop.xlane.xlu1 %1262  ;;  %v4001_v14 = vpop.xlane.xlu0 %1260 }
 0x22a   : > { %5021 = vst [vmem:[#allocation56_spill] sm:$0xff] %v3999_v12  ;;  %5022 = vst [vmem:[#allocation57_spill] sm:$0xff] %v4001_v14  ;;  %v4159_v14 = vmul.f32 10.0, %v4085_v5 }
 0x22d   : > { %v4003_v62 = vpop.xlane.xlu1 %1266  ;;  %v4005_v17 = vpop.xlane.xlu0 %1264 }
 0x22e   : > { %5023 = vst [vmem:[#allocation58_spill] sm:$0xff] %v4003_v62  ;;  %5024 = vst [vmem:[#allocation59_spill] sm:$0xff] %v4005_v17  ;;  %v4154_v62 = vld [vmem:[%s3203_s24 + $0x58] sm:$0xff] }
 0x22f   : > { %5054 = vst [vmem:[#allocation89_spill] sm:$0xff] %v4154_v62  ;;  %v1627_v45 = vmax.f32 %v4154_v62, 1.0 }
 0x231   : > { %v4007_v60 = vpop.xlane.xlu1 %1270  ;;  %v4009_v21 = vpop.xlane.xlu0 %1268 }
 0x232   : > { %5025 = vst [vmem:[#allocation60_spill] sm:$0xff] %v4007_v60  ;;  %5026 = vst [vmem:[#allocation61_spill] sm:$0xff] %v4009_v21  ;;  %v4140_v60 = vld [vmem:[%s3203_s24 + $0x50] sm:$0xff] }
 0x233   : > { %5053 = vst [vmem:[#allocation88_spill] sm:$0xff] %v4140_v60  ;;  %v1626_v1 = vmax.f32 %v4140_v60, 1.0  ;;  %v4215_v43 = vmul.f32 10.0, %v4140_v60  ;;  %v4229_v60 = vld [vmem:[%s3203_s24 + $0x78] sm:$0xff] }
 0x234   : > { %5058 = vst [vmem:[#allocation93_spill] sm:$0xff] %v4229_v60 }
 0x235   : > { %v4011_v56 = vpop.xlane.xlu1 %1274  ;;  %v4013_v49 = vpop.xlane.xlu0 %1272 }
 0x236   : > { %5027 = vst [vmem:[#allocation62_spill] sm:$0xff] %v4011_v56  ;;  %5028 = vst [vmem:[#allocation63_spill] sm:$0xff] %v4013_v49  ;;  %v1625_v49 = vmax.f32 %v4121_v37, 1.0 }
 0x238   : > { %2909 = vrcp.f32 %v1625_v49  ;;  %v4184_v49 = vmul.f32 10.0, %v4111_v54  ;;  %v4198_v54 = vld [vmem:[%s3203_s24 + $0x68] sm:$0xff] }
 0x239   : > { %v4015_v53 = vpop.xlane.xlu1 %1278  ;;  %v4017_v18 = vpop.xlane.xlu0 %1276  ;;  %2911 = vrcp.f32 %v1626_v1  ;;  %5056 = vst [vmem:[#allocation91_spill] sm:$0xff] %v4198_v54 }
 0x23a   : > { %5029 = vst [vmem:[#allocation64_spill] sm:$0xff] %v4015_v53  ;;  %5030 = vst [vmem:[#allocation65_spill] sm:$0xff] %v4017_v18  ;;  %2913 = vrcp.f32 %v1627_v45  ;;  %v1629_v45 = vmax.f32 %v4198_v54, 1.0 }
 0x23d   : > { %v4019_v44 = vpop.xlane.xlu1 %1298  ;;  %v4021_v32 = vpop.xlane.xlu0 %1296 }
 0x23e   : > { %5031 = vst [vmem:[#allocation66_spill] sm:$0xff] %v4019_v44 }
 0x241   : > { %v4023_v25 = vpop.xlane.xlu1 %1302  ;;  %v4025_v10 = vpop.xlane.xlu0 %1300 }
 0x242   : > { %5032 = vst [vmem:[#allocation67_spill] sm:$0xff] %v4023_v25  ;;  %5033 = vst [vmem:[#allocation68_spill] sm:$0xff] %v4025_v10 }
 0x245   : > { %v4027_v55 = vpop.xlane.xlu1 %1306  ;;  %v4029_v7 = vpop.xlane.xlu0 %1304 }
 0x246   : > { %5034 = vst [vmem:[#allocation69_spill] sm:$0xff] %v4027_v55  ;;  %5035 = vst [vmem:[#allocation70_spill] sm:$0xff] %v4029_v7 }
 0x249   : > { %v4031_v36 = vpop.xlane.xlu1 %1310  ;;  %v4033_v29 = vpop.xlane.xlu0 %1308 }
 0x24a   : > { %5036 = vst [vmem:[#allocation71_spill] sm:$0xff] %v4031_v36  ;;  %5037 = vst [vmem:[#allocation72_spill] sm:$0xff] %v4033_v29 }
 0x24d   : > { %v4035_v6 = vpop.xlane.xlu1 %1314  ;;  %v4037_v48 = vpop.xlane.xlu0 %1312 }
 0x24e   : > { %5038 = vst [vmem:[#allocation73_spill] sm:$0xff] %v4035_v6  ;;  %5039 = vst [vmem:[#allocation74_spill] sm:$0xff] %v4037_v48 }
 0x251   : > { %v4042_v15 = vpop.xlane.xlu1 %1318  ;;  %v4044_v38 = vpop.xlane.xlu0 %1316 }
 0x252   : > { %5040 = vst [vmem:[#allocation75_spill] sm:$0xff] %v4042_v15  ;;  %5041 = vst [vmem:[#allocation76_spill] sm:$0xff] %v4044_v38 }
 0x255   : > { %v4051_v19 = vpop.xlane.xlu1 %1322  ;;  %v4053_v0 = vpop.xlane.xlu0 %1320 }
 0x256   : > { %5042 = vst [vmem:[#allocation77_spill] sm:$0xff] %v4051_v19  ;;  %5043 = vst [vmem:[#allocation78_spill] sm:$0xff] %v4053_v0 }
 0x259   : > { %v4062_v50 = vpop.xlane.xlu1 %1326  ;;  %v4064_v42 = vpop.xlane.xlu0 %1324 }
 0x25a   : > { %5045 = vst [vmem:[#allocation80_spill] sm:$0xff] %v4062_v50  ;;  %5046 = vst [vmem:[#allocation81_spill] sm:$0xff] %v4064_v42 }
 0x25d   : > { %v4080_v34 = vpop.xlane.xlu1 %1346  ;;  %v4082_v51 = vpop.xlane.xlu0 %1344 }
 0x25e   : > { %v1441_v61 = vsub.f32 %v4019_v44, %v4080_v34  ;;  %v1440_v24 = vsub.f32 %v4021_v32, %v4082_v51 }
 0x260   : > { %v1537_v35 = vsub.f32 %v1441_v61, %v4074_v3  ;;  %v1536_v52 = vsub.f32 %v1440_v24, %v4077_v58  ;;  %v4127_v61 = vmul.f32 10.0, %v4067_v30 }
 0x261   : > { %v4104_v46 = vpop.xlane.xlu1 %1350  ;;  %v4106_v41 = vpop.xlane.xlu0 %1348 }
 0x262   : > { %v1443_v26 = vsub.f32 %v4023_v25, %v4104_v46  ;;  %v1442_v31 = vsub.f32 %v4025_v10, %v4106_v41  ;;  %v1553_v23 = vmax.f32 %v1537_v35, 0.0  ;;  %v1552_v63 = vmax.f32 %v1536_v52, 0.0 }
 0x264   : > { %v1539_v24 = vsub.f32 %v1443_v26, %v4098_v57  ;;  %v1538_v53 = vsub.f32 %v1442_v31, %v4101_v47  ;;  %v1665_v35 = vmul.f32 %v4108_v59, %v1553_v23  ;;  %v1664_v52 = vmul.f32 %v4117_v8, %v1552_v63  ;;  %v4148_v23 = vpop.eup %2895 }
 0x265   : > { %v4134_v18 = vpop.xlane.xlu1 %1354  ;;  %v4136_v56 = vpop.xlane.xlu0 %1352  ;;  %v4151_v63 = vmul.f32 10.0, %v4093_v16 }
 0x266   : > { %v1445_v26 = vsub.f32 %v4027_v55, %v4134_v18  ;;  %v1444_v31 = vsub.f32 %v4029_v7, %v4136_v56  ;;  %1698 = vrot.lane.b32.xlu1 %v1665_v35, %s3087_s18  ;;  %1696 = vrot.lane.b32.xlu0 %v1664_v52, %s3087_s18  ;;  %v1554_v20 = vmax.f32 %v1538_v53, 0.0  ;;  %v1555_v21 = vmax.f32 %v1539_v24, 0.0  ;;  %v4162_v53 = vpop.eup %2897  ;;  %v4170_v24 = vld [vmem:[%s3203_s24 + $0x60] sm:$0xff] }
 0x267   : > { %5055 = vst [vmem:[#allocation90_spill] sm:$0xff] %v4170_v24  ;;  %v4177_v39 = vpop.eup %2899  ;;  %v4181_v55 = vmul.f32 10.0, %v4121_v37  ;;  %v1628_v27 = vmax.f32 %v4170_v24, 1.0  ;;  %v4244_v33 = vmul.f32 10.0, %v4170_v24 }
 0x268   : > { %v1541_v17 = vsub.f32 %v1445_v26, %v4124_v28  ;;  %v1540_v12 = vsub.f32 %v1444_v31, %v4127_v61  ;;  %v1666_v35 = vmul.f32 %v4148_v23, %v1554_v20  ;;  %v1667_v5 = vmul.f32 %v4162_v53, %v1555_v21  ;;  %v4190_v4 = vpop.eup %2901 }
 0x269   : > { %v4165_v52 = vpop.xlane.xlu1 %1358  ;;  %v4167_v16 = vpop.xlane.xlu0 %1356  ;;  %2915 = vrcp.f32 %v1628_v27 }
 0x26a   : > { %v1447_v26 = vsub.f32 %v4031_v36, %v4165_v52  ;;  %v1446_v31 = vsub.f32 %v4033_v29, %v4167_v16  ;;  %1700 = vrot.lane.b32.xlu1 %v1666_v35, %s3087_s18  ;;  %v1556_v20 = vmax.f32 %v1540_v12, 0.0  ;;  %v1557_v12 = vmax.f32 %v1541_v17, 0.0  ;;  %v4206_v1 = vpop.eup %2903 }
 0x26b   : > { %v4221_v25 = vpop.eup %2905  ;;  %2917 = vrcp.f32 %v1629_v45  ;;  %v4266_v45 = vmul.f32 10.0, %v4229_v60 }
 0x26c   : > { %v1543_v36 = vsub.f32 %v1447_v26, %v4151_v63  ;;  %v1542_v29 = vsub.f32 %v1446_v31, %v4159_v14  ;;  %v1668_v35 = vmul.f32 %v4177_v39, %v1556_v20  ;;  %v4209_v31 = vld [vmem:[%s3203_s24 + $0x70] sm:$0xff]  ;;  %v4212_v20 = vmul.f32 10.0, %v4154_v62  ;;  %v4238_v27 = vpop.eup %2907 }
 0x26d   : > { %v4193_v37 = vpop.xlane.xlu1 %1362  ;;  %v4195_v7 = vpop.xlane.xlu0 %1360  ;;  %5057 = vst [vmem:[#allocation92_spill] sm:$0xff] %v4209_v31 }
 0x26e   : > { %v1449_v21 = vsub.f32 %v4035_v6, %v4193_v37  ;;  %v1448_v26 = vsub.f32 %v4037_v48, %v4195_v7  ;;  %1702 = vrot.lane.b32.xlu1 %v1667_v5, %s3087_s18  ;;  %1704 = vrot.lane.b32.xlu0 %v1668_v35, %s3087_s18  ;;  %v1558_v17 = vmax.f32 %v1542_v29, 0.0  ;;  %v1559_v6 = vmax.f32 %v1543_v36, 0.0  ;;  %v4247_v10 = vpop.eup %2909 }
 0x26f   : > { %v1669_v35 = vmul.f32 %v4190_v4, %v1557_v12  ;;  %v1630_v36 = vmax.f32 %v4209_v31, 1.0 }
 0x270   : > { %v1545_v48 = vsub.f32 %v1449_v21, %v4181_v55  ;;  %v1544_v5 = vsub.f32 %v1448_v26, %v4184_v49  ;;  %v1670_v29 = vmul.f32 %v4206_v1, %v1558_v17  ;;  %v4241_v17 = vmul.f32 10.0, %v4198_v54 }
 0x271   : > { %v4224_v30 = vpop.xlane.xlu1 %1366  ;;  %v4226_v62 = vpop.xlane.xlu0 %1364  ;;  %v1671_v9 = vmul.f32 %v4221_v25, %v1559_v6  ;;  %2919 = vrcp.f32 %v1630_v36 }
 0x272   : > { %v1451_v21 = vsub.f32 %v4042_v15, %v4224_v30  ;;  %v1450_v12 = vsub.f32 %v4044_v38, %v4226_v62  ;;  %1706 = vrot.lane.b32.xlu1 %v1669_v35, %s3087_s18  ;;  %1708 = vrot.lane.b32.xlu0 %v1670_v29, %s3087_s18  ;;  %v1560_v26 = vmax.f32 %v1544_v5, 0.0  ;;  %v1561_v29 = vmax.f32 %v1545_v48, 0.0  ;;  %v4263_v48 = vpop.eup %2911 }
 0x273   : > { %v1631_v5 = vmax.f32 %v4229_v60, 1.0 }
 0x274   : > { %v1547_v15 = vsub.f32 %v1451_v21, %v4212_v20  ;;  %v1546_v38 = vsub.f32 %v1450_v12, %v4215_v43  ;;  %v1672_v35 = vmul.f32 %v4238_v27, %v1560_v26  ;;  %v4269_v12 = vmul.f32 10.0, %v4209_v31 }
 0x275   : > { %v4253_v11 = vpop.xlane.xlu1 %1370  ;;  %v4255_v54 = vpop.xlane.xlu0 %1368  ;;  %2921 = vrcp.f32 %v1631_v5 }
 0x276   : > { %5059 = vst [vmem:[#allocation94_spill] sm:$0xff] %v4253_v11  ;;  %v1453_v6 = vsub.f32 %v4051_v19, %v4253_v11  ;;  %v1452_v24 = vsub.f32 %v4053_v0, %v4255_v54  ;;  %1710 = vrot.lane.b32.xlu1 %v1671_v9, %s3087_s18  ;;  %1712 = vrot.lane.b32.xlu0 %v1672_v35, %s3087_s18  ;;  %v1562_v21 = vmax.f32 %v1546_v38, 0.0  ;;  %5060 = vst [vmem:[#allocation95_spill] sm:$0xff] %v4269_v12  ;;  %v4275_v11 = vpop.eup %2913 }
 0x277   : > { %v1563_v36 = vmax.f32 %v1547_v15, 0.0  ;;  %v1673_v0 = vmul.f32 %v4247_v10, %v1561_v29  ;;  %v4287_v29 = vpop.eup %2915  ;;  %2923 = vlog2.f32 %v4047_v22 }
 0x278   : > { %v1549_v26 = vsub.f32 %v1453_v6, %v4241_v17  ;;  %v1548_v19 = vsub.f32 %v1452_v24, %v4244_v33  ;;  %v1674_v9 = vmul.f32 %v4263_v48, %v1562_v21  ;;  %5063 = vst [vmem:[#allocation98_spill] sm:$0xff] %v4287_v29  ;;  %2925 = vlog2.f32 %v4040_v2 }
 0x279   : > { %v4277_v38 = vpop.xlane.xlu1 %1374  ;;  %v4279_v35 = vpop.xlane.xlu0 %1372  ;;  %v1675_v6 = vmul.f32 %v4275_v11, %v1563_v36  ;;  %2927 = vlog2.f32 %v4056_v40 }
 0x27a   : > { %5061 = vst [vmem:[#allocation96_spill] sm:$0xff] %v4277_v38  ;;  %5062 = vst [vmem:[#allocation97_spill] sm:$0xff] %v4279_v35  ;;  %v1455_v60 = vsub.f32 %v4062_v50, %v4277_v38  ;;  %v1454_v15 = vsub.f32 %v4064_v42, %v4279_v35  ;;  %1714 = vrot.lane.b32.xlu1 %v1673_v0, %s3087_s18  ;;  %1716 = vrot.lane.b32.xlu0 %v1674_v9, %s3087_s18  ;;  %v1564_v24 = vmax.f32 %v1548_v19, 0.0  ;;  %v4296_v19 = vpop.eup %2917 }
 0x27b   : > { %v1565_v44 = vmax.f32 %v1549_v26, 0.0  ;;  %v4299_v9 = vpop.eup %2919 }
 0x27c   : > { %v1551_v5 = vsub.f32 %v1455_v60, %v4266_v45  ;;  %v1550_v21 = vsub.f32 %v1454_v15, %v4269_v12  ;;  %v1676_v31 = vmul.f32 %v4287_v29, %v1564_v24 }
 0x27d   : > { %v1395_v50 = vpop.xlane.xlu1 %1394  ;;  %v1393_v38 = vpop.xlane.xlu0 %1392  ;;  %v1677_v24 = vmul.f32 %v4296_v19, %v1565_v44 }
 0x27e   : > { %v1505_v42 = vsub.f32 %v1395_v50, %v4074_v3  ;;  %v1504_v0 = vsub.f32 %v1393_v38, %v4077_v58  ;;  %1718 = vrot.lane.b32.xlu1 %v1675_v6, %s3087_s18  ;;  %1720 = vrot.lane.b32.xlu0 %v1676_v31, %s3087_s18  ;;  %v1566_v36 = vmax.f32 %v1550_v21, 0.0  ;;  %v1567_v26 = vmax.f32 %v1551_v5, 0.0 }
 0x27f   : > { %v1456_v35 = vsub.f32 %v4082_v51, %v1393_v38  ;;  %v4307_v31 = vpop.eup %2921  ;;  %v1457_v51 = vsub.f32 %v4080_v34, %v1395_v50 }
 0x280   : > { %v1521_v60 = vmax.f32 %v1505_v42, 0.0  ;;  %v1520_v15 = vmax.f32 %v1504_v0, 0.0  ;;  %v1678_v58 = vmul.f32 %v4299_v9, %v1566_v36 }
 0x281   : > { %v1399_v29 = vpop.xlane.xlu1 %1398  ;;  %v1397_v3 = vpop.xlane.xlu0 %1396  ;;  %v1760_v36 = vmul.f32 %v4117_v8, %v1456_v35  ;;  %v1761_v35 = vmul.f32 %v4108_v59, %v1457_v51 }
 0x282   : > { %v1507_v6 = vsub.f32 %v1399_v29, %v4098_v57  ;;  %v1506_v12 = vsub.f32 %v1397_v3, %v4101_v47  ;;  %1722 = vrot.lane.b32.xlu1 %v1677_v24, %s3087_s18  ;;  %1724 = vrot.lane.b32.xlu0 %v1678_v58, %s3087_s18  ;;  %v4311_v42 = vmul.f32 %v4108_v59, %v1521_v60 }
 0x283   : > { %v4314_v44 = vmul.f32 %v4117_v8, %v1520_v15  ;;  %v1679_v57 = vmul.f32 %v4307_v31, %v1567_v26  ;;  %v1458_v47 = vsub.f32 %v4106_v41, %v1397_v3  ;;  %v1459_v41 = vsub.f32 %v4104_v46, %v1399_v29 }
 0x284   : > { %v1523_v38 = vmax.f32 %v1507_v6, 0.0  ;;  %v1522_v5 = vmax.f32 %v1506_v12, 0.0 }
 0x285   : > { %v1403_v21 = vpop.xlane.xlu1 %1402  ;;  %v1401_v0 = vpop.xlane.xlu0 %1400  ;;  %v1762_v3 = vmul.f32 %v4148_v23, %v1458_v47 }
 0x286   : > { %v1509_v24 = vsub.f32 %v1403_v21, %v4124_v28  ;;  %v1508_v60 = vsub.f32 %v1401_v0, %v4127_v61  ;;  %1726 = vrot.lane.b32.xlu1 %v1679_v57, %s3087_s18  ;;  %1792 = vrot.lane.b32.xlu0 %v1760_v36, %s3088_s20  ;;  %v4325_v50 = vmul.f32 %v4148_v23, %v1522_v5 }
 0x287   : > { %v4328_v34 = vmul.f32 %v4162_v53, %v1523_v38  ;;  %v1460_v28 = vsub.f32 %v4136_v56, %v1401_v0  ;;  %v1461_v56 = vsub.f32 %v4134_v18, %v1403_v21  ;;  %v1763_v5 = vmul.f32 %v4162_v53, %v1459_v41 }
 0x288   : > { %v1525_v12 = vmax.f32 %v1509_v24, 0.0  ;;  %v1524_v15 = vmax.f32 %v1508_v60, 0.0 }
 0x289   : > { %v1407_v61 = vpop.xlane.xlu1 %1406  ;;  %v1405_v26 = vpop.xlane.xlu0 %1404  ;;  %v1764_v47 = vmul.f32 %v4177_v39, %v1460_v28  ;;  %v1765_v41 = vmul.f32 %v4190_v4, %v1461_v56 }
 0x28a   : > { %v1511_v58 = vsub.f32 %v1407_v61, %v4151_v63  ;;  %v1510_v6 = vsub.f32 %v1405_v26, %v4159_v14  ;;  %1794 = vrot.lane.b32.xlu1 %v1761_v35, %s3088_s20  ;;  %1796 = vrot.lane.b32.xlu0 %v1762_v3, %s3088_s20  ;;  %v4339_v46 = vmul.f32 %v4177_v39, %v1524_v15 }
 0x28b   : > { %v4342_v29 = vmul.f32 %v4190_v4, %v1525_v12  ;;  %v1462_v63 = vsub.f32 %v4167_v16, %v1405_v26  ;;  %v1463_v16 = vsub.f32 %v4165_v52, %v1407_v61 }
 0x28c   : > { %v1527_v51 = vmax.f32 %v1511_v58, 0.0  ;;  %v1526_v38 = vmax.f32 %v1510_v6, 0.0 }
 0x28d   : > { %v1411_v57 = vpop.xlane.xlu1 %1410  ;;  %v1409_v14 = vpop.xlane.xlu0 %1408  ;;  %v1766_v15 = vmul.f32 %v4206_v1, %v1462_v63  ;;  %v1767_v58 = vmul.f32 %v4221_v25, %v1463_v16 }
 0x28e   : > { %v1513_v0 = vsub.f32 %v1411_v57, %v4181_v55  ;;  %v1512_v36 = vsub.f32 %v1409_v14, %v4184_v49  ;;  %1798 = vrot.lane.b32.xlu1 %v1763_v5, %s3088_s20  ;;  %1800 = vrot.lane.b32.xlu0 %v1764_v47, %s3088_s20  ;;  %v4353_v18 = vmul.f32 %v4206_v1, %v1526_v38 }
 0x28f   : > { %v4356_v21 = vmul.f32 %v4221_v25, %v1527_v51  ;;  %v1464_v55 = vsub.f32 %v4195_v7, %v1409_v14  ;;  %v1465_v7 = vsub.f32 %v4193_v37, %v1411_v57 }
 0x290   : > { %v1529_v24 = vmax.f32 %v1513_v0, 0.0  ;;  %v1528_v60 = vmax.f32 %v1512_v36, 0.0 }
 0x291   : > { %v1415_v12 = vpop.xlane.xlu1 %1414  ;;  %v1413_v49 = vpop.xlane.xlu0 %1412  ;;  %v1768_v56 = vmul.f32 %v4238_v27, %v1464_v55  ;;  %v1769_v14 = vmul.f32 %v4247_v10, %v1465_v7 }
 0x292   : > { %v1515_v35 = vsub.f32 %v1415_v12, %v4212_v20  ;;  %v1514_v28 = vsub.f32 %v1413_v49, %v4215_v43  ;;  %1802 = vrot.lane.b32.xlu1 %v1765_v41, %s3088_s20  ;;  %1804 = vrot.lane.b32.xlu0 %v1766_v15, %s3088_s20  ;;  %v4367_v52 = vmul.f32 %v4238_v27, %v1528_v60  ;;  %v1570_v60 = vmul.f32 20.0, %v4056_v40  ;;  %v5064_v41 = vld [vmem:[#allocation95_spill] sm:$0xff] }
 0x293   : > { %v4370_v61 = vmul.f32 %v4247_v10, %v1529_v24  ;;  %v1466_v20 = vsub.f32 %v4226_v62, %v1413_v49  ;;  %v1467_v62 = vsub.f32 %v4224_v30, %v1415_v12  ;;  %v1569_v24 = vmul.f32 20.0, %v4040_v2  ;;  %v5065_v12 = vld [vmem:[#allocation66_spill] sm:$0xff]  ;;  %v5066_v49 = vld [vmem:[#allocation53_spill] sm:$0xff] }
 0x294   : > { %v1531_v26 = vmax.f32 %v1515_v35, 0.0  ;;  %v1530_v3 = vmax.f32 %v1514_v28, 0.0  ;;  %v1473_v15 = vsub.f32 %v5066_v49, %v5065_v12  ;;  %v5068_v35 = vld [vmem:[#allocation94_spill] sm:$0xff] }
 0x295   : > { %v1419_v6 = vpop.xlane.xlu1 %1418  ;;  %v1417_v43 = vpop.xlane.xlu0 %1416  ;;  %v1770_v16 = vmul.f32 %v4263_v48, %v1466_v20  ;;  %v5069_v20 = vld [vmem:[#allocation68_spill] sm:$0xff] }
 0x296   : > { %v1517_v51 = vsub.f32 %v1419_v6, %v4241_v17  ;;  %v1516_v38 = vsub.f32 %v1417_v43, %v4244_v33  ;;  %1806 = vrot.lane.b32.xlu1 %v1767_v58, %s3088_s20  ;;  %1808 = vrot.lane.b32.xlu0 %v1768_v56, %s3088_s20  ;;  %v4381_v37 = vmul.f32 %v4263_v48, %v1530_v3  ;;  %v1568_v17 = vmul.f32 20.0, %v4047_v22 }
 0x297   : > { %v4384_v5 = vmul.f32 %v4275_v11, %v1531_v26  ;;  %v1472_v33 = vsub.f32 %v3989_v13, %v4021_v32  ;;  %v1468_v47 = vsub.f32 %v4255_v54, %v1417_v43  ;;  %v5067_v13 = vld [vmem:[#allocation98_spill] sm:$0xff]  ;;  %v1469_v28 = vsub.f32 %v5068_v35, %v1419_v6  ;;  %v5070_v43 = vld [vmem:[#allocation51_spill] sm:$0xff] }
 0x298   : > { %v1533_v63 = vmax.f32 %v1517_v51, 0.0  ;;  %v1532_v57 = vmax.f32 %v1516_v38, 0.0  ;;  %v3089_v3 = vmov 4   ;;  %v1474_v56 = vsub.f32 %v5070_v43, %v5069_v20  ;;  %v5071_v51 = vld [vmem:[#allocation97_spill] sm:$0xff]  ;;  %v5079_v35 = vld [vmem:[#allocation70_spill] sm:$0xff]  ;;  %v5081_v20 = vld [vmem:[#allocation83_spill] sm:$0xff] }
 0x299   : > { %v1423_v0 = vpop.xlane.xlu1 %1422  ;;  %v1421_v36 = vpop.xlane.xlu0 %1420  ;;  %2887 = vset.pattern.permute.xlu0 %v3089_v3  ;;  %2888 = vset.pattern.permute.xlu1 %v3089_v3  ;;  %v1584_v58 = vsub.f32 %v1568_v17, %v1472_v33  ;;  %v1585_v17 = vsub.f32 %v1569_v24, %v1473_v15  ;;  %v5076_v33 = vld [vmem:[#allocation67_spill] sm:$0xff]  ;;  %v1773_v12 = vmul.f32 %v4296_v19, %v1469_v28  ;;  %v1573_v43 = vmul.f32 20.0, %v5081_v20 }
 0x29a   : > { %v1519_v30 = vsub.f32 %v1423_v0, %v4266_v45  ;;  %v1518_v55 = vsub.f32 %v1421_v36, %v5064_v41  ;;  %1810 = vrot.lane.b32.xlu1 %v1769_v14, %s3088_s20  ;;  %1812 = vrot.lane.b32.xlu0 %v1770_v16, %s3088_s20  ;;  %v4402_v32 = vmul.f32 %v5067_v13, %v1532_v57  ;;  %v5075_v16 = vld [vmem:[#allocation82_spill] sm:$0xff]  ;;  %v5077_v41 = vld [vmem:[#allocation52_spill] sm:$0xff] }
 0x29b   : > { %v4405_v54 = vmul.f32 %v4296_v19, %v1533_v63  ;;  %v1771_v45 = vmul.f32 %v4275_v11, %v1467_v62  ;;  %v1470_v38 = vsub.f32 %v5071_v51, %v1421_v36  ;;  %v1772_v57 = vmul.f32 %v5067_v13, %v1468_v47  ;;  %v5074_v62 = vld [vmem:[#allocation79_spill] sm:$0xff]  ;;  %v5082_v51 = vld [vmem:[#allocation84_spill] sm:$0xff] }
 0x29c   : > { %v1535_v7 = vmax.f32 %v1519_v30, 0.0  ;;  %v1534_v26 = vmax.f32 %v1518_v55, 0.0  ;;  %v1571_v14 = vmul.f32 20.0, %v5074_v62  ;;  %v1572_v30 = vmul.f32 20.0, %v5075_v16  ;;  %v5078_v55 = vld [vmem:[#allocation96_spill] sm:$0xff] }
 0x29d   : > { %v1475_v36 = vsub.f32 %v5077_v41, %v5076_v33  ;;  %v1471_v47 = vsub.f32 %v5078_v55, %v1423_v0  ;;  %v1586_v49 = vsub.f32 %v1570_v60, %v1474_v56  ;;  %v1600_v3 = vmax.f32 %v1584_v58, 0.0  ;;  %v5083_v0 = vld [vmem:[#allocation69_spill] sm:$0xff]  ;;  %v5084_v33 = vld [vmem:[#allocation54_spill] sm:$0xff]  ;;  %v5085_v41 = vld [vmem:[#allocation72_spill] sm:$0xff] }
 0x29e   : > { %1814 = vrot.lane.b32.xlu1 %v1771_v45, %s3088_s20  ;;  %v4415_v63 = vmul.f32 %v4299_v9, %v1534_v26  ;;  %v4418_v6 = vmul.f32 %v4307_v31, %v1535_v7  ;;  %1816 = vrot.lane.b32.xlu0 %v1772_v57, %s3088_s20  ;;  %v5080_v26 = vld [vmem:[#allocation55_spill] sm:$0xff]  ;;  %v1774_v7 = vmul.f32 %v4299_v9, %v1470_v38  ;;  %v1574_v24 = vmul.f32 20.0, %v5082_v51  ;;  %v5086_v55 = vld [vmem:[#allocation57_spill] sm:$0xff] }
 0x29f   : > { %v1476_v45 = vsub.f32 %v5080_v26, %v5079_v35  ;;  %v1601_v15 = vmax.f32 %v1585_v17, 0.0  ;;  %v1587_v57 = vsub.f32 %v1571_v14, %v1475_v36  ;;  %v1477_v28 = vsub.f32 %v5084_v33, %v5083_v0  ;;  %v5087_v35 = vld [vmem:[#allocation85_spill] sm:$0xff]  ;;  %v5089_v36 = vld [vmem:[#allocation71_spill] sm:$0xff] }
 0x2a0   : > { %5072 = vst [vmem:[#allocation95_spill] sm:$0xff] %v4415_v63  ;;  %5073 = vst [vmem:[#allocation66_spill] sm:$0xff] %v4418_v6  ;;  %v1775_v60 = vmul.f32 %v4307_v31, %v1471_v47  ;;  %v1478_v38 = vsub.f32 %v5086_v55, %v5085_v41  ;;  %v1856_v58 = vmul.f32 %v4117_v8, %v1600_v3  ;;  %v1575_v26 = vmul.f32 20.0, %v5087_v35  ;;  %v5088_v6 = vld [vmem:[#allocation86_spill] sm:$0xff]  ;;  %v5090_v47 = vld [vmem:[#allocation56_spill] sm:$0xff] }
 0x2a1   : > { %v1588_v56 = vsub.f32 %v1572_v30, %v1476_v45  ;;  %v1603_v14 = vmax.f32 %v1587_v57, 0.0  ;;  %v1589_v17 = vsub.f32 %v1573_v43, %v1477_v28  ;;  %v1479_v30 = vsub.f32 %v5090_v47, %v5089_v36  ;;  %v5091_v8 = vld [vmem:[#allocation74_spill] sm:$0xff]  ;;  %v5093_v41 = vld [vmem:[#allocation87_spill] sm:$0xff]  ;;  %v5094_v63 = vld [vmem:[#allocation88_spill] sm:$0xff] }
 0x2a2   : > { %1818 = vrot.lane.b32.xlu1 %v1773_v12, %s3088_s20  ;;  %1820 = vrot.lane.b32.xlu0 %v1774_v7, %s3088_s20  ;;  %v1602_v12 = vmax.f32 %v1586_v49, 0.0  ;;  %v1576_v7 = vmul.f32 20.0, %v5088_v6  ;;  %v1857_v45 = vmul.f32 %v4108_v59, %v1601_v15  ;;  %v1590_v33 = vsub.f32 %v1574_v24, %v1478_v38  ;;  %v5092_v49 = vld [vmem:[#allocation59_spill] sm:$0xff]  ;;  %v5095_v28 = vld [vmem:[#allocation73_spill] sm:$0xff]  ;;  %v5096_v36 = vld [vmem:[#allocation58_spill] sm:$0xff] }
 0x2a3   : > { %v1604_v0 = vmax.f32 %v1588_v56, 0.0  ;;  %v1480_v3 = vsub.f32 %v5092_v49, %v5091_v8  ;;  %v1577_v55 = vmul.f32 20.0, %v5093_v41  ;;  %v1605_v43 = vmax.f32 %v1589_v17, 0.0  ;;  %v5097_v38 = vld [vmem:[#allocation76_spill] sm:$0xff]  ;;  %v5098_v47 = vld [vmem:[#allocation61_spill] sm:$0xff]  ;;  %v5100_v49 = vld [vmem:[#allocation90_spill] sm:$0xff] }
 0x2a4   : > { %v1591_v57 = vsub.f32 %v1575_v26, %v1479_v30  ;;  %v1481_v59 = vsub.f32 %v5096_v36, %v5095_v28  ;;  %v1859_v24 = vmul.f32 %v4162_v53, %v1603_v14  ;;  %v1606_v15 = vmax.f32 %v1590_v33, 0.0  ;;  %v5101_v30 = vld [vmem:[#allocation75_spill] sm:$0xff]  ;;  %v5102_v28 = vld [vmem:[#allocation60_spill] sm:$0xff] }
 0x2a5   : > { %v1592_v56 = vsub.f32 %v1576_v7, %v1480_v3  ;;  %v1483_v53 = vsub.f32 %v5102_v28, %v5101_v30  ;;  %v1861_v7 = vmul.f32 %v4190_v4, %v1605_v43  ;;  %v5103_v3 = vld [vmem:[#allocation78_spill] sm:$0xff]  ;;  %v5104_v36 = vld [vmem:[#allocation63_spill] sm:$0xff]  ;;  %2929 = vlog2.f32 %v5074_v62 }
 0x2a6   : > { %1822 = vrot.lane.b32.xlu1 %v1775_v60, %s3088_s20  ;;  %1888 = vrot.lane.b32.xlu0 %v1856_v58, %s3090_s21  ;;  %v1858_v60 = vmul.f32 %v4148_v23, %v1602_v12  ;;  %v1578_v58 = vmul.f32 20.0, %v5094_v63  ;;  %v1482_v23 = vsub.f32 %v5098_v47, %v5097_v38  ;;  %v1860_v12 = vmul.f32 %v4177_v39, %v1604_v0 }
 0x2a7   : > { %v1607_v26 = vmax.f32 %v1591_v57, 0.0  ;;  %v1593_v17 = vsub.f32 %v1577_v55, %v1481_v59  ;;  %v1608_v14 = vmax.f32 %v1592_v56, 0.0  ;;  %v1484_v39 = vsub.f32 %v5104_v36, %v5103_v3  ;;  %v5106_v57 = vld [vmem:[#allocation92_spill] sm:$0xff]  ;;  %v5108_v59 = vld [vmem:[#allocation62_spill] sm:$0xff] }
 0x2a8   : > { %v1594_v33 = vsub.f32 %v1578_v58, %v1482_v23  ;;  %v1862_v0 = vmul.f32 %v4206_v1, %v1606_v15  ;;  %v1582_v55 = vmul.f32 20.0, %v5106_v57  ;;  %v5107_v58 = vld [vmem:[#allocation77_spill] sm:$0xff]  ;;  %v5113_v36 = vld [vmem:[#allocation64_spill] sm:$0xff]  ;;  %2931 = vlog2.f32 %v5075_v16 }
 0x2a9   : > { %v1609_v4 = vmax.f32 %v1593_v17, 0.0  ;;  %v1485_v56 = vsub.f32 %v5108_v59, %v5107_v58  ;;  %v1863_v47 = vmul.f32 %v4221_v25, %v1607_v26  ;;  %v5109_v23 = vld [vmem:[#allocation81_spill] sm:$0xff]  ;;  %v1864_v28 = vmul.f32 %v4238_v27, %v1608_v14  ;;  %v2924_v27 = vpop.eup %2923 }
 0x2aa   : > { %1890 = vrot.lane.b32.xlu1 %v1857_v45, %s3090_s21  ;;  %1892 = vrot.lane.b32.xlu0 %v1858_v60, %s3090_s21  ;;  %v5099_v45 = vld [vmem:[#allocation89_spill] sm:$0xff]  ;;  %v1580_v60 = vmul.f32 20.0, %v5100_v49  ;;  %v1610_v1 = vmax.f32 %v1594_v33, 0.0  ;;  %2933 = vlog2.f32 %v5081_v20 }
 0x2ab   : > { %v1579_v8 = vmul.f32 20.0, %v5099_v45  ;;  %2935 = vlog2.f32 %v5082_v51 }
 0x2ac   : > { %v1596_v15 = vsub.f32 %v1580_v60, %v1484_v39  ;;  %v1865_v60 = vmul.f32 %v4247_v10, %v1609_v4  ;;  %v1866_v39 = vmul.f32 %v4263_v48, %v1610_v1  ;;  %v1953_v48 = vmul.f32 0.6931472, %v2924_v27 }
 0x2ad   : > { %v1595_v43 = vsub.f32 %v1579_v8, %v1483_v53  ;;  %v5112_v53 = vld [vmem:[#allocation80_spill] sm:$0xff]  ;;  %2937 = vlog2.f32 %v5087_v35 }
 0x2ae   : > { %1894 = vrot.lane.b32.xlu1 %v1859_v24, %s3090_s21  ;;  %1896 = vrot.lane.b32.xlu0 %v1860_v12, %s3090_s21  ;;  %v5105_v24 = vld [vmem:[#allocation91_spill] sm:$0xff]  ;;  %v5110_v12 = vld [vmem:[#allocation65_spill] sm:$0xff]  ;;  %v1487_v25 = vsub.f32 %v5113_v36, %v5112_v53  ;;  %v1612_v26 = vmax.f32 %v1596_v15, 0.0  ;;  %2939 = vlog2.f32 %v5088_v6 }
 0x2af   : > { %v1581_v38 = vmul.f32 20.0, %v5105_v24  ;;  %v1486_v30 = vsub.f32 %v5110_v12, %v5109_v23  ;;  %v1611_v8 = vmax.f32 %v1595_v43, 0.0  ;;  %v2926_v43 = vpop.eup %2925  ;;  %2941 = vlog2.f32 %v5093_v41 }
 0x2b0   : > { %v1868_v10 = vmul.f32 %v5067_v13, %v1612_v26  ;;  %2943 = vlog2.f32 %v5094_v63 }
 0x2b1   : > { %v1597_v17 = vsub.f32 %v1581_v38, %v1485_v56  ;;  %v1598_v33 = vsub.f32 %v1582_v55, %v1486_v30  ;;  %v1867_v38 = vmul.f32 %v4275_v11, %v1611_v8  ;;  %v2928_v55 = vpop.eup %2927  ;;  %v1955_v11 = vmul.f32 0.6931472, %v2926_v43 }
 0x2b2   : > { %1898 = vrot.lane.b32.xlu1 %v1861_v7, %s3090_s21  ;;  %1900 = vrot.lane.b32.xlu0 %v1862_v0, %s3090_s21  ;;  %v5111_v7 = vld [vmem:[#allocation93_spill] sm:$0xff]  ;;  %v2930_v13 = vpop.eup %2929  ;;  %v1957_v1 = vmul.f32 0.6931472, %v2928_v55  ;;  %2945 = vlog2.f32 %v5099_v45 }
 0x2b3   : > { %v1583_v3 = vmul.f32 20.0, %v5111_v7  ;;  %v1613_v14 = vmax.f32 %v1597_v17, 0.0  ;;  %v1614_v58 = vmax.f32 %v1598_v33, 0.0  ;;  %v2932_v15 = vpop.eup %2931  ;;  %2947 = vlog2.f32 %v5100_v49 }
 0x2b4   : > { %v2934_v12 = vpop.eup %2933  ;;  %v1986_v30 = vmax.f32 %v1957_v1, -100.0  ;;  %2949 = vlog2.f32 %v5105_v24  ;;  %v2000_v33 = vsub.f32 1.0, %v4047_v22 }
 0x2b5   : > { %v1599_v0 = vsub.f32 %v1583_v3, %v1487_v25  ;;  %v1869_v59 = vmul.f32 %v4296_v19, %v1613_v14  ;;  %v1870_v56 = vmul.f32 %v4299_v9, %v1614_v58  ;;  %v1985_v19 = vmax.f32 %v1955_v11, -100.0  ;;  %v2936_v3 = vpop.eup %2935 }
 0x2b6   : > { %1902 = vrot.lane.b32.xlu1 %v1863_v47, %s3090_s21  ;;  %1904 = vrot.lane.b32.xlu0 %v1864_v28, %s3090_s21  ;;  %v1984_v47 = vmax.f32 %v1953_v48, -100.0  ;;  %v1959_v9 = vmul.f32 0.6931472, %v2930_v13  ;;  %v1961_v28 = vmul.f32 0.6931472, %v2932_v15  ;;  %2951 = vlog2.f32 %v5106_v57 }
 0x2b7   : > { %v1615_v4 = vmax.f32 %v1599_v0, 0.0  ;;  %v2938_v17 = vpop.eup %2937  ;;  %v1965_v36 = vmul.f32 0.6931472, %v2936_v3  ;;  %2953 = vlog2.f32 %v5111_v7  ;;  %v2004_v11 = vsub.f32 1.0, %v5075_v16 }
 0x2b8   : > { %v1987_v8 = vmax.f32 %v1959_v9, -100.0  ;;  %v1988_v53 = vmax.f32 %v1961_v28, -100.0  ;;  %v2940_v25 = vpop.eup %2939  ;;  %v1967_v26 = vmul.f32 0.6931472, %v2938_v17  ;;  %2955 = vlog2.f32 %v2000_v33 }
 0x2b9   : > { %v1871_v23 = vmul.f32 %v4307_v31, %v1615_v4  ;;  %v1963_v31 = vmul.f32 0.6931472, %v2934_v12  ;;  %v1990_v27 = vmax.f32 %v1965_v36, -100.0  ;;  %v1969_v14 = vmul.f32 0.6931472, %v2940_v25 }
 0x2ba   : > { %1906 = vrot.lane.b32.xlu1 %v1865_v60, %s3090_s21  ;;  %1908 = vrot.lane.b32.xlu0 %v1866_v39, %s3090_s21  ;;  %v2942_v39 = vpop.eup %2941  ;;  %v1991_v43 = vmax.f32 %v1967_v26, -100.0  ;;  %v2006_v9 = vsub.f32 1.0, %v5082_v51  ;;  %v2008_v51 = vsub.f32 1.0, %v5088_v6  ;;  %v2010_v6 = vsub.f32 1.0, %v5094_v63 }
 0x2bb   : > { %v1989_v60 = vmax.f32 %v1963_v31, -100.0  ;;  %v2944_v0 = vpop.eup %2943  ;;  %v1971_v58 = vmul.f32 0.6931472, %v2942_v39  ;;  %v1992_v22 = vmax.f32 %v1969_v14, -100.0  ;;  %v2012_v63 = vsub.f32 1.0, %v5100_v49 }
 0x2bc   : > { %v2946_v48 = vpop.eup %2945  ;;  %v1973_v55 = vmul.f32 0.6931472, %v2944_v0  ;;  %v2014_v49 = vsub.f32 1.0, %v5106_v57 }
 0x2bd   : > { %v2948_v4 = vpop.eup %2947 }
 0x2be   : > { %1910 = vrot.lane.b32.xlu1 %v1867_v38, %s3090_s21  ;;  %1912 = vrot.lane.b32.xlu0 %v1868_v10, %s3090_s21  ;;  %v2001_v38 = vsub.f32 1.0, %v4040_v2  ;;  %v2002_v10 = vsub.f32 1.0, %v4056_v40  ;;  %v1975_v2 = vmul.f32 0.6931472, %v2946_v48  ;;  %v2950_v13 = vpop.eup %2949  ;;  %v1994_v40 = vmax.f32 %v1973_v55, -100.0 }
 0x2c0   : > { %2957 = vlog2.f32 %v2001_v38  ;;  %v2952_v1 = vpop.eup %2951 }
 0x2c1   : > { %2959 = vlog2.f32 %v2002_v10  ;;  %v2954_v12 = vpop.eup %2953 }
 0x2c2   : > { %1914 = vrot.lane.b32.xlu1 %v1869_v59, %s3090_s21  ;;  %1916 = vrot.lane.b32.xlu0 %v1870_v56, %s3090_s21  ;;  %v2003_v59 = vsub.f32 1.0, %v5074_v62  ;;  %v1993_v56 = vmax.f32 %v1971_v58, -100.0  ;;  %v1995_v62 = vmax.f32 %v1975_v2, -100.0  ;;  %v2956_v28 = vpop.eup %2955  ;;  %v1983_v17 = vmul.f32 0.6931472, %v2954_v12 }
 0x2c3   : > { %v2017_v25 = vmul.f32 0.6931472, %v2956_v28 }
 0x2c4   : > { %2961 = vlog2.f32 %v2003_v59  ;;  %v1999_v39 = vmax.f32 %v1983_v17, -100.0 }
 0x2c5   : > { %2963 = vlog2.f32 %v2004_v11  ;;  %v2048_v0 = vmax.f32 %v2017_v25, -100.0 }
 0x2c6   : > { %1918 = vrot.lane.b32.xlu1 %v1871_v23, %s3090_s21  ;;  %2080 = vrot.lane.b32.xlu0 %v1984_v47, %s3088_s20  ;;  %v1977_v47 = vmul.f32 0.6931472, %v2948_v4  ;;  %v2005_v23 = vsub.f32 1.0, %v5081_v20  ;;  %v2007_v20 = vsub.f32 1.0, %v5087_v35  ;;  %v2009_v35 = vsub.f32 1.0, %v5093_v41 }
 0x2c7   : > { %v2011_v41 = vsub.f32 1.0, %v5099_v45  ;;  %v2013_v45 = vsub.f32 1.0, %v5105_v24  ;;  %v2015_v24 = vsub.f32 1.0, %v5111_v7 }
 0x2c8   : > { %v1996_v16 = vmax.f32 %v1977_v47, -100.0  ;;  %2965 = vlog2.f32 %v2005_v23 }
 0x2c9   : > { %2967 = vlog2.f32 %v2006_v9 }
 0x2ca   : > { %2082 = vrot.lane.b32.xlu1 %v1985_v19, %s3088_s20  ;;  %2084 = vrot.lane.b32.xlu0 %v1986_v30, %s3088_s20  ;;  %v1979_v19 = vmul.f32 0.6931472, %v2950_v13  ;;  %v1981_v30 = vmul.f32 0.6931472, %v2952_v1  ;;  %2969 = vlog2.f32 %v2007_v20 }
 0x2cb   : > { %2971 = vlog2.f32 %v2008_v51 }
 0x2cc   : > { %v1997_v31 = vmax.f32 %v1979_v19, -100.0  ;;  %v1998_v36 = vmax.f32 %v1981_v30, -100.0  ;;  %2973 = vlog2.f32 %v2009_v35 }
 0x2cd   : > { %2975 = vlog2.f32 %v2010_v6 }
 0x2ce   : > { %2086 = vrot.lane.b32.xlu1 %v1987_v8, %s3088_s20  ;;  %2088 = vrot.lane.b32.xlu0 %v1988_v53, %s3088_s20  ;;  %v2958_v53 = vpop.eup %2957  ;;  %2977 = vlog2.f32 %v2011_v41 }
 0x2cf   : > { %2979 = vlog2.f32 %v2012_v63 }
 0x2d0   : > { %2981 = vlog2.f32 %v2013_v45 }
 0x2d1   : > { %2983 = vlog2.f32 %v2014_v49 }
 0x2d2   : > { %2090 = vrot.lane.b32.xlu1 %v1989_v60, %s3088_s20  ;;  %2092 = vrot.lane.b32.xlu0 %v1990_v27, %s3088_s20  ;;  %v2960_v60 = vpop.eup %2959  ;;  %v2019_v27 = vmul.f32 0.6931472, %v2958_v53  ;;  %2985 = vlog2.f32 %v2015_v24 }
 0x2d3   : > { %v2962_v14 = vpop.eup %2961  ;;  %v2021_v38 = vmul.f32 0.6931472, %v2960_v60 }
 0x2d4   : > { %v2049_v48 = vmax.f32 %v2019_v27, -100.0 }
 0x2d5   : > { %v2050_v4 = vmax.f32 %v2021_v38, -100.0 }
 0x2d6   : > { %2094 = vrot.lane.b32.xlu1 %v1991_v43, %s3088_s20  ;;  %2096 = vrot.lane.b32.xlu0 %v1992_v22, %s3088_s20  ;;  %v2964_v43 = vpop.eup %2963  ;;  %v2023_v22 = vmul.f32 0.6931472, %v2962_v14 }
 0x2d7   : > { %v2966_v55 = vpop.eup %2965  ;;  %v2025_v59 = vmul.f32 0.6931472, %v2964_v43 }
 0x2d8   : > { %v4529_v15 = vpop.permute.xlu1 %1698  ;;  %v4535_v3 = vpop.permute.xlu0 %1696  ;;  %v2051_v13 = vmax.f32 %v2023_v22, -100.0 }
 0x2d9   : > { %v2052_v1 = vmax.f32 %v2025_v59, -100.0 }
 0x2da   : > { %2098 = vrot.lane.b32.xlu1 %v1993_v56, %s3088_s20  ;;  %2100 = vrot.lane.b32.xlu0 %v1994_v40, %s3088_s20  ;;  %v2968_v56 = vpop.eup %2967  ;;  %v2027_v40 = vmul.f32 0.6931472, %v2966_v55 }
 0x2db   : > { %v2970_v47 = vpop.eup %2969  ;;  %v2029_v23 = vmul.f32 0.6931472, %v2968_v56 }
 0x2dc   : > { %v4537_v8 = vpop.permute.xlu1 %1700  ;;  %v2053_v12 = vmax.f32 %v2027_v40, -100.0 }
 0x2dd   : > { %v2054_v57 = vmax.f32 %v2029_v23, -100.0 }
 0x2de   : > { %2102 = vrot.lane.b32.xlu1 %v1995_v62, %s3088_s20  ;;  %2104 = vrot.lane.b32.xlu0 %v1996_v16, %s3088_s20  ;;  %v2972_v62 = vpop.eup %2971  ;;  %v2031_v16 = vmul.f32 0.6931472, %v2970_v47 }
 0x2df   : > { %v2974_v30 = vpop.eup %2973  ;;  %v2033_v28 = vmul.f32 0.6931472, %v2972_v62 }
 0x2e0   : > { %v4543_v26 = vpop.permute.xlu1 %1702  ;;  %v4545_v33 = vpop.permute.xlu0 %1704  ;;  %v2055_v51 = vmax.f32 %v2031_v16, -100.0  ;;  %v2035_v7 = vmul.f32 0.6931472, %v2974_v30 }
 0x2e1   : > { %v2976_v20 = vpop.eup %2975 }
 0x2e2   : > { %2106 = vrot.lane.b32.xlu1 %v1997_v31, %s3088_s20  ;;  %2108 = vrot.lane.b32.xlu0 %v1998_v36, %s3088_s20  ;;  %v2978_v53 = vpop.eup %2977  ;;  %v2056_v36 = vmax.f32 %v2033_v28, -100.0  ;;  %v2037_v25 = vmul.f32 0.6931472, %v2976_v20  ;;  %v2057_v27 = vmax.f32 %v2035_v7, -100.0 }
 0x2e3   : > { %v2980_v60 = vpop.eup %2979  ;;  %v2039_v6 = vmul.f32 0.6931472, %v2978_v53  ;;  %v1744_v53 = vadd.f32 %v4535_v3, %v4314_v44 }
 0x2e4   : > { %v4551_v58 = vpop.permute.xlu1 %1706  ;;  %v4553_v10 = vpop.permute.xlu0 %1708  ;;  %v2041_v38 = vmul.f32 0.6931472, %v2980_v60  ;;  %v1745_v60 = vadd.f32 %v4529_v15, %v4311_v42  ;;  %v1748_v42 = vadd.f32 %v4545_v33, %v4339_v46 }
 0x2e5   : > { %v2982_v14 = vpop.eup %2981  ;;  %v2059_v22 = vmax.f32 %v2039_v6, -100.0  ;;  %v1749_v15 = vadd.f32 %v4551_v58, %v4342_v29 }
 0x2e6   : > { %2110 = vrot.lane.b32.xlu1 %v1999_v39, %s3088_s20  ;;  %2176 = vrot.lane.b32.xlu0 %v2048_v0, %s3088_s20  ;;  %v2058_v0 = vmax.f32 %v2037_v25, -100.0  ;;  %v2984_v43 = vpop.eup %2983  ;;  %v2043_v63 = vmul.f32 0.6931472, %v2982_v14 }
 0x2e7   : > { %v2986_v55 = vpop.eup %2985  ;;  %v2045_v59 = vmul.f32 0.6931472, %v2984_v43  ;;  %v1747_v43 = vadd.f32 %v4543_v26, %v4328_v34 }
 0x2e8   : > { %v4559_v2 = vpop.permute.xlu1 %1710  ;;  %v4561_v11 = vpop.permute.xlu0 %1712  ;;  %v2047_v40 = vmul.f32 0.6931472, %v2986_v55 }
 0x2e9   : > { %v2062_v49 = vmax.f32 %v2045_v59, -100.0  ;;  %v1751_v26 = vadd.f32 %v4559_v2, %v4356_v21  ;;  %v1752_v58 = vadd.f32 %v4561_v11, %v4367_v52 }
 0x2ea   : > { %2178 = vrot.lane.b32.xlu1 %v2049_v48, %s3088_s20  ;;  %2180 = vrot.lane.b32.xlu0 %v2050_v4, %s3088_s20  ;;  %v2060_v4 = vmax.f32 %v2041_v38, -100.0  ;;  %v2063_v23 = vmax.f32 %v2047_v40, -100.0  ;;  %v1746_v38 = vadd.f32 %v4537_v8, %v4325_v50  ;;  %v1750_v8 = vadd.f32 %v4553_v10, %v4353_v18 }
 0x2ec   : > { %v4567_v19 = vpop.permute.xlu1 %1714  ;;  %v4569_v9 = vpop.permute.xlu0 %1716 }
 0x2ed   : > { %v1754_v2 = vadd.f32 %v4569_v9, %v4381_v37 }
 0x2ee   : > { %2182 = vrot.lane.b32.xlu1 %v2051_v13, %s3088_s20  ;;  %2184 = vrot.lane.b32.xlu0 %v2052_v1, %s3088_s20  ;;  %v2061_v13 = vmax.f32 %v2043_v63, -100.0 }
 0x2f0   : > { %v4574_v31 = vpop.permute.xlu1 %1718  ;;  %v4576_v17 = vpop.permute.xlu0 %1720 }
 0x2f2   : > { %2186 = vrot.lane.b32.xlu1 %v2053_v12, %s3088_s20  ;;  %2188 = vrot.lane.b32.xlu0 %v2054_v57, %s3088_s20 }
 0x2f4   : > { %v4580_v35 = vpop.permute.xlu1 %1722  ;;  %v4582_v39 = vpop.permute.xlu0 %1724 }
 0x2f6   : > { %2190 = vrot.lane.b32.xlu1 %v2055_v51, %s3088_s20  ;;  %2192 = vrot.lane.b32.xlu0 %v2056_v36, %s3088_s20 }
 0x2f8   : > { %v4586_v41 = vpop.permute.xlu1 %1726  ;;  %v1793_v48 = vpop.permute.xlu0 %1792 }
 0x2f9   : > { %v1840_v36 = vadd.f32 %v1793_v48, %v1744_v53 }
 0x2fa   : > { %2194 = vrot.lane.b32.xlu1 %v2057_v27, %s3088_s20  ;;  %2196 = vrot.lane.b32.xlu0 %v2058_v0, %s3088_s20 }
 0x2fc   : > { %v1795_v56 = vpop.permute.xlu1 %1794  ;;  %v1797_v45 = vpop.permute.xlu0 %1796 }
 0x2fd   : > { %v1841_v14 = vadd.f32 %v1795_v56, %v1745_v60  ;;  %v1842_v44 = vadd.f32 %v1797_v45, %v1746_v38  ;;  %v5115_v60 = vld [vmem:[#allocation66_spill] sm:$0xff] }
 0x2fe   : > { %2198 = vrot.lane.b32.xlu1 %v2059_v22, %s3088_s20  ;;  %2200 = vrot.lane.b32.xlu0 %v2060_v4, %s3088_s20 }
 0x300   : > { %v1799_v47 = vpop.permute.xlu1 %1798  ;;  %v1801_v1 = vpop.permute.xlu0 %1800 }
 0x301   : > { %v1843_v3 = vadd.f32 %v1799_v47, %v1747_v43  ;;  %v1844_v56 = vadd.f32 %v1801_v1, %v1748_v42  ;;  %v3091_v43 = vmov 0  }
 0x302   : > { %2202 = vrot.lane.b32.xlu1 %v2061_v13, %s3088_s20  ;;  %2204 = vrot.lane.b32.xlu0 %v2062_v49, %s3088_s20  ;;  %v1753_v49 = vadd.f32 %v4567_v19, %v4370_v61  ;;  %v1756_v19 = vadd.f32 %v4576_v17, %v4402_v32 }
 0x304   : > { %v1803_v62 = vpop.permute.xlu1 %1802  ;;  %v1805_v24 = vpop.permute.xlu0 %1804 }
 0x305   : > { %v1845_v50 = vadd.f32 %v1803_v62, %v1749_v15  ;;  %v1846_v33 = vadd.f32 %v1805_v24, %v1750_v8  ;;  %v1755_v62 = vadd.f32 %v4574_v31, %v4384_v5  ;;  %v5117_v8 = vld [vmem:[#allocation16_spill] sm:$0xff] }
 0x306   : > { %2206 = vrot.lane.b32.xlu1 %v2063_v23, %s3088_s20 }
 0x308   : > { %v1807_v12 = vpop.permute.xlu1 %1806  ;;  %v1809_v16 = vpop.permute.xlu0 %1808 }
 0x309   : > { %v1847_v40 = vadd.f32 %v1807_v12, %v1751_v26  ;;  %v1848_v10 = vadd.f32 %v1809_v16, %v1752_v58  ;;  %v1757_v16 = vadd.f32 %v4580_v35, %v4405_v54  ;;  %v2145_v26 = vsub.f32 1.0, %v5117_v8 }
 0x30c   : > { %v1811_v30 = vpop.permute.xlu1 %1810  ;;  %v1813_v57 = vpop.permute.xlu0 %1812 }
 0x30d   : > { %v1849_v23 = vadd.f32 %v1811_v30, %v1753_v49  ;;  %v1850_v11 = vadd.f32 %v1813_v57, %v1754_v2  ;;  %v5114_v57 = vld [vmem:[#allocation95_spill] sm:$0xff]  ;;  %v5120_v2 = vld [vmem:[#allocation18_spill] sm:$0xff] }
 0x310   : > { %v1815_v28 = vpop.permute.xlu1 %1814  ;;  %v4595_v20 = vpop.permute.xlu0 %1816 }
 0x311   : > { %v1851_v53 = vadd.f32 %v1815_v28, %v1755_v62  ;;  %v1852_v9 = vadd.f32 %v4595_v20, %v1756_v19  ;;  %v1758_v28 = vadd.f32 %v4582_v39, %v5114_v57  ;;  %v2148_v62 = vsub.f32 1.0, %v5120_v2 }
 0x314   : > { %v4597_v51 = vpop.permute.xlu1 %1818  ;;  %v4599_v7 = vpop.permute.xlu0 %1820 }
 0x315   : > { %v1853_v5 = vadd.f32 %v4597_v51, %v1757_v16  ;;  %v1854_v54 = vadd.f32 %v4599_v7, %v1758_v28  ;;  %v5121_v16 = vld [vmem:[#allocation17_spill] sm:$0xff] }
 0x318   : > { %v4603_v25 = vpop.permute.xlu1 %1822  ;;  %v1889_v27 = vpop.permute.xlu0 %1888 }
 0x319   : > { %v1936_v6 = vadd.f32 %v1889_v27, %v1840_v36  ;;  %v1759_v27 = vadd.f32 %v4586_v41, %v5115_v60 }
 0x31b   : > { %2277 = vperm.xlu0 %2887, %v1936_v6   ;;  %v1855_v35 = vadd.f32 %v4603_v25, %v1759_v27 }
 0x31c   : > { %v1891_v0 = vpop.permute.xlu1 %1890  ;;  %v1893_v63 = vpop.permute.xlu0 %1892 }
 0x31d   : > { %v1937_v22 = vadd.f32 %v1891_v0, %v1841_v14  ;;  %v1938_v55 = vadd.f32 %v1893_v63, %v1842_v44 }
 0x31f   : > { %2282 = vperm.xlu1 %2888, %v1937_v22  }
 0x320   : > { %v1895_v48 = vpop.permute.xlu1 %1894  ;;  %v1897_v59 = vpop.permute.xlu0 %1896 }
 0x321   : > { %v1939_v4 = vadd.f32 %v1895_v48, %v1843_v3  ;;  %v1940_v45 = vadd.f32 %v1897_v59, %v1844_v56  ;;  %v5116_v59 = vld [vmem:[#allocation14_spill] sm:$0xff] }
 0x322   : > { %v2144_v56 = vsub.f32 1.0, %v5116_v59 }
 0x323   : > { %2292 = vperm.xlu0 %2887, %v1939_v4   ;;  %2287 = vperm.xlu1 %2888, %v1938_v55  }
 0x324   : > { %v1899_v34 = vpop.permute.xlu1 %1898  ;;  %v1901_v46 = vpop.permute.xlu0 %1900 }
 0x325   : > { %v1941_v13 = vadd.f32 %v1899_v34, %v1845_v50  ;;  %v1942_v47 = vadd.f32 %v1901_v46, %v1846_v33  ;;  %v5118_v46 = vld [vmem:[#allocation13_spill] sm:$0xff] }
 0x326   : > { %v2146_v33 = vsub.f32 1.0, %v5118_v46 }
 0x327   : > { %2302 = vperm.xlu0 %2887, %v1941_v13   ;;  %2297 = vperm.xlu1 %2888, %v1940_v45  }
 0x328   : > { %v1903_v29 = vpop.permute.xlu1 %1902  ;;  %v1905_v18 = vpop.permute.xlu0 %1904 }
 0x329   : > { %v1943_v1 = vadd.f32 %v1903_v29, %v1847_v40  ;;  %v1944_v24 = vadd.f32 %v1905_v18, %v1848_v10 }
 0x32b   : > { %2312 = vperm.xlu0 %2887, %v1943_v1   ;;  %2307 = vperm.xlu1 %2888, %v1942_v47   ;;  %v5119_v1 = vld [vmem:[#allocation15_spill] sm:$0xff] }
 0x32c   : > { %v1907_v21 = vpop.permute.xlu1 %1906  ;;  %v1909_v52 = vpop.permute.xlu0 %1908  ;;  %v2147_v18 = vsub.f32 1.0, %v5119_v1 }
 0x32d   : > { %v1945_v12 = vadd.f32 %v1907_v21, %v1849_v23  ;;  %v1946_v30 = vadd.f32 %v1909_v52, %v1850_v11 }
 0x32f   : > { %2322 = vperm.xlu0 %2887, %v1945_v12   ;;  %2317 = vperm.xlu1 %2888, %v1944_v24  }
 0x330   : > { %v1911_v61 = vpop.permute.xlu1 %1910  ;;  %v1913_v37 = vpop.permute.xlu0 %1912 }
 0x331   : > { %v1947_v36 = vadd.f32 %v1911_v61, %v1851_v53  ;;  %v1948_v32 = vadd.f32 %v1913_v37, %v1852_v9 }
 0x333   : > { %2332 = vperm.xlu0 %2887, %v1947_v36   ;;  %2327 = vperm.xlu1 %2888, %v1946_v30   ;;  %v2149_v30 = vsub.f32 1.0, %v5121_v16 }
 0x334   : > { %v1915_v31 = vpop.permute.xlu1 %1914  ;;  %v1917_v6 = vpop.permute.xlu0 %1916 }
 0x335   : > { %v1949_v17 = vadd.f32 %v1915_v31, %v1853_v5  ;;  %v1950_v51 = vadd.f32 %v1917_v6, %v1854_v54  ;;  %v5122_v5 = vld [vmem:[#allocation20_spill] sm:$0xff]  ;;  %v5123_v54 = vld [vmem:[#allocation19_spill] sm:$0xff] }
 0x336   : > { %v2150_v31 = vsub.f32 1.0, %v5122_v5 }
 0x337   : > { %2342 = vperm.xlu0 %2887, %v1949_v17   ;;  %2337 = vperm.xlu1 %2888, %v1948_v32  }
 0x338   : > { %v1919_v20 = vpop.permute.xlu1 %1918  ;;  %v2081_v0 = vpop.permute.xlu0 %2080 }
 0x339   : > { %v1951_v14 = vadd.f32 %v1919_v20, %v1855_v35  ;;  %v2128_v45 = vmul.f32 %v2081_v0, %v5116_v59  ;;  %v2151_v35 = vsub.f32 1.0, %v5123_v54  ;;  %v5124_v0 = vld [vmem:[#allocation22_spill] sm:$0xff] }
 0x33b   : > { %2352 = vperm.xlu0 %2887, %v1951_v14   ;;  %2347 = vperm.xlu1 %2888, %v1950_v51  }
 0x33c   : > { %v2083_v38 = vpop.permute.xlu1 %2082  ;;  %v2085_v39 = vpop.permute.xlu0 %2084 }
 0x33d   : > { %v2129_v58 = vmul.f32 %v2083_v38, %v5117_v8  ;;  %v2130_v10 = vmul.f32 %v2085_v39, %v5118_v46  ;;  %v2152_v38 = vsub.f32 1.0, %v5124_v0 }
 0x33f   : > { %2889 = vset.pattern.permute.xlu1 %v3091_v43  ;;  %2890 = vset.pattern.permute.xlu0 %v3091_v43 }
 0x340   : > { %v2087_v41 = vpop.permute.xlu1 %2086  ;;  %v2089_v22 = vpop.permute.xlu0 %2088 }
 0x341   : > { %v2131_v11 = vmul.f32 %v2087_v41, %v5119_v1  ;;  %v2132_v36 = vmul.f32 %v2089_v22, %v5120_v2  ;;  %v5127_v1 = vld [vmem:[#allocation23_spill] sm:$0xff] }
 0x344   : > { %v2091_v63 = vpop.permute.xlu1 %2090  ;;  %v2093_v44 = vpop.permute.xlu0 %2092 }
 0x345   : > { %v2133_v27 = vmul.f32 %v2091_v63, %v5121_v16  ;;  %v2134_v20 = vmul.f32 %v2093_v44, %v5122_v5 }
 0x348   : > { %v2095_v7 = vpop.permute.xlu1 %2094  ;;  %v2097_v3 = vpop.permute.xlu0 %2096 }
 0x349   : > { %v2135_v22 = vmul.f32 %v2095_v7, %v5123_v54 }
 0x34c   : > { %v4639_v25 = vpop.permute.xlu1 %2098  ;;  %v4641_v48 = vpop.permute.xlu0 %2100 }
 0x350   : > { %v4643_v42 = vpop.permute.xlu1 %2102  ;;  %v4645_v15 = vpop.permute.xlu0 %2104 }
 0x354   : > { %v4647_v55 = vpop.permute.xlu1 %2106  ;;  %v4649_v4 = vpop.permute.xlu0 %2108 }
 0x358   : > { %v4652_v50 = vpop.permute.xlu1 %2110  ;;  %v2177_v34 = vpop.permute.xlu0 %2176 }
 0x359   : > { %v2224_v13 = vmul.f32 %v2177_v34, %v2144_v56  ;;  %v5125_v34 = vld [vmem:[#allocation21_spill] sm:$0xff] }
 0x35a   : > { %v2153_v8 = vsub.f32 1.0, %v5125_v34 }
 0x35b   : > { %v2240_v40 = vadd.f32 %v2224_v13, %v2128_v45  ;;  %v5126_v13 = vld [vmem:[#allocation24_spill] sm:$0xff] }
 0x35c   : > { %v2179_v29 = vpop.permute.xlu1 %2178  ;;  %v2181_v47 = vpop.permute.xlu0 %2180  ;;  %v2154_v46 = vsub.f32 1.0, %v5126_v13 }
 0x35d   : > { %v2225_v49 = vmul.f32 %v2179_v29, %v2145_v26  ;;  %v2256_v23 = vsub.f32 0.0, %v2240_v40  ;;  %v2226_v21 = vmul.f32 %v2181_v47, %v2146_v33  ;;  %v2136_v26 = vmul.f32 %v2097_v3, %v5124_v0 }
 0x35e   : > { %v2138_v3 = vmul.f32 %v4641_v48, %v5126_v13 }
 0x35f   : > { %v2241_v24 = vadd.f32 %v2225_v49, %v2129_v58  ;;  %v2242_v12 = vadd.f32 %v2226_v21, %v2130_v10  ;;  %2357 = vperm.xlu1 %2889, %v2256_v23   ;;  %v2137_v58 = vmul.f32 %v4639_v25, %v5125_v34  ;;  %v5128_v21 = vld [vmem:[#allocation26_spill] sm:$0xff]  ;;  %v2139_v25 = vmul.f32 %v4643_v42, %v5127_v1 }
 0x360   : > { %v2183_v52 = vpop.permute.xlu1 %2182  ;;  %v2185_v19 = vpop.permute.xlu0 %2184  ;;  %v2156_v2 = vsub.f32 1.0, %v5128_v21  ;;  %v2140_v48 = vmul.f32 %v4645_v15, %v5128_v21 }
 0x361   : > { %v2257_v53 = vsub.f32 0.0, %v2241_v24  ;;  %v2227_v61 = vmul.f32 %v2183_v52, %v2147_v18  ;;  %v2258_v37 = vsub.f32 0.0, %v2242_v12  ;;  %v2228_v9 = vmul.f32 %v2185_v19, %v2148_v62 }
 0x362   : > { %v2155_v18 = vsub.f32 1.0, %v5127_v1 }
 0x363   : > { %v2243_v57 = vadd.f32 %v2227_v61, %v2131_v11  ;;  %2362 = vperm.xlu0 %2890, %v2257_v53   ;;  %v2244_v28 = vadd.f32 %v2228_v9, %v2132_v36  ;;  %2367 = vperm.xlu1 %2889, %v2258_v37   ;;  %v5129_v61 = vld [vmem:[#allocation25_spill] sm:$0xff]  ;;  %v5130_v36 = vld [vmem:[#allocation28_spill] sm:$0xff] }
 0x364   : > { %v2187_v60 = vpop.permute.xlu1 %2186  ;;  %v2189_v6 = vpop.permute.xlu0 %2188  ;;  %v2157_v19 = vsub.f32 1.0, %v5129_v61  ;;  %v2158_v37 = vsub.f32 1.0, %v5130_v36  ;;  %v2141_v42 = vmul.f32 %v4647_v55, %v5129_v61  ;;  %v2142_v15 = vmul.f32 %v4649_v4, %v5130_v36 }
 0x365   : > { %v2259_v32 = vsub.f32 0.0, %v2243_v57  ;;  %v2229_v17 = vmul.f32 %v2187_v60, %v2149_v30  ;;  %v2260_v51 = vsub.f32 0.0, %v2244_v28  ;;  %v2230_v14 = vmul.f32 %v2189_v6, %v2150_v31 }
 0x367   : > { %v2245_v39 = vadd.f32 %v2229_v17, %v2133_v27  ;;  %v2246_v43 = vadd.f32 %v2230_v14, %v2134_v20  ;;  %2372 = vperm.xlu1 %2889, %v2259_v32   ;;  %2377 = vperm.xlu0 %2890, %v2260_v51   ;;  %v5131_v27 = vld [vmem:[#allocation27_spill] sm:$0xff] }
 0x368   : > { %v2191_v41 = vpop.permute.xlu1 %2190  ;;  %v2193_v56 = vpop.permute.xlu0 %2192  ;;  %v2159_v32 = vsub.f32 1.0, %v5131_v27  ;;  %v2143_v51 = vmul.f32 %v4652_v50, %v5131_v27 }
 0x369   : > { %v2261_v59 = vsub.f32 0.0, %v2245_v39  ;;  %v2231_v63 = vmul.f32 %v2191_v41, %v2151_v35  ;;  %v2262_v45 = vsub.f32 0.0, %v2246_v43  ;;  %v2232_v44 = vmul.f32 %v2193_v56, %v2152_v38 }
 0x36b   : > { %v2247_v33 = vadd.f32 %v2231_v63, %v2135_v22  ;;  %v2248_v40 = vadd.f32 %v2232_v44, %v2136_v26  ;;  %2382 = vperm.xlu1 %2889, %v2261_v59   ;;  %2387 = vperm.xlu0 %2890, %v2262_v45  }
 0x36c   : > { %v2195_v29 = vpop.permute.xlu1 %2194  ;;  %v2197_v47 = vpop.permute.xlu0 %2196 }
 0x36d   : > { %v2263_v7 = vsub.f32 0.0, %v2247_v33  ;;  %v2233_v49 = vmul.f32 %v2195_v29, %v2153_v8  ;;  %v2264_v10 = vsub.f32 0.0, %v2248_v40  ;;  %v2234_v23 = vmul.f32 %v2197_v47, %v2154_v46 }
 0x36e   : > { %v5132_v46 = vlaneseq }
 0x36f   : > { %v2249_v62 = vadd.f32 %v2233_v49, %v2137_v58  ;;  %v2250_v24 = vadd.f32 %v2234_v23, %v2138_v3  ;;  %2392 = vperm.xlu1 %2889, %v2263_v7   ;;  %2397 = vperm.xlu0 %2890, %v2264_v10  }
 0x370   : > { %v2199_v12 = vpop.permute.xlu1 %2198  ;;  %v2201_v53 = vpop.permute.xlu0 %2200  ;;  %v2273_v33 = vand.u32 127, %v5132_v46 }
 0x371   : > { %v2265_v52 = vsub.f32 0.0, %v2249_v62  ;;  %v2235_v11 = vmul.f32 %v2199_v12, %v2155_v18  ;;  %v2266_v16 = vsub.f32 0.0, %v2250_v24  ;;  %v2236_v30 = vmul.f32 %v2201_v53, %v2156_v2 }
 0x372   : > { %vm2274_vm3 = vcmp.lt.s32.totalorder %v2273_v33, 64 }
 0x373   : > { %v2251_v9 = vadd.f32 %v2235_v11, %v2139_v25  ;;  %v2252_v5 = vadd.f32 %v2236_v30, %v2140_v48  ;;  %2402 = vperm.xlu1 %2889, %v2265_v52   ;;  %2407 = vperm.xlu0 %2890, %v2266_v16  }
 0x374   : > { %v2203_v31 = vpop.permute.xlu1 %2202  ;;  %v2205_v60 = vpop.permute.xlu0 %2204 }
 0x375   : > { %v2267_v57 = vsub.f32 0.0, %v2251_v9  ;;  %v2237_v28 = vmul.f32 %v2203_v31, %v2157_v19  ;;  %v2268_v17 = vsub.f32 0.0, %v2252_v5  ;;  %v2238_v6 = vmul.f32 %v2205_v60, %v2158_v37 }
 0x377   : > { %v2253_v54 = vadd.f32 %v2237_v28, %v2141_v42  ;;  %v2254_v35 = vadd.f32 %v2238_v6, %v2142_v15  ;;  %2412 = vperm.xlu1 %2889, %v2267_v57   ;;  %2417 = vperm.xlu0 %2890, %v2268_v17  }
 0x378   : > { %v2207_v20 = vpop.permute.xlu1 %2206 }
 0x379   : > { %v2269_v14 = vsub.f32 0.0, %v2253_v54  ;;  %v2239_v55 = vmul.f32 %v2207_v20, %v2159_v32  ;;  %v2270_v0 = vsub.f32 0.0, %v2254_v35 }
 0x37b   : > { %v2255_v38 = vadd.f32 %v2239_v55, %v2143_v51  ;;  %2422 = vperm.xlu1 %2889, %v2269_v14   ;;  %2427 = vperm.xlu0 %2890, %v2270_v0  }
 0x37d   : > { %v2271_v39 = vsub.f32 0.0, %v2255_v38 }
 0x37f   : > { %2432 = vperm.xlu1 %2889, %v2271_v39  }
 0x39a   : > { %v2278_v4 = vpop.permute.xlu0 %2277 }
 0x39e   : > { %v2283_v43 = vpop.permute.xlu1 %2282 }
 0x3a2   : > { %v2288_v41 = vpop.permute.xlu1 %2287  ;;  %v2293_v22 = vpop.permute.xlu0 %2292 }
 0x3a6   : > { %v2298_v59 = vpop.permute.xlu1 %2297  ;;  %v2303_v63 = vpop.permute.xlu0 %2302 }
 0x3aa   : > { %v2308_v56 = vpop.permute.xlu1 %2307  ;;  %v2313_v34 = vpop.permute.xlu0 %2312 }
 0x3ae   : > { %v2318_v8 = vpop.permute.xlu1 %2317  ;;  %v2323_v26 = vpop.permute.xlu0 %2322 }
 0x3b2   : > { %v2328_v50 = vpop.permute.xlu1 %2327  ;;  %v2333_v45 = vpop.permute.xlu0 %2332 }
 0x3b6   : > { %v2338_v44 = vpop.permute.xlu1 %2337  ;;  %v2343_v13 = vpop.permute.xlu0 %2342 }
 0x3ba   : > { %v2348_v40 = vpop.permute.xlu1 %2347  ;;  %v2353_v29 = vpop.permute.xlu0 %2352 }
 0x3de   : > { %v2358_v58 = vpop.permute.xlu1 %2357 }
 0x3df   : > { %v2435_v7 = vsel %vm2274_vm3, %v2278_v4, %v2358_v58 }
 0x3e0   : > { %2451 = vst [vmem:[%s3216_s12] sm:$0xff] %v2435_v7 }
 0x3e2   : > { %v2363_v49 = vpop.permute.xlu0 %2362  ;;  %v2368_v47 = vpop.permute.xlu1 %2367 }
 0x3e3   : > { %v2436_v1 = vsel %vm2274_vm3, %v2283_v43, %v2363_v49  ;;  %v2437_v18 = vsel %vm2274_vm3, %v2288_v41, %v2368_v47 }
 0x3e4   : > { %2452 = vst [vmem:[%s3216_s12 + $0x8] sm:$0xff] %v2436_v1  ;;  %2453 = vst [vmem:[%s3216_s12 + $0x10] sm:$0xff] %v2437_v18 }
 0x3e6   : > { %v2373_v3 = vpop.permute.xlu1 %2372  ;;  %v2378_v10 = vpop.permute.xlu0 %2377 }
 0x3e7   : > { %v2438_v23 = vsel %vm2274_vm3, %v2293_v22, %v2373_v3  ;;  %v2439_v21 = vsel %vm2274_vm3, %v2298_v59, %v2378_v10 }
 0x3e8   : > { %2454 = vst [vmem:[%s3216_s12 + $0x18] sm:$0xff] %v2438_v23  ;;  %2455 = vst [vmem:[%s3216_s12 + $0x20] sm:$0xff] %v2439_v21 }
 0x3ea   : > { %v2383_v2 = vpop.permute.xlu1 %2382  ;;  %v2388_v62 = vpop.permute.xlu0 %2387 }
 0x3eb   : > { %v2440_v24 = vsel %vm2274_vm3, %v2303_v63, %v2383_v2  ;;  %v2441_v12 = vsel %vm2274_vm3, %v2308_v56, %v2388_v62 }
 0x3ec   : > { %2456 = vst [vmem:[%s3216_s12 + $0x28] sm:$0xff] %v2440_v24  ;;  %2457 = vst [vmem:[%s3216_s12 + $0x30] sm:$0xff] %v2441_v12 }
 0x3ee   : > { %v2393_v25 = vpop.permute.xlu1 %2392  ;;  %v2398_v52 = vpop.permute.xlu0 %2397 }
 0x3ef   : > { %v2442_v11 = vsel %vm2274_vm3, %v2313_v34, %v2393_v25  ;;  %v2443_v53 = vsel %vm2274_vm3, %v2318_v8, %v2398_v52 }
 0x3f0   : > { %2458 = vst [vmem:[%s3216_s12 + $0x38] sm:$0xff] %v2442_v11  ;;  %2459 = vst [vmem:[%s3216_s12 + $0x40] sm:$0xff] %v2443_v53 }
 0x3f2   : > { %v2403_v61 = vpop.permute.xlu1 %2402  ;;  %v2408_v19 = vpop.permute.xlu0 %2407 }
 0x3f3   : > { %v2444_v48 = vsel %vm2274_vm3, %v2323_v26, %v2403_v61  ;;  %v2445_v16 = vsel %vm2274_vm3, %v2328_v50, %v2408_v19 }
 0x3f4   : > { %2460 = vst [vmem:[%s3216_s12 + $0x48] sm:$0xff] %v2444_v48  ;;  %2461 = vst [vmem:[%s3216_s12 + $0x50] sm:$0xff] %v2445_v16 }
 0x3f6   : > { %v2413_v30 = vpop.permute.xlu1 %2412  ;;  %v2418_v36 = vpop.permute.xlu0 %2417 }
 0x3f7   : > { %v2446_v37 = vsel %vm2274_vm3, %v2333_v45, %v2413_v30  ;;  %v2447_v9 = vsel %vm2274_vm3, %v2338_v44, %v2418_v36 }
 0x3f8   : > { %2462 = vst [vmem:[%s3216_s12 + $0x58] sm:$0xff] %v2446_v37  ;;  %2463 = vst [vmem:[%s3216_s12 + $0x60] sm:$0xff] %v2447_v9 }
 0x3fa   : > { %v2423_v5 = vpop.permute.xlu1 %2422  ;;  %v2428_v31 = vpop.permute.xlu0 %2427 }
 0x3fb   : > { %v2448_v42 = vsel %vm2274_vm3, %v2343_v13, %v2423_v5  ;;  %v2449_v57 = vsel %vm2274_vm3, %v2348_v40, %v2428_v31 }
 0x3fc   : > { %2464 = vst [vmem:[%s3216_s12 + $0x68] sm:$0xff] %v2448_v42  ;;  %2465 = vst [vmem:[%s3216_s12 + $0x70] sm:$0xff] %v2449_v57 }
 0x3fe   : > { %v2433_v28 = vpop.permute.xlu1 %2432 }
 0x3ff   : > { %v2450_v60 = vsel %vm2274_vm3, %v2353_v29, %v2433_v28 }
 0x400   : > { %2466 = vst [vmem:[%s3216_s12 + $0x78] sm:$0xff] %v2450_v60 }
 0x401 PF: > { %s2644_s25 = sshll.u32 %s3069_s19, 11  ;;  %s2481_s9 = sshll.u32 %s3216_s12, 4  ;;  %s4732_s9 = int_to_ptr.vmem [resolvable:$true] %s2481_s9 }
 0x402   : > { %s4729_s8 = scalar_lea.hbm %s4792_s4, %s2644_s25  ;;  %s5133_s10 = sand.u32 1, %s3057_s16  }
 0x403   : > { %s4736_s13 = scalar_lea.sflag [#allocation7], %s5133_s10  ;;  %s2987_s14 = scalar_lea.vmem %s4732_s9, 2048 }
 0x404   : > { %p2988_p4 = scmp.ne.s32.totalorder %s4732_s9, %s2987_s14  ;;  %s3092_s19 = smov [#allocation6]  }
 0x405   : > { %s2991_s23 = sshll.u32 %s3092_s19, 4  ;;  %s2992_s23 = int_to_ptr.vmem [resolvable:$false] %s2991_s23 }
 0x406   : > { %p2989_p5 = pnand %p2988_p4, %p3169_p3  ;;  %s2993_s24 = scalar_lea.vmem %s2992_s23, 4096 }
 0x407   : > { %p2994_p7 = scmp.lt.s32.totalorder %s4732_s9, %s2992_s23  ;;  %p2995_p8 = scmp.lt.s32.totalorder %s2993_s24, %s2987_s14 }
 0x408   : > { %p2990_p6 = pneg %p2989_p5 }
 0x409   : > { %p2996_p10 = por %p2995_p8, %p2994_p7 }
 0x40b   : > { %p2997_p11 = pnand %p2996_p10, %p2990_p6 }
 0x40d   : > { %3000 = shalt.err (!%p2997_p11)
}
 0x40e   : > { %s3001_s29 = scalar_lea.hbm %s4729_s8, 2048  ;;  %s3005_s11 = scalar_lea.hbm %s4792_s4, 4096 }
 0x40f   : > { %p3002_p12 = scmp.ne.s32.totalorder %s4729_s8, %s3001_s29  ;;  %p3006_p1 = scmp.lt.u32.totalorder %s4729_s8, %s4792_s4 }
 0x410   : > { %p3007_p2 = scmp.lt.u32.totalorder %s3005_s11, %s3001_s29  ;;  %p3009_p5 = scmp.lt.u32.totalorder %s3001_s29, %s4729_s8 }
 0x411   : > { %p3003_p13 = pnand %p3002_p12, %p3169_p3 }
 0x412   : > { %p3008_p4 = por %p3007_p2, %p3006_p1 }
 0x413   : > { %p3004_p0 = pneg %p3003_p13 }
 0x414   : > { %p3010_p6 = por %p3009_p5, %p3008_p4 }
 0x416   : > { %p3011_p7 = pnand %p3010_p6, %p3004_p0 }
 0x418   : > { %3014 = shalt.err (!%p3011_p7)
}
 0x419   : > { %s3093_s20 = smov 128   ;;  %s3094_s21 = smov 8  }
 0x41a   : > { %2797 = dma.vmem_to_hbm [thread:$0]  (%p3169_p3), %s4732_s9, 2048, %s4729_s8, %s4736_s13, %s3093_s20, %s3093_s20, %s3094_s21  }
 0x41b PF: > { %p2803_p8 = scmp.ge.s32.totalorder %s3081_s22, 2  ;;  %s2496_s25 = sand.u32 1, %s3053_s15  }
 0x41c   : > { %s2497_s26 = scalar_lea.sflag [#allocation7], %s2496_s25 }
 0x41d   : > { %p2800_p10 = pnand %p2803_p8, %p3179_p9 }
 0x41f   : > { %3048 = dma.done.wait (!%p2800_p10), %s2497_s26, 2048  }
 0x420   : > { %3050 = vsyncadd (!%p2800_p10), %s2497_s26, 4294965248  ;;  %s17_s22 = sadd.s32 1, %s3081_s22   ;;  %s5134_s18 = sld [smem:[#allocation9_spill]] }
 0x421   : > { %p14_p11 = scmp.ge.s32.totalorder %s17_s22, 6   ;;  %s5135_s19 = sld [smem:[#allocation10_spill]] }
 0x422   : > { %s5136_s20 = sld [smem:[#allocation11_spill]]  ;;  %s5137_s21 = sld [smem:[#allocation12_spill]] }
 0x423   : > { %s5138_s15 = smov %s3057_s16  ;;  %s5139_s16 = smov %s3061_s17 }
 0x424   : > { %s5140_s17 = smov %s3187_s5  ;;  %16 = sbr.rel (!%p14_p11) target bundleno = 5 (0x5), region = 88 }
 0x42b   :  { %2502 = vsyncpa [#allocation7], 1 }
 0x42c   :  { %2504 = vsyncpa [#allocation7 + $0x1], 1 }

</bundles_post_ra>
